<compile_context>
chip_gen: v6e
topology: v6e:2x2x1
jax: 0.10.0
libtpu: 0.0.40
codegen_flags: <defaults>
</compile_context>

<pallas_src>
import jax
import jax.numpy as jnp
from jax.experimental import pallas as pl
from jax.experimental.pallas import tpu as pltpu

NHIDDEN = 128   # nhidden in the PyTorch module
KS = 3          # kernel size
EPS = 1e-5      # BatchNorm2d default eps


# --------------------------------------------------------------------------- #
# SPADE kernel: one (image, TH-row band) tile
# --------------------------------------------------------------------------- #
def spade_kernel(x_ref, cols_ref, scale_ref, shift_ref,
                 w1_ref, b1_ref, wgb_ref, bgb_ref,
                 o_ref, actv_ref, acols_ref):
    """One (batch image, TH-row band) tile of the SPADE forward pass.

    x_ref    : (1, TH, W, C)          input tile (f32, NHWC)
    cols_ref : (1, TH+2, W, 9*Cin)    im2col band of ref (bf16); local row i
                                      holds the 3x3 patch for hidden row
                                      t*TH - 1 + i (rows 0 / TH+1 are the halo)
    scale/shift : (1, C)              folded BatchNorm scale / shift (f32)
    w1_ref   : (9*Cin, 128)           mlp_shared weight, im2col layout (bf16)
    b1_ref   : (1, 128)               mlp_shared bias (f32)
    wgb_ref  : (9*128, 2C)            fused+flattened mlp_gamma|mlp_beta weight (bf16)
    bgb_ref  : (1, 2C)                fused gamma|beta bias (f32)
    o_ref    : (1, TH, W, C)          output tile (f32)
    actv_ref : (TH+2, W+2, 128)       bf16 scratch: hidden activation + 1px halo
    acols_ref: (TH*W, 9*128)          bf16 scratch: im2col of the hidden activation
    """
    TH = cols_ref.shape[1] - 2
    W = cols_ref.shape[2]
    C = x_ref.shape[3]
    t = pl.program_id(1)

    # ---- mlp_shared: ONE im2col matmul (K = 9*Cin) for the TH+2 hidden rows
    #      this band needs (TH interior rows + 1-row halo above/below).
    patches = cols_ref[0].reshape((TH + 2) * W, cols_ref.shape[-1])
    hid = jnp.dot(patches, w1_ref[...], preferred_element_type=jnp.float32)
    hid = jnp.maximum(hid + b1_ref[...], 0.0)
    actv_ref[:, 1:1 + W, :] = hid.reshape(TH + 2, W, NHIDDEN).astype(actv_ref.dtype)

    # Conv zero-padding: side columns every step; top/bottom halo rows only at
    # the image boundary (interior-band halo rows hold real hidden rows).
    zcol = jnp.zeros((TH + 2, 1, NHIDDEN), actv_ref.dtype)
    actv_ref[:, 0:1, :] = zcol
    actv_ref[:, W + 1:W + 2, :] = zcol

    @pl.when(t == 0)
    def _():  # hidden row above the image is conv zero-padding
        actv_ref[0:1, :, :] = jnp.zeros((1, W + 2, NHIDDEN), actv_ref.dtype)

    @pl.when(t == pl.num_programs(1) - 1)
    def _():  # hidden row below the image is conv zero-padding
        actv_ref[TH + 1:TH + 2, :, :] = jnp.zeros((1, W + 2, NHIDDEN), actv_ref.dtype)

    # ---- im2col of the hidden activation: 9 lane-aligned 128-wide writes ...
    for ky in range(KS):
        for kx in range(KS):
            tap = ky * KS + kx
            acols_ref[:, tap * NHIDDEN:(tap + 1) * NHIDDEN] = (
                actv_ref[ky:ky + TH, kx:kx + W, :].reshape(TH * W, NHIDDEN))

    # ---- ... then ONE fused K=1152 matmul for gamma|beta (f32 accumulation).
    gb = jnp.dot(acols_ref[...], wgb_ref[...],
                 preferred_element_type=jnp.float32) + bgb_ref[...]       # (TH*W, 2C)
    gb = gb.reshape(TH, W, 2 * C)
    gamma = gb[:, :, :C]
    beta = gb[:, :, C:]

    # ---- BatchNorm apply + SPADE modulation (all f32) -------------------------
    normalized = x_ref[0].astype(jnp.float32) * scale_ref[...] + shift_ref[...]
    o_ref[0] = (normalized * (1.0 + gamma) + beta).astype(o_ref.dtype)
    # TODO(synk): for tiny norm_nc (C << 128) the store is lane-thin; a (W*C)
    # lane-folded output layout would need a minor-dim merge reshape of
    # gamma/beta in-kernel, gated off to stay on proven Mosaic reshape patterns
    # (moot once norm_nc >= 128 where the store is already lane-dense).


# --------------------------------------------------------------------------- #
# Tile-size selection from an explicit VMEM budget
# --------------------------------------------------------------------------- #
def _estimate_vmem_bytes(th, W, C, cin9):
    """Rough per-core VMEM working set for one (image, row-band) grid step."""
    x_blk = 2 * th * W * C * 4                        # double-buffered input tile
    o_blk = 2 * th * W * C * 4                        # double-buffered output tile
    c_blk = 2 * (th + 2) * W * cin9 * 2               # double-buffered im2col band
    actv = (th + 2) * (W + 2) * NHIDDEN * 2           # hidden activation scratch
    acols = th * W * KS * KS * NHIDDEN * 2            # hidden im2col scratch
    hid = (th + 2) * W * NHIDDEN * 4                  # live f32 mlp_shared result
    gb = th * W * 2 * C * 4                           # live f32 gamma|beta result
    weights = (cin9 * NHIDDEN * 2 + KS * KS * NHIDDEN * 2 * C * 2
               + 4 * (NHIDDEN + 4 * C))
    return x_blk + o_blk + c_blk + actv + acols + hid + gb + 2 * weights


def _pick_row_tile(H, W, C, cin9, budget_bytes=12 * 1024 * 1024):
    """Largest divisor of H whose per-step working set fits the VMEM budget."""
    best = 1
    for th in range(1, H + 1):
        if H % th == 0 and _estimate_vmem_bytes(th, W, C, cin9) <= budget_bytes:
            best = th
    return best


# --------------------------------------------------------------------------- #
# Wrapper
# --------------------------------------------------------------------------- #
def spade_forward(x_nchw, ref_nchw, params, row_tile=None):
    """SPADE forward. NCHW in / NCHW out (PyTorch convention)."""
    N, C, H, W = x_nchw.shape
    Cin = ref_nchw.shape[1]
    cin9 = KS * KS * Cin
    TH = _pick_row_tile(H, W, C, cin9) if row_tile is None else row_tile
    assert H % TH == 0
    nT = H // TH

    x_nchw = x_nchw.astype(jnp.float32)

    # ---- BatchNorm batch statistics as a plain XLA reduction (training-mode
    #      BN: biased batch variance), folded into per-channel scale / shift.
    mean = jnp.mean(x_nchw, axis=(0, 2, 3))
    var = jnp.var(x_nchw, axis=(0, 2, 3))
    inv = jax.lax.rsqrt(var + EPS)
    scale = (params["bn_w"] * inv).reshape(1, C).astype(jnp.float32)
    shift = (params["bn_b"] - mean * params["bn_w"] * inv).reshape(1, C).astype(jnp.float32)

    # ---- layout glue: NCHW -> NHWC ------------------------------------------
    x = jnp.transpose(x_nchw, (0, 2, 3, 1))                                # (N,H,W,C)
    r = jnp.transpose(ref_nchw, (0, 2, 3, 1)).astype(jnp.float32)          # (N,H,W,Cin)

    # ---- im2col of the tiny (Cin-channel) ref map, pre-banded so the kernel
    #      only keeps TH+2 rows resident in VMEM per grid step.
    rp = jnp.pad(r, ((0, 0), (1, 1), (1, 1), (0, 0)))
    cols = jnp.concatenate(
        [rp[:, ky:ky + H, kx:kx + W, :] for ky in range(KS) for kx in range(KS)],
        axis=-1)                                                           # (N,H,W,9*Cin)
    cols = jnp.pad(cols, ((0, 0), (1, 1), (0, 0), (0, 0)))                 # halo rows (don't-care)
    cols_b = jnp.stack(
        [cols[:, t * TH:t * TH + TH + 2] for t in range(nT)], axis=1)
    cols_b = cols_b.reshape(N * nT, TH + 2, W, cin9).astype(jnp.bfloat16)  # (N*nT,TH+2,W,9Cin)

    # ---- weights: im2col mlp_shared, fused + flattened gamma|beta ------------
    w1 = params["w1"].reshape(cin9, NHIDDEN).astype(jnp.bfloat16)          # (9*Cin,128)
    b1 = params["b1"].reshape(1, NHIDDEN).astype(jnp.float32)
    wgb = jnp.concatenate([params["wg"], params["wb"]], axis=-1)           # (3,3,128,2C)
    wgb = wgb.reshape(KS * KS * NHIDDEN, 2 * C).astype(jnp.bfloat16)       # (1152,2C)
    bgb = jnp.concatenate([params["bg"], params["bb"]],
                          axis=0).reshape(1, 2 * C).astype(jnp.float32)

    grid = (N, nT)
    out_nhwc = pl.pallas_call(
        spade_kernel,
        out_shape=jax.ShapeDtypeStruct((N, H, W, C), jnp.float32),
        grid_spec=pltpu.PrefetchScalarGridSpec(
            num_scalar_prefetch=0,
            grid=grid,
            in_specs=[
                pl.BlockSpec((1, TH, W, C), lambda n, t: (n, t, 0, 0)),        # x tile
                pl.BlockSpec((1, TH + 2, W, cin9),
                             lambda n, t: (n * nT + t, 0, 0, 0)),              # im2col band
                pl.BlockSpec((1, C), lambda n, t: (0, 0)),                     # BN scale
                pl.BlockSpec((1, C), lambda n, t: (0, 0)),                     # BN shift
                pl.BlockSpec((cin9, NHIDDEN), lambda n, t: (0, 0)),            # w1
                pl.BlockSpec((1, NHIDDEN), lambda n, t: (0, 0)),               # b1
                pl.BlockSpec((KS * KS * NHIDDEN, 2 * C), lambda n, t: (0, 0)), # wg|wb flat
                pl.BlockSpec((1, 2 * C), lambda n, t: (0, 0)),                 # bg|bb
            ],
            out_specs=pl.BlockSpec((1, TH, W, C), lambda n, t: (n, t, 0, 0)),
            scratch_shapes=[
                pltpu.VMEM((TH + 2, W + 2, NHIDDEN), jnp.bfloat16),            # actv + halo
                pltpu.VMEM((TH * W, KS * KS * NHIDDEN), jnp.bfloat16),         # actv im2col
            ]),
        compiler_params=pltpu.CompilerParams(
            dimension_semantics=("parallel", "parallel"),
            vmem_limit_bytes=32 * 1024 * 1024),
    )(x, cols_b, scale, shift, w1, b1, wgb, bgb)

    return jnp.transpose(out_nhwc, (0, 3, 1, 2))                           # back to NCHW


# --------------------------------------------------------------------------- #
# Parameters / reference
# --------------------------------------------------------------------------- #
def init_params(key, norm_nc, label_nc=3):
    """Deterministic synthetic parameters (shapes per SPADE.__init__)."""
    ks = jax.random.split(key, 8)
    return {
        "bn_w": 1.0 + 0.1 * jax.random.normal(ks[0], (norm_nc,), jnp.float32),
        "bn_b": 0.1 * jax.random.normal(ks[1], (norm_nc,), jnp.float32),
        "w1":  0.10 * jax.random.normal(ks[2], (KS, KS, label_nc, NHIDDEN), jnp.float32),
        "b1":  0.10 * jax.random.normal(ks[3], (NHIDDEN,), jnp.float32),
        "wg":  0.02 * jax.random.normal(ks[4], (KS, KS, NHIDDEN, norm_nc), jnp.float32),
        "bg":  0.10 * jax.random.normal(ks[5], (norm_nc,), jnp.float32),
        "wb":  0.02 * jax.random.normal(ks[6], (KS, KS, NHIDDEN, norm_nc), jnp.float32),
        "bb":  0.10 * jax.random.normal(ks[7], (norm_nc,), jnp.float32),
    }


def spade_reference(x_nchw, ref_nchw, p):
    """Pure-JAX reference (same math, XLA conv) for validation."""
    x = jnp.transpose(x_nchw, (0, 2, 3, 1))
    r = jnp.transpose(ref_nchw, (0, 2, 3, 1))
    mean = jnp.mean(x, axis=(0, 1, 2), keepdims=True)
    var = jnp.var(x, axis=(0, 1, 2), keepdims=True)          # biased, like PyTorch BN
    norm = (x - mean) * jax.lax.rsqrt(var + EPS) * p["bn_w"] + p["bn_b"]

    def conv(inp, w, b):
        y = jax.lax.conv_general_dilated(
            inp, w, window_strides=(1, 1), padding="SAME",
            dimension_numbers=("NHWC", "HWIO", "NHWC"),
            precision=jax.lax.Precision.HIGHEST)
        return y + b

    actv = jax.nn.relu(conv(r, p["w1"], p["b1"]))
    gamma = conv(actv, p["wg"], p["bg"])
    beta = conv(actv, p["wb"], p["bb"])
    out = norm * (1.0 + gamma) + beta
    return jnp.transpose(out, (0, 3, 1, 2))


if __name__ == "__main__":
    key = jax.random.PRNGKey(0)
    k_x, k_r, k_p = jax.random.split(key, 3)

    N, C, H, W = 2, 4, 16, 16          # norm_nc = 4
    label_nc = 3

    x = jax.random.normal(k_x, (N, C, H, W), jnp.float32)
    ref = jax.random.normal(k_r, (N, label_nc, H, W), jnp.float32)
    params = init_params(k_p, C, label_nc)

    out = jax.block_until_ready(spade_forward(x, ref, params))
    expected = jax.block_until_ready(spade_reference(x, ref, params))

    assert out.shape == (N, C, H, W), out.shape
    assert bool(jnp.all(jnp.isfinite(out)))
    max_err = float(jnp.max(jnp.abs(out - expected)))
    assert max_err < 5e-2, f"max abs error {max_err}"

    print("KERNEL_OK")
</pallas_src>

<mosaic_0001>
module attributes {stable_mosaic.version = 11 : i64} {
  func.func @spade_kernel(%arg0: i32, %arg1: i32, %arg2: memref<1x16x16x4xf32, #tpu.memory_space<vmem>>, %arg3: memref<1x18x16x27xbf16, #tpu.memory_space<vmem>>, %arg4: memref<1x4xf32, #tpu.memory_space<vmem>>, %arg5: memref<1x4xf32, #tpu.memory_space<vmem>>, %arg6: memref<27x128xbf16, #tpu.memory_space<vmem>>, %arg7: memref<1x128xf32, #tpu.memory_space<vmem>>, %arg8: memref<1152x8xbf16, #tpu.memory_space<vmem>>, %arg9: memref<1x8xf32, #tpu.memory_space<vmem>>, %arg10: memref<1x16x16x4xf32, #tpu.memory_space<vmem>>, %arg11: memref<18x18x128xbf16, #tpu.memory_space<vmem>>, %arg12: memref<256x1152xbf16, #tpu.memory_space<vmem>>) attributes {dimension_semantics = [#tpu.dimension_semantics<parallel>, #tpu.dimension_semantics<parallel>], iteration_bounds = array<i64: 2, 1>, scalar_prefetch = 0 : i64, scratch_operands = 2 : i64, tpu.core_type = #tpu.core_type<tc>, window_params = [{transform_indices = @transform_0, window_bounds = array<i64: 1, 16, 16, 4>}, {transform_indices = @transform_1, window_bounds = array<i64: 1, 18, 16, 27>}, {pipeline_mode = #tpu.pipeline_mode<synchronous>, transform_indices = @transform_2, window_bounds = array<i64: 1, 4>}, {pipeline_mode = #tpu.pipeline_mode<synchronous>, transform_indices = @transform_3, window_bounds = array<i64: 1, 4>}, {pipeline_mode = #tpu.pipeline_mode<synchronous>, transform_indices = @transform_4, window_bounds = array<i64: 27, 128>}, {pipeline_mode = #tpu.pipeline_mode<synchronous>, transform_indices = @transform_5, window_bounds = array<i64: 1, 128>}, {pipeline_mode = #tpu.pipeline_mode<synchronous>, transform_indices = @transform_6, window_bounds = array<i64: 1152, 8>}, {pipeline_mode = #tpu.pipeline_mode<synchronous>, transform_indices = @transform_7, window_bounds = array<i64: 1, 8>}, {transform_indices = @transform_8, window_bounds = array<i64: 1, 16, 16, 4>}]} {
    %c0 = arith.constant 0 : index
    %c0_0 = arith.constant 0 : index
    %c0_1 = arith.constant 0 : index
    %c0_2 = arith.constant 0 : index
    %0 = vector.load %arg3[%c0, %c0_0, %c0_1, %c0_2] : memref<1x18x16x27xbf16, #tpu.memory_space<vmem>>, vector<1x18x16x27xbf16>
    %1 = vector.shape_cast %0 : vector<1x18x16x27xbf16> to vector<18x16x27xbf16>
    %2 = vector.shape_cast %1 : vector<18x16x27xbf16> to vector<288x27xbf16>
    %c0_3 = arith.constant 0 : index
    %c0_4 = arith.constant 0 : index
    %3 = vector.load %arg6[%c0_3, %c0_4] : memref<27x128xbf16, #tpu.memory_space<vmem>>, vector<27x128xbf16>
    %cst = arith.constant dense<0.000000e+00> : vector<288x128xf32>
    %4 = tpu.matmul %2, %3, %cst {dimension_numbers = #tpu.dot_dimension_numbers<[1], [0], [0], [1], [0, 0, 1, 1], [], []>} : vector<288x27xbf16>, vector<27x128xbf16>, vector<288x128xf32> -> vector<288x128xf32>
    %c0_5 = arith.constant 0 : index
    %c0_6 = arith.constant 0 : index
    %5 = vector.load %arg7[%c0_5, %c0_6] : memref<1x128xf32, #tpu.memory_space<vmem>>, vector<1x128xf32>
    %6 = vector.broadcast %5 : vector<1x128xf32> to vector<288x128xf32>
    %7 = arith.addf %4, %6 : vector<288x128xf32>
    %cst_7 = arith.constant 0.000000e+00 : f32
    %8 = vector.broadcast %cst_7 : f32 to vector<288x128xf32>
    %9 = arith.maximumf %7, %8 : vector<288x128xf32>
    %10 = vector.shape_cast %9 : vector<288x128xf32> to vector<18x16x128xf32>
    %11 = arith.truncf %10 : vector<18x16x128xf32> to vector<18x16x128xbf16>
    %c0_8 = arith.constant 0 : index
    %c1 = arith.constant 1 : index
    %c0_9 = arith.constant 0 : index
    %12 = vector.load %arg11[%c0_8, %c1, %c0_9] : memref<18x18x128xbf16, #tpu.memory_space<vmem>>, vector<18x16x128xbf16>
    tpu.vector_store %arg11[%c0_8, %c1, %c0_9], %11 {strides = array<i32>} : memref<18x18x128xbf16, #tpu.memory_space<vmem>>, vector<18x16x128xbf16>,
    %cst_10 = arith.constant 0.000000e+00 : bf16
    %13 = vector.broadcast %cst_10 : bf16 to vector<18x1x128xbf16>
    %c0_11 = arith.constant 0 : index
    %c0_12 = arith.constant 0 : index
    %c0_13 = arith.constant 0 : index
    %14 = vector.load %arg11[%c0_11, %c0_12, %c0_13] : memref<18x18x128xbf16, #tpu.memory_space<vmem>>, vector<18x1x128xbf16>
    tpu.vector_store %arg11[%c0_11, %c0_12, %c0_13], %13 {strides = array<i32>} : memref<18x18x128xbf16, #tpu.memory_space<vmem>>, vector<18x1x128xbf16>,
    %c0_14 = arith.constant 0 : index
    %c17 = arith.constant 17 : index
    %c0_15 = arith.constant 0 : index
    %15 = vector.load %arg11[%c0_14, %c17, %c0_15] : memref<18x18x128xbf16, #tpu.memory_space<vmem>>, vector<18x1x128xbf16>
    tpu.vector_store %arg11[%c0_14, %c17, %c0_15], %13 {strides = array<i32>} : memref<18x18x128xbf16, #tpu.memory_space<vmem>>, vector<18x1x128xbf16>,
    %c0_i32 = arith.constant 0 : i32
    %16 = arith.cmpi eq, %arg1, %c0_i32 : i32
    %17 = arith.extui %16 : i1 to i32
    %c0_i32_16 = arith.constant 0 : i32
    %18 = arith.cmpi ne, %17, %c0_i32_16 : i32
    scf.if %18 {
      %cst_75 = arith.constant 0.000000e+00 : bf16
      %75 = vector.broadcast %cst_75 : bf16 to vector<1x18x128xbf16>
      %c0_76 = arith.constant 0 : index
      %c0_77 = arith.constant 0 : index
      %c0_78 = arith.constant 0 : index
      %76 = vector.load %arg11[%c0_76, %c0_77, %c0_78] : memref<18x18x128xbf16, #tpu.memory_space<vmem>>, vector<1x18x128xbf16>
      tpu.vector_store %arg11[%c0_76, %c0_77, %c0_78], %75 {strides = array<i32>} : memref<18x18x128xbf16, #tpu.memory_space<vmem>>, vector<1x18x128xbf16>,
    } else {
    }
    %c0_i32_17 = arith.constant 0 : i32
    %19 = arith.cmpi eq, %arg1, %c0_i32_17 : i32
    %20 = arith.extui %19 : i1 to i32
    %c0_i32_18 = arith.constant 0 : i32
    %21 = arith.cmpi ne, %20, %c0_i32_18 : i32
    scf.if %21 {
      %cst_75 = arith.constant 0.000000e+00 : bf16
      %75 = vector.broadcast %cst_75 : bf16 to vector<1x18x128xbf16>
      %c17_76 = arith.constant 17 : index
      %c0_77 = arith.constant 0 : index
      %c0_78 = arith.constant 0 : index
      %76 = vector.load %arg11[%c17_76, %c0_77, %c0_78] : memref<18x18x128xbf16, #tpu.memory_space<vmem>>, vector<1x18x128xbf16>
      tpu.vector_store %arg11[%c17_76, %c0_77, %c0_78], %75 {strides = array<i32>} : memref<18x18x128xbf16, #tpu.memory_space<vmem>>, vector<1x18x128xbf16>,
    } else {
    }
    %c0_19 = arith.constant 0 : index
    %c0_20 = arith.constant 0 : index
    %c0_21 = arith.constant 0 : index
    %22 = vector.load %arg11[%c0_19, %c0_20, %c0_21] : memref<18x18x128xbf16, #tpu.memory_space<vmem>>, vector<16x16x128xbf16>
    %23 = vector.shape_cast %22 : vector<16x16x128xbf16> to vector<256x128xbf16>
    %c0_22 = arith.constant 0 : index
    %c0_23 = arith.constant 0 : index
    %24 = vector.load %arg12[%c0_22, %c0_23] : memref<256x1152xbf16, #tpu.memory_space<vmem>>, vector<256x128xbf16>
    tpu.vector_store %arg12[%c0_22, %c0_23], %23 {strides = array<i32>} : memref<256x1152xbf16, #tpu.memory_space<vmem>>, vector<256x128xbf16>,
    %c0_24 = arith.constant 0 : index
    %c1_25 = arith.constant 1 : index
    %c0_26 = arith.constant 0 : index
    %25 = vector.load %arg11[%c0_24, %c1_25, %c0_26] : memref<18x18x128xbf16, #tpu.memory_space<vmem>>, vector<16x16x128xbf16>
    %26 = vector.shape_cast %25 : vector<16x16x128xbf16> to vector<256x128xbf16>
    %c0_27 = arith.constant 0 : index
    %c128 = arith.constant 128 : index
    %27 = vector.load %arg12[%c0_27, %c128] : memref<256x1152xbf16, #tpu.memory_space<vmem>>, vector<256x128xbf16>
    tpu.vector_store %arg12[%c0_27, %c128], %26 {strides = array<i32>} : memref<256x1152xbf16, #tpu.memory_space<vmem>>, vector<256x128xbf16>,
    %c0_28 = arith.constant 0 : index
    %c2 = arith.constant 2 : index
    %c0_29 = arith.constant 0 : index
    %28 = vector.load %arg11[%c0_28, %c2, %c0_29] : memref<18x18x128xbf16, #tpu.memory_space<vmem>>, vector<16x16x128xbf16>
    %29 = vector.shape_cast %28 : vector<16x16x128xbf16> to vector<256x128xbf16>
    %c0_30 = arith.constant 0 : index
    %c256 = arith.constant 256 : index
    %30 = vector.load %arg12[%c0_30, %c256] : memref<256x1152xbf16, #tpu.memory_space<vmem>>, vector<256x128xbf16>
    tpu.vector_store %arg12[%c0_30, %c256], %29 {strides = array<i32>} : memref<256x1152xbf16, #tpu.memory_space<vmem>>, vector<256x128xbf16>,
    %c1_31 = arith.constant 1 : index
    %c0_32 = arith.constant 0 : index
    %c0_33 = arith.constant 0 : index
    %31 = vector.load %arg11[%c1_31, %c0_32, %c0_33] : memref<18x18x128xbf16, #tpu.memory_space<vmem>>, vector<16x16x128xbf16>
    %32 = vector.shape_cast %31 : vector<16x16x128xbf16> to vector<256x128xbf16>
    %c0_34 = arith.constant 0 : index
    %c384 = arith.constant 384 : index
    %33 = vector.load %arg12[%c0_34, %c384] : memref<256x1152xbf16, #tpu.memory_space<vmem>>, vector<256x128xbf16>
    tpu.vector_store %arg12[%c0_34, %c384], %32 {strides = array<i32>} : memref<256x1152xbf16, #tpu.memory_space<vmem>>, vector<256x128xbf16>,
    %c1_35 = arith.constant 1 : index
    %c1_36 = arith.constant 1 : index
    %c0_37 = arith.constant 0 : index
    %34 = vector.load %arg11[%c1_35, %c1_36, %c0_37] : memref<18x18x128xbf16, #tpu.memory_space<vmem>>, vector<16x16x128xbf16>
    %35 = vector.shape_cast %34 : vector<16x16x128xbf16> to vector<256x128xbf16>
    %c0_38 = arith.constant 0 : index
    %c512 = arith.constant 512 : index
    %36 = vector.load %arg12[%c0_38, %c512] : memref<256x1152xbf16, #tpu.memory_space<vmem>>, vector<256x128xbf16>
    tpu.vector_store %arg12[%c0_38, %c512], %35 {strides = array<i32>} : memref<256x1152xbf16, #tpu.memory_space<vmem>>, vector<256x128xbf16>,
    %c1_39 = arith.constant 1 : index
    %c2_40 = arith.constant 2 : index
    %c0_41 = arith.constant 0 : index
    %37 = vector.load %arg11[%c1_39, %c2_40, %c0_41] : memref<18x18x128xbf16, #tpu.memory_space<vmem>>, vector<16x16x128xbf16>
    %38 = vector.shape_cast %37 : vector<16x16x128xbf16> to vector<256x128xbf16>
    %c0_42 = arith.constant 0 : index
    %c640 = arith.constant 640 : index
    %39 = vector.load %arg12[%c0_42, %c640] : memref<256x1152xbf16, #tpu.memory_space<vmem>>, vector<256x128xbf16>
    tpu.vector_store %arg12[%c0_42, %c640], %38 {strides = array<i32>} : memref<256x1152xbf16, #tpu.memory_space<vmem>>, vector<256x128xbf16>,
    %c2_43 = arith.constant 2 : index
    %c0_44 = arith.constant 0 : index
    %c0_45 = arith.constant 0 : index
    %40 = vector.load %arg11[%c2_43, %c0_44, %c0_45] : memref<18x18x128xbf16, #tpu.memory_space<vmem>>, vector<16x16x128xbf16>
    %41 = vector.shape_cast %40 : vector<16x16x128xbf16> to vector<256x128xbf16>
    %c0_46 = arith.constant 0 : index
    %c768 = arith.constant 768 : index
    %42 = vector.load %arg12[%c0_46, %c768] : memref<256x1152xbf16, #tpu.memory_space<vmem>>, vector<256x128xbf16>
    tpu.vector_store %arg12[%c0_46, %c768], %41 {strides = array<i32>} : memref<256x1152xbf16, #tpu.memory_space<vmem>>, vector<256x128xbf16>,
    %c2_47 = arith.constant 2 : index
    %c1_48 = arith.constant 1 : index
    %c0_49 = arith.constant 0 : index
    %43 = vector.load %arg11[%c2_47, %c1_48, %c0_49] : memref<18x18x128xbf16, #tpu.memory_space<vmem>>, vector<16x16x128xbf16>
    %44 = vector.shape_cast %43 : vector<16x16x128xbf16> to vector<256x128xbf16>
    %c0_50 = arith.constant 0 : index
    %c896 = arith.constant 896 : index
    %45 = vector.load %arg12[%c0_50, %c896] : memref<256x1152xbf16, #tpu.memory_space<vmem>>, vector<256x128xbf16>
    tpu.vector_store %arg12[%c0_50, %c896], %44 {strides = array<i32>} : memref<256x1152xbf16, #tpu.memory_space<vmem>>, vector<256x128xbf16>,
    %c2_51 = arith.constant 2 : index
    %c2_52 = arith.constant 2 : index
    %c0_53 = arith.constant 0 : index
    %46 = vector.load %arg11[%c2_51, %c2_52, %c0_53] : memref<18x18x128xbf16, #tpu.memory_space<vmem>>, vector<16x16x128xbf16>
    %47 = vector.shape_cast %46 : vector<16x16x128xbf16> to vector<256x128xbf16>
    %c0_54 = arith.constant 0 : index
    %c1024 = arith.constant 1024 : index
    %48 = vector.load %arg12[%c0_54, %c1024] : memref<256x1152xbf16, #tpu.memory_space<vmem>>, vector<256x128xbf16>
    tpu.vector_store %arg12[%c0_54, %c1024], %47 {strides = array<i32>} : memref<256x1152xbf16, #tpu.memory_space<vmem>>, vector<256x128xbf16>,
    %c0_55 = arith.constant 0 : index
    %c0_56 = arith.constant 0 : index
    %49 = vector.load %arg12[%c0_55, %c0_56] : memref<256x1152xbf16, #tpu.memory_space<vmem>>, vector<256x1152xbf16>
    %c0_57 = arith.constant 0 : index
    %c0_58 = arith.constant 0 : index
    %50 = vector.load %arg8[%c0_57, %c0_58] : memref<1152x8xbf16, #tpu.memory_space<vmem>>, vector<1152x8xbf16>
    %cst_59 = arith.constant dense<0.000000e+00> : vector<256x8xf32>
    %51 = tpu.matmul %49, %50, %cst_59 {dimension_numbers = #tpu.dot_dimension_numbers<[1], [0], [0], [1], [0, 0, 1, 1], [], []>} : vector<256x1152xbf16>, vector<1152x8xbf16>, vector<256x8xf32> -> vector<256x8xf32>
    %c0_60 = arith.constant 0 : index
    %c0_61 = arith.constant 0 : index
    %52 = vector.load %arg9[%c0_60, %c0_61] : memref<1x8xf32, #tpu.memory_space<vmem>>, vector<1x8xf32>
    %53 = vector.broadcast %52 : vector<1x8xf32> to vector<256x8xf32>
    %54 = arith.addf %51, %53 : vector<256x8xf32>
    %55 = vector.shape_cast %54 : vector<256x8xf32> to vector<16x16x8xf32>
    %56 = vector.extract_strided_slice %55 {offsets = [0, 0, 0], sizes = [16, 16, 4], strides = [1, 1, 1]} : vector<16x16x8xf32> to vector<16x16x4xf32>
    %57 = vector.extract_strided_slice %55 {offsets = [0, 0, 4], sizes = [16, 16, 4], strides = [1, 1, 1]} : vector<16x16x8xf32> to vector<16x16x4xf32>
    %c0_62 = arith.constant 0 : index
    %c0_63 = arith.constant 0 : index
    %c0_64 = arith.constant 0 : index
    %c0_65 = arith.constant 0 : index
    %58 = vector.load %arg2[%c0_62, %c0_63, %c0_64, %c0_65] : memref<1x16x16x4xf32, #tpu.memory_space<vmem>>, vector<1x16x16x4xf32>
    %59 = vector.shape_cast %58 : vector<1x16x16x4xf32> to vector<16x16x4xf32>
    %c0_66 = arith.constant 0 : index
    %c0_67 = arith.constant 0 : index
    %60 = vector.load %arg4[%c0_66, %c0_67] : memref<1x4xf32, #tpu.memory_space<vmem>>, vector<1x4xf32>
    %61 = vector.shape_cast %60 : vector<1x4xf32> to vector<1x1x4xf32>
    %62 = vector.broadcast %61 : vector<1x1x4xf32> to vector<16x16x4xf32>
    %63 = arith.mulf %59, %62 : vector<16x16x4xf32>
    %c0_68 = arith.constant 0 : index
    %c0_69 = arith.constant 0 : index
    %64 = vector.load %arg5[%c0_68, %c0_69] : memref<1x4xf32, #tpu.memory_space<vmem>>, vector<1x4xf32>
    %65 = vector.shape_cast %64 : vector<1x4xf32> to vector<1x1x4xf32>
    %66 = vector.broadcast %65 : vector<1x1x4xf32> to vector<16x16x4xf32>
    %67 = arith.addf %63, %66 : vector<16x16x4xf32>
    %cst_70 = arith.constant 1.000000e+00 : f32
    %68 = vector.broadcast %cst_70 : f32 to vector<16x16x4xf32>
    %69 = arith.addf %68, %56 : vector<16x16x4xf32>
    %70 = arith.mulf %67, %69 : vector<16x16x4xf32>
    %71 = arith.addf %70, %57 : vector<16x16x4xf32>
    %c0_71 = arith.constant 0 : index
    %c0_72 = arith.constant 0 : index
    %c0_73 = arith.constant 0 : index
    %c0_74 = arith.constant 0 : index
    %72 = vector.load %arg10[%c0_71, %c0_72, %c0_73, %c0_74] : memref<1x16x16x4xf32, #tpu.memory_space<vmem>>, vector<1x16x16x4xf32>
    %73 = vector.shape_cast %72 : vector<1x16x16x4xf32> to vector<16x16x4xf32>
    %74 = vector.shape_cast %71 : vector<16x16x4xf32> to vector<1x16x16x4xf32>
    tpu.vector_store %arg10[%c0_71, %c0_72, %c0_73, %c0_74], %74 {strides = array<i32>} : memref<1x16x16x4xf32, #tpu.memory_space<vmem>>, vector<1x16x16x4xf32>,
    return
  }
  func.func @transform_0(%arg0: i32, %arg1: i32) -> (i32, i32, i32, i32) {
    %c0_i32 = arith.constant 0 : i32
    %c0_i32_0 = arith.constant 0 : i32
    %c0_i32_1 = arith.constant 0 : i32
    return %arg0, %arg1, %c0_i32, %c0_i32_0 : i32, i32, i32, i32
  }
  func.func @transform_1(%arg0: i32, %arg1: i32) -> (i32, i32, i32, i32) {
    %c1_i32 = arith.constant 1 : i32
    %0 = arith.muli %arg0, %c1_i32 : i32
    %1 = arith.addi %0, %arg1 : i32
    %c0_i32 = arith.constant 0 : i32
    %c0_i32_0 = arith.constant 0 : i32
    %c0_i32_1 = arith.constant 0 : i32
    %c0_i32_2 = arith.constant 0 : i32
    return %1, %c0_i32, %c0_i32_0, %c0_i32_1 : i32, i32, i32, i32
  }
  func.func @transform_2(%arg0: i32, %arg1: i32) -> (i32, i32) {
    %c0_i32 = arith.constant 0 : i32
    %c0_i32_0 = arith.constant 0 : i32
    %c0_i32_1 = arith.constant 0 : i32
    return %c0_i32, %c0_i32_0 : i32, i32
  }
  func.func @transform_3(%arg0: i32, %arg1: i32) -> (i32, i32) {
    %c0_i32 = arith.constant 0 : i32
    %c0_i32_0 = arith.constant 0 : i32
    %c0_i32_1 = arith.constant 0 : i32
    return %c0_i32, %c0_i32_0 : i32, i32
  }
  func.func @transform_4(%arg0: i32, %arg1: i32) -> (i32, i32) {
    %c0_i32 = arith.constant 0 : i32
    %c0_i32_0 = arith.constant 0 : i32
    %c0_i32_1 = arith.constant 0 : i32
    return %c0_i32, %c0_i32_0 : i32, i32
  }
  func.func @transform_5(%arg0: i32, %arg1: i32) -> (i32, i32) {
    %c0_i32 = arith.constant 0 : i32
    %c0_i32_0 = arith.constant 0 : i32
    %c0_i32_1 = arith.constant 0 : i32
    return %c0_i32, %c0_i32_0 : i32, i32
  }
  func.func @transform_6(%arg0: i32, %arg1: i32) -> (i32, i32) {
    %c0_i32 = arith.constant 0 : i32
    %c0_i32_0 = arith.constant 0 : i32
    %c0_i32_1 = arith.constant 0 : i32
    return %c0_i32, %c0_i32_0 : i32, i32
  }
  func.func @transform_7(%arg0: i32, %arg1: i32) -> (i32, i32) {
    %c0_i32 = arith.constant 0 : i32
    %c0_i32_0 = arith.constant 0 : i32
    %c0_i32_1 = arith.constant 0 : i32
    return %c0_i32, %c0_i32_0 : i32, i32
  }
  func.func @transform_8(%arg0: i32, %arg1: i32) -> (i32, i32, i32, i32) {
    %c0_i32 = arith.constant 0 : i32
    %c0_i32_0 = arith.constant 0 : i32
    %c0_i32_1 = arith.constant 0 : i32
    return %arg0, %arg1, %c0_i32, %c0_i32_0 : i32, i32, i32, i32
  }
}

</mosaic_0001>

<bundles_post_ra>
// kernel: tpu_custom_call.1
= control target key start
LH: loop header
LB: loop body
LE: loop exit
PB: predicated region body
PF: predicated region fallthrough
CT: control target
= control target key end

     0   :  { %s8182_s27 = smov 0   ;;  %s8184_s28 = smov 0   ;;  %s10708_s0 = inlined_call_operand.vmem [shape: f32[2,16,16,4], index: 0, kind: input, shape index: {}]   ;;  %s10709_s1 = inlined_call_operand.vmem [shape: bf16[2,18,16,27], index: 1, kind: input, shape index: {}]   ;;  %s10710_s2 = inlined_call_operand.vmem [shape: f32[1,4], index: 2, kind: input, shape index: {}]   ;;  %s10711_s3 = inlined_call_operand.vmem [shape: f32[1,4], index: 3, kind: input, shape index: {}]   ;;  %s10712_s4 = inlined_call_operand.vmem [shape: bf16[27,128], index: 4, kind: input, shape index: {}]   ;;  %s10713_s5 = inlined_call_operand.vmem [shape: f32[1,128], index: 5, kind: input, shape index: {}]   ;;  %s10714_s6 = inlined_call_operand.vmem [shape: bf16[1152,8], index: 6, kind: input, shape index: {}]   ;;  %s10715_s7 = inlined_call_operand.vmem [shape: f32[1,8], index: 7, kind: input, shape index: {}]   ;;  %s10716_s8 = inlined_call_operand.vmem [shape: f32[2,16,16,4], index: 8, kind: output, shape index: {}]  }
   0x1   :  { %s8186_s29 = smov 0  }
   0x2 LB: > { %s30_s30 = sadd.s32 1, %s8128_s28  ;;  %p6790_p0 = scmp.ge.s32.totalorder %s8132_s29, 1  ;;  %s8132_s29 = sphi %s8186_s29, %s18_s29   ;;  %s8128_s28 = sphi %s8184_s28, %s10949_s28   ;;  %s8124_s27 = sphi %s8182_s27, %s10948_s27  }
   0x3   : > { %p32_p1 = scmp.ge.s32.totalorder %s30_s30, 2  ;;  %p298_p2 = scmp.lt.s32.totalorder %s8132_s29, 3 }
   0x5   : > { %s10951_s30 = smov (%p32_p1, %s30_s30), 0  ;;  %p299_p3 = pnand %p6790_p0, %p298_p2 }
   0x7   : > { %302 = sbr.rel (%p299_p3) target bundleno = 1120 (0x460), region = 52 }
   0xc   : > { %v7802_v0 = vld [vmem:[%s10712_s4 + $0x8] sm:$0x3f]   ;;  %vm581_vm0 = vcmask 1044480   ;;  %vm582_vm1 = vcmask 1045504   ;;  %v8134_v1 = vmov 65535   ;;  %p349_p4 = scmp.lt.s32.totalorder %s8124_s27, 1 }
   0xd   : > { %v583_v2 = vsel %vm581_vm0, 4294967295, %v8134_v1  ;;  %v7803_v5 = vld [vmem:[%s10712_s4] sm:$0xff]   ;;  %vm526_vm2 = vcmask 220160   ;;  %v7822_v6 = vld [vmem:[%s10714_s6 + $0xf8] sm:$0xff]   ;;  %v7824_v11 = vld [vmem:[%s10714_s6 + $0xf0] sm:$0xff]   ;;  %vm1272_vm3 = vcmask 1043456  }
   0xe   : > { %v584_v3 = vsel %vm582_vm1, %v583_v2, 0  ;;  %s10953_s27 = smov (!%p349_p4, %s8124_s27), 1  ;;  %v7823_v8 = vld [vmem:[%s10714_s6 + $0xb8] sm:$0xff]   ;;  %v7825_v12 = vld [vmem:[%s10714_s6 + $0xb0] sm:$0xff]   ;;  %v7826_v13 = vld [vmem:[%s10714_s6 + $0xe8] sm:$0xff]   ;;  %vm1279_vm6 = vcmask 1040384  }
   0xf   : > { %v586_v4 = vand.u32 %v7802_v0, %v584_v3  ;;  %s7774_s13 = smul.u32 144, %s10953_s27  ;;  %v7827_v14 = vld [vmem:[%s10714_s6 + $0xa8] sm:$0xff]   ;;  %v7828_v30 = vld [vmem:[%s10714_s6 + $0xe0] sm:$0xff]   ;;  %v7832_v32 = vld [vmem:[%s10714_s6 + $0x78] sm:$0xff]   ;;  %vm1273_vm4 = vsmask.f32 7938 }
  0x10   : > { %v7829_v31 = vld [vmem:[%s10714_s6 + $0xa0] sm:$0xff]   ;;  %v7833_v33 = vld [vmem:[%s10714_s6 + $0x38] sm:$0xff]   ;;  %7198 = vmatprep.subr.bf16.mxu1 %v7832_v32  ;;  %v7836_v36 = vld [vmem:[%s10714_s6 + $0x70] sm:$0xff]   ;;  %vm909_vm5 = vsmask.f32 256  ;;  %vm2182_vm12 = vcmask 1042432  }
  0x11   : > { %7670 = vmatprep.subr.bf16.mxu0 %v586_v4  ;;  %s8212_s16 = scalar_lea.vmem %s10709_s1, %s7774_s13  ;;  %7199 = vmatpush3.bf16.msra.mxu1 %v7833_v33  ;;  %v7830_v34 = vld [vmem:[%s10714_s6 + $0xd8] sm:$0xff]   ;;  %v7837_v37 = vld [vmem:[%s10714_s6 + $0x30] sm:$0xff]   ;;  %v7838_v38 = vld [vmem:[%s10714_s6 + $0x68] sm:$0xff]   ;;  %vm910_vm7 = vsmask.f32 4368  ;;  %vm2183_vm13 = vcmask 1046532  }
  0x12   : > { %7671 = vmatpush3.bf16.msra.mxu0 %v586_v4  ;;  %v7804_v7 = vld [vmem:[%s8212_s16] sm:$0xff]   ;;  %v7805_v9 = vld [vmem:[%s8212_s16 + $0x8] sm:$0xff]   ;;  %v7806_v10 = vld [vmem:[%s8212_s16 + $0x10] sm:$0xff]   ;;  %7200 = vmatprep.subr.bf16.mxu1 %v7836_v36  ;;  %vm1635_vm15 = vsmask.f32 3328  ;;  %s8136_s11 = smov 124  }
  0x13   : > { %7672 = vmatprep.subr.bf16.mxu0 %v7803_v5  ;;  %7674 = vmatprep.mubr.msk.bf16.mxu0 %vm526_vm2, %v7804_v7  ;;  %v7807_v15 = vld [vmem:[%s8212_s16 + $0x18] sm:$0xff]   ;;  %v7808_v16 = vld [vmem:[%s8212_s16 + $0x20] sm:$0xff]   ;;  %v7809_v17 = vld [vmem:[%s8212_s16 + $0x28] sm:$0xff]   ;;  %vm1636_vm0 = vsmask.f32 7440  ;;  %s7140_s12 = sshll.u32 %s10953_s27, 8 }
  0x14   : > { %v7810_v18 = vld [vmem:[%s8212_s16 + $0x30] sm:$0xff]   ;;  %v7811_v19 = vld [vmem:[%s8212_s16 + $0x38] sm:$0xff]   ;;  %v7812_v20 = vld [vmem:[%s8212_s16 + $0x40] sm:$0xff]   ;;  %s10490_s15 = scalar_lea.vmem %s10708_s0, %s7140_s12  ;;  %s10522_s21 = scalar_lea.vmem %s10716_s8, %s7140_s12 }
  0x15   : > { %v7813_v21 = vld [vmem:[%s8212_s16 + $0x48] sm:$0xff]   ;;  %v7814_v22 = vld [vmem:[%s8212_s16 + $0x50] sm:$0xff]   ;;  %v7815_v23 = vld [vmem:[%s8212_s16 + $0x58] sm:$0xff]   ;;  %7201 = vmatpush3.bf16.msra.mxu1 %v7837_v37 }
  0x16   : > { %7673 = vmatpush3.bf16.msra.mxu0 %v7803_v5  ;;  %v7816_v24 = vld [vmem:[%s8212_s16 + $0x60] sm:$0xff]   ;;  %v7817_v25 = vld [vmem:[%s8212_s16 + $0x68] sm:$0xff]   ;;  %v7818_v26 = vld [vmem:[%s8212_s16 + $0x70] sm:$0xff]   ;;  %7202 = vmatprep.subr.bf16.mxu1 %v7838_v38 }
  0x17   : > { %7310 = vmatprep.subr.bf16.mxu0 %v7822_v6  ;;  %v7819_v27 = vld [vmem:[%s8212_s16 + $0x78] sm:$0xff]   ;;  %v7820_v28 = vld [vmem:[%s8212_s16 + $0x80] sm:$0xff]   ;;  %v7821_v29 = vld [vmem:[%s8212_s16 + $0x88] sm:$0xff]  }
  0x18   : > { %v7831_v35 = vld [vmem:[%s10714_s6 + $0x98] sm:$0xff]   ;;  %v7839_v39 = vld [vmem:[%s10714_s6 + $0x28] sm:$0xff]   ;;  %v7834_v40 = vld [vmem:[%s10714_s6 + $0xd0] sm:$0xff]  }
  0x19   : > { %7675 = vmatmul.mubr.msk.bf16.vlgmr.msra.gmra.mxu0 %vm526_vm2, %v7805_v9  ;;  %7203 = vmatpush3.bf16.msra.mxu1 %v7839_v39  ;;  %v7835_v41 = vld [vmem:[%s10714_s6 + $0x90] sm:$0xff]   ;;  %v7841_v42 = vld [vmem:[%s10714_s6 + $0x60] sm:$0xff]   ;;  %v7844_v44 = vld [vmem:[%s10714_s6 + $0x58] sm:$0xff]  }
  0x1a   : > { %7678 = vmatprep.mubr.msk.bf16.mxu0 %vm526_vm2, %v7806_v10  ;;  %7311 = vmatpush3.bf16.msra.mxu0 %v7823_v8  ;;  %v7843_v43 = vld [vmem:[%s10714_s6 + $0x20] sm:$0xff]   ;;  %v7845_v45 = vld [vmem:[%s10714_s6 + $0x18] sm:$0xff]   ;;  %v7840_v46 = vld [vmem:[%s10714_s6 + $0xc8] sm:$0xff]  }
  0x1b   : > { %7312 = vmatprep.subr.bf16.mxu0 %v7824_v11  ;;  %7204 = vmatprep.subr.bf16.mxu1 %v7841_v42  ;;  %v7842_v47 = vld [vmem:[%s10714_s6 + $0x88] sm:$0xff]   ;;  %v7846_v48 = vld [vmem:[%s10714_s6 + $0x50] sm:$0xff]   ;;  %v7847_v52 = vld [vmem:[%s10714_s6 + $0xc0] sm:$0xff]  }
  0x1c   : > { %v7848_v49 = vld [vmem:[%s10714_s6 + $0x10] sm:$0xff]   ;;  %v7850_v50 = vld [vmem:[%s10714_s6 + $0x48] sm:$0xff]   ;;  %v7849_v53 = vld [vmem:[%s10714_s6 + $0x80] sm:$0xff]  }
  0x1d   : > { %7205 = vmatpush3.bf16.msra.mxu1 %v7843_v43  ;;  %v7851_v51 = vld [vmem:[%s10714_s6 + $0x8] sm:$0xff]   ;;  %v7852_v54 = vld [vmem:[%s10714_s6 + $0x40] sm:$0xff]   ;;  %v7857_v56 = vld [vmem:[%s10714_s6 + $0x1f8] sm:$0xff]  }
  0x1e   : > { %7313 = vmatpush3.bf16.msra.mxu0 %v7825_v12  ;;  %7206 = vmatprep.subr.bf16.mxu1 %v7844_v44  ;;  %v7853_v55 = vld [vmem:[%s10714_s6] sm:$0xff]   ;;  %v7866_v57 = vld [vmem:[%s10714_s6 + $0x178] sm:$0xff]   ;;  %vm8363_vm8 = vmand %vm1272_vm3, %vm1273_vm4 }
  0x1f   : > { %7314 = vmatprep.subr.bf16.mxu0 %v7826_v13  ;;  %v8355_v58 = vld [vmem:[%s10713_s5] ss:$0 sm:$0xff]  ;;  %vm8371_vm9 = vmand %vm1279_vm6, %vm909_vm5  ;;  %v1288_v36 = vld [vmem:[#allocation2 + $0x14] sm:$0x1] }
  0x20   : > { %vm8379_vm10 = vmor %vm909_vm5, %vm910_vm7 }
  0x21   : > { %7679 = vmatmul.mubr.msk.bf16.gmra.mxu0 %vm526_vm2, %v7807_v15  ;;  %7207 = vmatpush3.bf16.msra.mxu1 %v7845_v45  ;;  %v1284_v15 = vld [vmem:[#allocation2 + $0xc] sm:$0xf]  ;;  %vm8404_vm11 = vmand %vm1279_vm6, %vm1273_vm4 }
  0x22   : > { %7682 = vmatprep.mubr.msk.bf16.mxu0 %vm526_vm2, %v7808_v16  ;;  %7315 = vmatpush3.bf16.msra.mxu0 %v7827_v14  ;;  %vm8447_vm14 = vmor %vm2182_vm12, %vm2183_vm13 }
  0x23   : > { %7316 = vmatprep.subr.bf16.mxu0 %v7828_v30  ;;  %7208 = vmatprep.subr.bf16.mxu1 %v7846_v48  ;;  %vm8695_vm1 = vmor %vm1635_vm15, %vm1636_vm0 }
  0x25   : > { %7209 = vmatpush3.bf16.msra.mxu1 %v7848_v49 }
  0x26   : > { %7317 = vmatpush3.bf16.msra.mxu0 %v7829_v31  ;;  %7210 = vmatprep.subr.bf16.mxu1 %v7850_v50 }
  0x27   : > { %7318 = vmatprep.subr.bf16.mxu0 %v7830_v34 }
  0x29   : > { %7683 = vmatmul.mubr.msk.bf16.gmra.mxu0 %vm526_vm2, %v7809_v17  ;;  %7211 = vmatpush3.bf16.msra.mxu1 %v7851_v51 }
  0x2a   : > { %7686 = vmatprep.mubr.msk.bf16.mxu0 %vm526_vm2, %v7810_v18  ;;  %7319 = vmatpush3.bf16.msra.mxu0 %v7831_v35 }
  0x2b   : > { %7320 = vmatprep.subr.bf16.mxu0 %v7834_v40  ;;  %7212 = vmatprep.subr.bf16.mxu1 %v7852_v54 }
  0x2d   : > { %7213 = vmatpush3.bf16.msra.mxu1 %v7853_v55 }
  0x2e   : > { %7321 = vmatpush3.bf16.msra.mxu0 %v7835_v41  ;;  %7422 = vmatprep.subr.bf16.mxu1 %v7866_v57 }
  0x2f   : > { %7322 = vmatprep.subr.bf16.mxu0 %v7840_v46 }
  0x31   : > { %7687 = vmatmul.mubr.msk.bf16.gmra.mxu0 %vm526_vm2, %v7811_v19 }
  0x32   : > { %7690 = vmatprep.mubr.msk.bf16.mxu0 %vm526_vm2, %v7812_v20  ;;  %7323 = vmatpush3.bf16.msra.mxu0 %v7842_v47 }
  0x33   : > { %7324 = vmatprep.subr.bf16.mxu0 %v7847_v52 }
  0x36   : > { %7325 = vmatpush3.bf16.msra.mxu0 %v7849_v53  ;;  %v1281_v53 = vld [vmem:[#allocation2 + $0x8] sm:$0x1] }
  0x37   : > { %7534 = vmatprep.subr.bf16.mxu0 %v7857_v56 }
  0x39   : > { %7691 = vmatmul.mubr.msk.bf16.gmra.mxu0 %vm526_vm2, %v7813_v21 }
  0x3a   : > { %7694 = vmatprep.mubr.msk.bf16.mxu0 %vm526_vm2, %v7814_v22 }
  0x41   : > { %7695 = vmatmul.mubr.msk.bf16.gmra.mxu0 %vm526_vm2, %v7815_v23 }
  0x42   : > { %7698 = vmatprep.mubr.msk.bf16.mxu0 %vm526_vm2, %v7816_v24  ;;  %v1275_v24 = vld [vmem:[#allocation2] sm:$0xf] }
  0x49   : > { %7699 = vmatmul.mubr.msk.bf16.gmra.mxu0 %vm526_vm2, %v7817_v25 }
  0x4a   : > { %7702 = vmatprep.mubr.msk.bf16.mxu0 %vm526_vm2, %v7818_v26 }
  0x51   : > { %7703 = vmatmul.mubr.msk.bf16.gmra.mxu0 %vm526_vm2, %v7819_v27 }
  0x52   : > { %7706 = vmatprep.mubr.msk.bf16.mxu0 %vm526_vm2, %v7820_v28 }
  0x59   : > { %7707 = vmatmul.mubr.msk.bf16.gmra.mxu0 %vm526_vm2, %v7821_v29  ;;  %vm6645_vm2 = vcmask 31744  }
  0xd9   : > { %v7676_v59 = vpop.f32.mrf.mxu0 }
  0xda   : > { %v631_v60 = vadd.f32 %v7676_v59, %v8355_v58 }
  0xdb   : > { %v622_v61 = vpop.f32.mrf.mxu0 }
  0xdc   : > { %v767_v62 = vmax.f32 %v631_v60, 0.0  ;;  %v623_v63 = vadd.f32 %v8355_v58, %v622_v61  ;;  %v1298_v61 = vld [vmem:[#allocation2 + $0x24] sm:$0xf] }
  0xdd   : > { %v7677_v0 = vpop.f32.mrf.mxu0 }
  0xde   : > { %v7144_v1 = vpack.c.bf16 %v767_v62, %v767_v62  ;;  %v765_v2 = vmax.f32 %v623_v63, 0.0  ;;  %v634_v3 = vadd.f32 %v7677_v0, %v8355_v58 }
  0xdf   : > { %v625_v4 = vpop.f32.mrf.mxu0 }
  0xe0   : > { %v930_v5 = vshrl.u32 %v7144_v1, 16  ;;  %v7142_v6 = vpack.c.bf16 %v765_v2, %v765_v2  ;;  %v768_v7 = vmax.f32 %v634_v3, 0.0  ;;  %v626_v8 = vadd.f32 %v8355_v58, %v625_v4 }
  0xe1   : > { %v7680_v9 = vpop.f32.mrf.mxu0  ;;  %v933_v11 = vshll.u32 %v7144_v1, 16 }
  0xe2   : > { %v932_v10 = vrot.slane %v930_v5, 7  ;;  %v913_v12 = vshrl.u32 %v7142_v6, 16  ;;  %v7145_v13 = vpack.c.bf16 %v768_v7, %v768_v7  ;;  %v916_v16 = vshll.u32 %v7142_v6, 16 }
  0xe3   : > { %v766_v17 = vmax.f32 %v626_v8, 0.0  ;;  %v647_v18 = vadd.f32 %v7680_v9, %v8355_v58  ;;  %v638_v19 = vpop.f32.mrf.mxu0 }
  0xe4   : > { %v935_v20 = vor.u32 %v933_v11, %v932_v10  ;;  %v936_v21 = vrot.slane %v932_v10, 4  ;;  %v915_v22 = vrot.slane %v913_v12, 7  ;;  %v938_v23 = vshrl.u32 %v7145_v13, 16 }
  0xe5   : > { %v941_v25 = vshll.u32 %v7145_v13, 16  ;;  %v7143_v26 = vpack.c.bf16 %v766_v17, %v766_v17  ;;  %v771_v27 = vmax.f32 %v647_v18, 0.0  ;;  %v639_v28 = vadd.f32 %v8355_v58, %v638_v19  ;;  %v7681_v29 = vpop.f32.mrf.mxu0 }
  0xe6   : > { %v1285_v31 = vsel %vm8363_vm8, %v935_v20, %v1284_v15  ;;  %v918_v32 = vor.u32 %v916_v16, %v915_v22  ;;  %v919_v33 = vrot.slane %v915_v22, 4  ;;  %v940_v34 = vrot.slane %v938_v23, 7  ;;  %v1291_v15 = vld [vmem:[#allocation2 + $0x18] sm:$0xf] }
  0xe7   : > { %1286 = vst [vmem:[#allocation2 + $0xc] sm:$0xf] %v1285_v31  ;;  %v921_v37 = vshrl.u32 %v7143_v26, 16  ;;  %v924_v38 = vshll.u32 %v7143_v26, 16  ;;  %v7148_v39 = vpack.c.bf16 %v771_v27, %v771_v27  ;;  %v769_v40 = vmax.f32 %v639_v28, 0.0  ;;  %v641_v41 = vpop.f32.mrf.mxu0 }
  0xe8   : > { %v1276_v42 = vsel %vm8363_vm8, %v918_v32, %v1275_v24  ;;  %v943_v43 = vor.u32 %v941_v25, %v940_v34  ;;  %v945_v44 = vrot.slane %v940_v34, 4  ;;  %v650_v45 = vadd.f32 %v7681_v29, %v8355_v58  ;;  %v1302_v32 = vld [vmem:[#allocation2 + $0x2c] sm:$0x1] }
  0xe9   : > { %1277 = vst [vmem:[#allocation2] sm:$0xf] %v1276_v42  ;;  %v923_v46 = vrot.slane %v921_v37, 7  ;;  %v964_v47 = vshrl.u32 %v7148_v39, 16  ;;  %v967_v48 = vshll.u32 %v7148_v39, 16  ;;  %v7146_v49 = vpack.c.bf16 %v769_v40, %v769_v40  ;;  %v7684_v50 = vpop.f32.mrf.mxu0 }
  0xea   : > { %v944_v51 = vsel %vm8379_vm10, %v936_v21, %v943_v43  ;;  %v1289_v52 = vsel %vm8371_vm9, %v945_v44, %v1288_v36  ;;  %v772_v54 = vmax.f32 %v650_v45, 0.0  ;;  %v642_v55 = vadd.f32 %v8355_v58, %v641_v41 }
  0xeb   : > { %1287 = vst [vmem:[#allocation2 + $0x10] sm:$0xf] %v944_v51  ;;  %1290 = vst [vmem:[#allocation2 + $0x14] sm:$0x1] %v1289_v52  ;;  %v926_v56 = vor.u32 %v924_v38, %v923_v46  ;;  %v928_v57 = vrot.slane %v923_v46, 4  ;;  %v966_v59 = vrot.slane %v964_v47, 7  ;;  %v663_v1 = vadd.f32 %v7684_v50, %v8355_v58  ;;  %v654_v2 = vpop.f32.mrf.mxu0 }
  0xec   : > { %v947_v60 = vshrl.u32 %v7146_v49, 16  ;;  %v950_v62 = vshll.u32 %v7146_v49, 16  ;;  %v7149_v63 = vpack.c.bf16 %v772_v54, %v772_v54  ;;  %v770_v0 = vmax.f32 %v642_v55, 0.0  ;;  %v1295_v51 = vld [vmem:[#allocation2 + $0x20] sm:$0x1] }
  0xed   : > { %v927_v3 = vsel %vm8379_vm10, %v919_v33, %v926_v56  ;;  %v1282_v4 = vsel %vm8371_vm9, %v928_v57, %v1281_v53  ;;  %v969_v5 = vor.u32 %v967_v48, %v966_v59  ;;  %v10717_v12 = vmov 0   ;;  %v7685_v27 = vpop.f32.mrf.mxu0  ;;  %v1312_v55 = vld [vmem:[#allocation2 + $0x3c] sm:$0xf] }
  0xee   : > { %v1406_v6 = vld [vmem:[#allocation2 + $0xc] sm:$0x1]  ;;  %1278 = vst [vmem:[#allocation2 + $0x4] sm:$0xf] %v927_v3  ;;  %1283 = vst [vmem:[#allocation2 + $0x8] sm:$0x1] %v1282_v4  ;;  %v7147_v10 = vpack.c.bf16 %v770_v0, %v770_v0  ;;  %v655_v17 = vadd.f32 %v8355_v58, %v654_v2  ;;  %v666_v54 = vadd.f32 %v7685_v27, %v8355_v58 }
  0xef   : > { %v949_v7 = vrot.slane %v947_v60, 7  ;;  %v972_v8 = vshrl.u32 %v7149_v63, 16  ;;  %v975_v9 = vshll.u32 %v7149_v63, 16  ;;  %v1407_v11 = vsel %vm8371_vm9, 0, %v1406_v6  ;;  %1517 = vst [vmem:[#allocation2 + $0x4] sm:$0xf] %v10717_v12  ;;  %v657_v46 = vpop.f32.mrf.mxu0 }
  0xf0   : > { %v1299_v13 = vsel %vm8363_vm8, %v969_v5, %v1298_v61  ;;  %v775_v16 = vmax.f32 %v663_v1, 0.0  ;;  %1408 = vst [vmem:[#allocation2 + $0xc] sm:$0x1] %v1407_v11  ;;  %v1403_v18 = vld [vmem:[#allocation2] sm:$0x1]  ;;  %v970_v20 = vrot.slane %v966_v59, 4  ;;  %v658_v5 = vadd.f32 %v8355_v58, %v657_v46 }
  0xf1   : > { %1300 = vst [vmem:[#allocation2 + $0x24] sm:$0xf] %v1299_v13  ;;  %v952_v21 = vor.u32 %v950_v62, %v949_v7  ;;  %v974_v22 = vrot.slane %v972_v8, 7  ;;  %v955_v23 = vshrl.u32 %v7147_v10, 16  ;;  %v1404_v24 = vsel %vm8371_vm9, 0, %v1403_v18  ;;  %v7688_v60 = vpop.f32.mrf.mxu0 }
  0xf2   : > { %v7152_v25 = vpack.c.bf16 %v775_v16, %v775_v16  ;;  %v773_v26 = vmax.f32 %v655_v17, 0.0  ;;  %1405 = vst [vmem:[#allocation2] sm:$0x1] %v1404_v24  ;;  %v1461_v28 = vld [vmem:[#allocation2 + $0x14] sm:$0x1]  ;;  %v958_v33 = vshll.u32 %v7147_v10, 16 }
  0xf3   : > { %v1292_v29 = vsel %vm8363_vm8, %v952_v21, %v1291_v15  ;;  %v977_v31 = vor.u32 %v975_v9, %v974_v22  ;;  %1516 = vst [vmem:[#allocation2] sm:$0xf] %v10717_v12  ;;  %v1462_v34 = vsel %vm8404_vm11, 0, %v1461_v28  ;;  %v979_v36 = vrot.slane %v974_v22, 4  ;;  %v2363_v37 = vld [vmem:[#allocation2 + $0x10] sm:$0xf]  ;;  %v670_v16 = vpop.f32.mrf.mxu0 }
  0xf4   : > { %1293 = vst [vmem:[#allocation2 + $0x18] sm:$0xf] %v1292_v29  ;;  %1463 = vst [vmem:[#allocation2 + $0x14] sm:$0x1] %v1462_v34  ;;  %v957_v39 = vrot.slane %v955_v23, 7  ;;  %v998_v40 = vshrl.u32 %v7152_v25, 16  ;;  %v7150_v45 = vpack.c.bf16 %v773_v26, %v773_v26  ;;  %v679_v9 = vadd.f32 %v7688_v60, %v8355_v58 }
  0xf5   : > { %v978_v38 = vsel %vm8379_vm10, %v970_v20, %v977_v31  ;;  %2395 = vst [vmem:[#allocation3 + $0x30] sm:$0xf] %v2363_v37  ;;  %v1458_v41 = vld [vmem:[#allocation2 + $0x8] sm:$0x1]  ;;  %v953_v42 = vrot.slane %v949_v7, 4  ;;  %v1303_v43 = vsel %vm8371_vm9, %v979_v36, %v1302_v32  ;;  %v1001_v44 = vshll.u32 %v7152_v25, 16  ;;  %v7689_v25 = vpop.f32.mrf.mxu0 }
  0xf6   : > { %1301 = vst [vmem:[#allocation2 + $0x28] sm:$0xf] %v978_v38  ;;  %v1526_v47 = vld [vmem:[#allocation2 + $0x10] sm:$0xf]  ;;  %v1459_v48 = vsel %vm8404_vm11, 0, %v1458_v41  ;;  %v960_v49 = vor.u32 %v958_v33, %v957_v39  ;;  %v962_v50 = vrot.slane %v957_v39, 4 }
  0xf7   : > { %1304 = vst [vmem:[#allocation2 + $0x2c] sm:$0x1] %v1303_v43  ;;  %v8421_v52 = vrot.slane %v998_v40, 7  ;;  %1558 = vst [vmem:[#allocation3 + $0x6c] sm:$0xf] %v1526_v47  ;;  %v981_v2 = vshrl.u32 %v7150_v45, 16  ;;  %v673_v40 = vpop.f32.mrf.mxu0 }
  0xf8   : > { %1460 = vst [vmem:[#allocation2 + $0x8] sm:$0x1] %v1459_v48  ;;  %v1412_v53 = vld [vmem:[#allocation2 + $0x24] sm:$0x1]  ;;  %v961_v57 = vsel %vm8379_vm10, %v953_v42, %v960_v49  ;;  %v1296_v59 = vsel %vm8371_vm9, %v962_v50, %v1295_v51  ;;  %v2362_v61 = vld [vmem:[#allocation2 + $0xc] sm:$0xf]  ;;  %v8468_v49 = vadd.f32 %v7689_v25, %v8355_v58 }
  0xf9   : > { %1518 = vst [vmem:[#allocation2 + $0x8] sm:$0x1] %v10717_v12  ;;  %v1413_v56 = vsel %vm8371_vm9, 0, %v1412_v53  ;;  %v1524_v62 = vld [vmem:[#allocation2 + $0x4] sm:$0xf]  ;;  %v1003_v1 = vor.u32 %v1001_v44, %v8421_v52  ;;  %v776_v4 = vmax.f32 %v666_v54, 0.0  ;;  %v671_v44 = vadd.f32 %v8355_v58, %v670_v16  ;;  %v7692_v50 = vpop.f32.mrf.mxu0 }
  0xfa   : > { %1414 = vst [vmem:[#allocation2 + $0x24] sm:$0x1] %v1413_v56  ;;  %v3758_v63 = vld [vmem:[#allocation2 + $0x24] sm:$0xe]  ;;  %1294 = vst [vmem:[#allocation2 + $0x1c] sm:$0xf] %v961_v57  ;;  %v8473_v56 = vadd.f32 %v8355_v58, %v673_v40  ;;  %v8476_v57 = vadd.f32 %v7692_v50, %v8355_v58 }
  0xfb   : > { %v1409_v0 = vld [vmem:[#allocation2 + $0x18] sm:$0x1]  ;;  %1297 = vst [vmem:[#allocation2 + $0x20] sm:$0x1] %v1296_v59  ;;  %2394 = vst [vmem:[#allocation3 + $0xc] sm:$0xf] %v2362_v61  ;;  %v1313_v7 = vsel %vm8363_vm8, %v1003_v1, %v1312_v55  ;;  %v7153_v20 = vpack.c.bf16 %v776_v4, %v776_v4 }
  0xfc   : > { %1556 = vst [vmem:[#allocation3 + $0x24] sm:$0xf] %v1524_v62  ;;  %v1410_v3 = vsel %vm8371_vm9, 0, %v1409_v0  ;;  %v8435_v6 = vld [vmem:[#allocation2 + $0x10] sm:$0xf]  ;;  %v984_v8 = vshll.u32 %v7150_v45, 16 }
  0xfd   : > { %1411 = vst [vmem:[#allocation2 + $0x18] sm:$0x1] %v1410_v3  ;;  %v2427_v10 = vld [vmem:[#allocation2 + $0x10] sm:$0xf]  ;;  %v6904_v11 = vrot.slane %v3758_v63, 9  ;;  %v8440_v15 = vrot.slane %v981_v2, 7 }
  0xfe   : > { %v1467_v13 = vld [vmem:[#allocation2 + $0x2c] sm:$0x1]  ;;  %1314 = vst [vmem:[#allocation2 + $0x3c] sm:$0xf] %v1313_v7  ;;  %v3759_v18 = vld [vmem:[#allocation2 + $0x28] sm:$0xf] }
  0xff   : > { %v1468_v17 = vsel %vm8404_vm11, 0, %v1467_v13  ;;  %v1523_v21 = vld [vmem:[#allocation2] sm:$0xf]  ;;  %v1676_v22 = vshrl.u32 %v8435_v6, 16  ;;  %v3860_v23 = vrot.slane %v3759_v18, 5  ;;  %v774_v24 = vmax.f32 %v658_v5, 0.0 }
 0x100   : > { %1469 = vst [vmem:[#allocation2 + $0x2c] sm:$0x1] %v1468_v17  ;;  %1555 = vst [vmem:[#allocation3] sm:$0xf] %v1523_v21  ;;  %v2488_v26 = vshrl.u32 %v2427_v10, 16  ;;  %v986_v28 = vor.u32 %v984_v8, %v8440_v15  ;;  %v779_v31 = vmax.f32 %v679_v9, 0.0 }
 0x101   : > { %v1305_v29 = vld [vmem:[#allocation2 + $0x30] sm:$0xf]  ;;  %v3861_v32 = vsel %vm8447_vm14, %v6904_v11, %v3860_v23  ;;  %v8454_v33 = vld [vmem:[#allocation2 + $0xc] sm:$0xf]  ;;  %v1006_v36 = vshrl.u32 %v7153_v20, 16  ;;  %v8456_v37 = vrot.slane %v1676_v22, 4  ;;  %v7151_v39 = vpack.c.bf16 %v774_v24, %v774_v24 }
 0x102   : > { %3997 = vst [vmem:[#allocation3 + $0x68] sm:$0xf] %v3861_v32  ;;  %v1464_v34 = vld [vmem:[#allocation2 + $0x20] sm:$0x1]  ;;  %v1306_v38 = vsel %vm8363_vm8, %v986_v28, %v1305_v29  ;;  %v8460_v41 = vrot.slane %v2488_v26, 4  ;;  %v1009_v42 = vshll.u32 %v7153_v20, 16  ;;  %v7156_v43 = vpack.c.bf16 %v779_v31, %v779_v31 }
 0x103   : > { %1307 = vst [vmem:[#allocation2 + $0x30] sm:$0xf] %v1306_v38  ;;  %v1465_v46 = vsel %vm8404_vm11, 0, %v1464_v34  ;;  %v1004_v47 = vrot.slane %v8421_v52, 4  ;;  %v1008_v54 = vrot.slane %v1006_v36, 7  ;;  %v3862_v52 = vrot.slane %v3860_v23, 4 }
 0x104   : > { %1466 = vst [vmem:[#allocation2 + $0x20] sm:$0x1] %v1465_v46  ;;  %v1316_v55 = vld [vmem:[#allocation2 + $0x44] sm:$0x1]  ;;  %v1597_v59 = vld [vmem:[#allocation2 + $0x28] sm:$0xf] }
 0x105   : > { %v1418_v48 = vld [vmem:[#allocation2 + $0x3c] sm:$0x1]  ;;  %v989_v61 = vshrl.u32 %v7151_v39, 16  ;;  %v992_v62 = vshll.u32 %v7151_v39, 16  ;;  %v2433_v63 = vld [vmem:[#allocation2 + $0x28] sm:$0xf]  ;;  %v1011_v0 = vor.u32 %v1009_v42, %v1008_v54 }
 0x106   : > { %v1419_v53 = vsel %vm8371_vm9, 0, %v1418_v48  ;;  %v1013_v1 = vrot.slane %v1008_v54, 4  ;;  %v1309_v2 = vld [vmem:[#allocation2 + $0x38] sm:$0x1]  ;;  %v1032_v3 = vshrl.u32 %v7156_v43, 16  ;;  %v1035_v4 = vshll.u32 %v7156_v43, 16 }
 0x107   : > { %v3760_v51 = vld [vmem:[#allocation2 + $0x2c] sm:$0x1]  ;;  %1420 = vst [vmem:[#allocation2 + $0x3c] sm:$0x1] %v1419_v53  ;;  %v3263_v7 = vld [vmem:[#allocation2 + $0x28] sm:$0xf]  ;;  %v1012_v17 = vsel %vm8379_vm10, %v1004_v47, %v1011_v0 }
 0x108   : > { %v3863_v60 = vrot.slane %v3760_v51, 5  ;;  %v8478_v5 = vld [vmem:[#allocation2 + $0xc] sm:$0xf]  ;;  %v987_v9 = vrot.slane %v8440_v15, 4  ;;  %v991_v10 = vrot.slane %v989_v61, 7  ;;  %v777_v13 = vmax.f32 %v671_v44, 0.0 }
 0x109   : > { %v1326_v11 = vld [vmem:[#allocation2 + $0x54] sm:$0xf]  ;;  %v1724_v16 = vshrl.u32 %v1597_v59, 16  ;;  %v1317_v18 = vsel %vm8371_vm9, %v1013_v1, %v1316_v55  ;;  %v8487_v20 = vrot.slane %v1032_v3, 7  ;;  %v2364_v21 = vld [vmem:[#allocation2 + $0x18] sm:$0xf] }
 0x10a   : > { %v3864_v8 = vsel %vm8447_vm14, %v3862_v52, %v3863_v60  ;;  %v2365_v22 = vld [vmem:[#allocation2 + $0x1c] sm:$0xf]  ;;  %v1415_v23 = vld [vmem:[#allocation2 + $0x30] sm:$0x1]  ;;  %1315 = vst [vmem:[#allocation2 + $0x40] sm:$0xf] %v1012_v17  ;;  %v994_v24 = vor.u32 %v992_v62, %v991_v10  ;;  %v7154_v25 = vpack.c.bf16 %v777_v13, %v777_v13 }
 0x10b   : > { %3998 = vst [vmem:[#allocation3 + $0x8c] sm:$0xf] %v3864_v8  ;;  %1318 = vst [vmem:[#allocation2 + $0x44] sm:$0x1] %v1317_v18  ;;  %v996_v15 = vrot.slane %v991_v10, 4  ;;  %v780_v26 = vmax.f32 %v8468_v49, 0.0  ;;  %v1037_v32 = vor.u32 %v1035_v4, %v8487_v20 }
 0x10c   : > { %2396 = vst [vmem:[#allocation3 + $0x54] sm:$0xf] %v2364_v21  ;;  %2397 = vst [vmem:[#allocation3 + $0x78] sm:$0xf] %v2365_v22  ;;  %v1525_v28 = vld [vmem:[#allocation2 + $0xc] sm:$0xf]  ;;  %v995_v38 = vsel %vm8379_vm10, %v987_v9, %v994_v24 }
 0x10d   : > { %v2536_v29 = vshrl.u32 %v2433_v63, 16  ;;  %v1416_v31 = vsel %vm8371_vm9, 0, %v1415_v23  ;;  %v778_v34 = vmax.f32 %v8473_v56, 0.0  ;;  %1557 = vst [vmem:[#allocation3 + $0x48] sm:$0xf] %v1525_v28  ;;  %v3345_v36 = vshrl.u32 %v3263_v7, 16  ;;  %v686_v7 = vpop.f32.mrf.mxu0 }
 0x10e   : > { %1417 = vst [vmem:[#allocation2 + $0x30] sm:$0x1] %v1416_v31  ;;  %v1310_v39 = vsel %vm8371_vm9, %v996_v15, %v1309_v2  ;;  %v1015_v40 = vshrl.u32 %v7154_v25, 16  ;;  %1308 = vst [vmem:[#allocation2 + $0x34] sm:$0xf] %v995_v38  ;;  %v1327_v44 = vsel %vm8363_vm8, %v1037_v32, %v1326_v11  ;;  %v1018_v46 = vshll.u32 %v7154_v25, 16 }
 0x10f   : > { %1311 = vst [vmem:[#allocation2 + $0x38] sm:$0x1] %v1310_v39  ;;  %v8503_v48 = vld [vmem:[#allocation2 + $0x24] sm:$0xf]  ;;  %v8505_v49 = vrot.slane %v1724_v16, 4  ;;  %v7157_v51 = vpack.c.bf16 %v780_v26, %v780_v26  ;;  %v8509_v55 = vrot.slane %v2536_v29, 4  ;;  %v7155_v59 = vpack.c.bf16 %v778_v34, %v778_v34  ;;  %v7693_v21 = vpop.f32.mrf.mxu0 }
 0x110   : > { %1328 = vst [vmem:[#allocation2 + $0x54] sm:$0xf] %v1327_v44  ;;  %v1319_v50 = vld [vmem:[#allocation2 + $0x48] sm:$0xf]  ;;  %v2366_v53 = vld [vmem:[#allocation2 + $0x24] sm:$0xf]  ;;  %v8534_v25 = vadd.f32 %v8355_v58, %v686_v7 }
 0x111   : > { %v8507_v54 = vld [vmem:[#allocation2 + $0x24] sm:$0xf]  ;;  %v8511_v56 = vrot.slane %v1015_v40, 7  ;;  %v2367_v52 = vld [vmem:[#allocation2 + $0x28] sm:$0xf]  ;;  %v8515_v61 = vrot.slane %v3345_v36, 4 }
 0x112   : > { %2398 = vst [vmem:[#allocation3 + $0x9c] sm:$0xf] %v2366_v53  ;;  %v8513_v60 = vld [vmem:[#allocation2 + $0x24] sm:$0xf]  ;;  %v783_v62 = vmax.f32 %v8476_v57, 0.0  ;;  %v1040_v11 = vshrl.u32 %v7157_v51, 16 }
 0x113   : > { %2399 = vst [vmem:[#allocation3 + $0xc0] sm:$0xf] %v2367_v52  ;;  %v1527_v63 = vld [vmem:[#allocation2 + $0x18] sm:$0xf]  ;;  %v3764_v2 = vld [vmem:[#allocation2 + $0x3c] sm:$0xe]  ;;  %v1020_v4 = vor.u32 %v1018_v46, %v8511_v56 }
 0x114   : > { %v1473_v3 = vld [vmem:[#allocation2 + $0x44] sm:$0x1]  ;;  %1559 = vst [vmem:[#allocation3 + $0x90] sm:$0xf] %v1527_v63  ;;  %v8523_v10 = vld [vmem:[#allocation2 + $0x18] sm:$0xf]  ;;  %v7160_v18 = vpack.c.bf16 %v783_v62, %v783_v62  ;;  %v689_v62 = vpop.f32.mrf.mxu0 }
 0x115   : > { %v1474_v57 = vsel %vm8404_vm11, 0, %v1473_v3  ;;  %v1320_v16 = vsel %vm8363_vm8, %v1020_v4, %v1319_v50  ;;  %v1023_v17 = vshrl.u32 %v7155_v59, 16  ;;  %v8531_v23 = vld [vmem:[#allocation2 + $0x18] sm:$0xf]  ;;  %v6906_v24 = vrot.slane %v3764_v2, 9 }
 0x116   : > { %1475 = vst [vmem:[#allocation2 + $0x44] sm:$0x1] %v1474_v57  ;;  %v3765_v15 = vld [vmem:[#allocation2 + $0x40] sm:$0xf]  ;;  %1321 = vst [vmem:[#allocation2 + $0x48] sm:$0xf] %v1320_v16 }
 0x117   : > { %v1470_v29 = vld [vmem:[#allocation2 + $0x38] sm:$0x1]  ;;  %v1043_v31 = vshll.u32 %v7157_v51, 16  ;;  %v1026_v32 = vshll.u32 %v7155_v59, 16  ;;  %v3874_v34 = vrot.slane %v3765_v15, 5  ;;  %v1038_v38 = vrot.slane %v8487_v20, 4 }
 0x118   : > { %v1471_v36 = vsel %vm8404_vm11, 0, %v1470_v29  ;;  %v1424_v39 = vld [vmem:[#allocation2 + $0x54] sm:$0x1]  ;;  %v1042_v40 = vrot.slane %v1040_v11, 7  ;;  %v1021_v46 = vrot.slane %v8511_v56, 4  ;;  %v1025_v53 = vrot.slane %v1023_v17, 7 }
 0x119   : > { %1472 = vst [vmem:[#allocation2 + $0x38] sm:$0x1] %v1471_v36  ;;  %v1425_v44 = vsel %vm8371_vm9, 0, %v1424_v39  ;;  %v1330_v50 = vld [vmem:[#allocation2 + $0x5c] sm:$0x1]  ;;  %v1066_v52 = vshrl.u32 %v7160_v18, 16  ;;  %v3875_v59 = vsel %vm8447_vm14, %v6906_v24, %v3874_v34  ;;  %v698_v24 = vadd.f32 %v7693_v21, %v8355_v58 }
 0x11a   : > { %v3876_v63 = vrot.slane %v3874_v34, 4  ;;  %1426 = vst [vmem:[#allocation2 + $0x54] sm:$0x1] %v1425_v44  ;;  %v1069_v20 = vshll.u32 %v7160_v18, 16  ;;  %v1528_v2 = vld [vmem:[#allocation2 + $0x1c] sm:$0xf]  ;;  %v1045_v3 = vor.u32 %v1043_v31, %v1042_v40  ;;  %v1028_v7 = vor.u32 %v1026_v32, %v1025_v53 }
 0x11b   : > { %4001 = vst [vmem:[#allocation3 + $0xf8] sm:$0xf] %v3875_v59  ;;  %v1047_v4 = vrot.slane %v1042_v40, 4  ;;  %v1030_v57 = vrot.slane %v1025_v53, 4  ;;  %v1323_v11 = vld [vmem:[#allocation2 + $0x50] sm:$0x1]  ;;  %v690_v18 = vadd.f32 %v8355_v58, %v689_v62 }
 0x11c   : > { %v1340_v56 = vld [vmem:[#allocation2 + $0x6c] sm:$0xf]  ;;  %1560 = vst [vmem:[#allocation3 + $0xb4] sm:$0xf] %v1528_v2  ;;  %v8547_v16 = vld [vmem:[#allocation2 + $0x18] sm:$0xf]  ;;  %v1046_v40 = vsel %vm8379_vm10, %v1038_v38, %v1045_v3 }
 0x11d   : > { %v3766_v17 = vld [vmem:[#allocation2 + $0x44] sm:$0x1]  ;;  %v8549_v15 = vrot.slane %v1066_v52, 7  ;;  %v781_v29 = vmax.f32 %v8534_v25, 0.0  ;;  %v2086_v34 = vld [vmem:[#allocation2] sm:$0xe]  ;;  %v1331_v44 = vsel %vm8371_vm9, %v1047_v4, %v1330_v50  ;;  %v1029_v25 = vsel %vm8379_vm10, %v1021_v46, %v1028_v7 }
 0x11e   : > { %v8554_v36 = vld [vmem:[#allocation2 + $0x4] sm:$0xf]  ;;  %v8556_v31 = vld [vmem:[#allocation2 + $0x3c] sm:$0xf]  ;;  %v3877_v32 = vrot.slane %v3766_v17, 5  ;;  %v1324_v38 = vsel %vm8371_vm9, %v1030_v57, %v1323_v11  ;;  %v784_v57 = vmax.f32 %v698_v24, 0.0 }
 0x11f   : > { %v1421_v39 = vld [vmem:[#allocation2 + $0x48] sm:$0x1]  ;;  %v8565_v53 = vld [vmem:[#allocation2 + $0x3c] sm:$0xf]  ;;  %v1603_v52 = vld [vmem:[#allocation2 + $0x40] sm:$0xf]  ;;  %v1071_v59 = vor.u32 %v1069_v20, %v8549_v15 }
 0x120   : > { %10771 = vst [vmem:[#allocation4_spill] sm:$0xff] %v8565_v53  ;;  %v1422_v62 = vsel %vm8371_vm9, 0, %v1421_v39  ;;  %1329 = vst [vmem:[#allocation2 + $0x58] sm:$0xf] %v1046_v40  ;;  %v8572_v50 = vld [vmem:[#allocation2 + $0x3c] sm:$0xf]  ;;  %v3878_v46 = vsel %vm8447_vm14, %v3876_v63, %v3877_v32  ;;  %v8579_v63 = vpack.c.bf16 %v781_v29, %v781_v29 }
 0x121   : > { %1332 = vst [vmem:[#allocation2 + $0x5c] sm:$0x1] %v1331_v44  ;;  %1322 = vst [vmem:[#allocation2 + $0x4c] sm:$0xf] %v1029_v25  ;;  %v2368_v2 = vld [vmem:[#allocation2 + $0x30] sm:$0xf]  ;;  %v1341_v39 = vsel %vm8363_vm8, %v1071_v59, %v1340_v56 }
 0x122   : > { %1423 = vst [vmem:[#allocation2 + $0x48] sm:$0x1] %v1422_v62  ;;  %1325 = vst [vmem:[#allocation2 + $0x50] sm:$0x1] %v1324_v38  ;;  %v2369_v3 = vld [vmem:[#allocation2 + $0x34] sm:$0xf]  ;;  %v7696_v38 = vpop.f32.mrf.mxu0 }
 0x123   : > { %v1529_v4 = vld [vmem:[#allocation2 + $0x24] sm:$0xf]  ;;  %v2439_v17 = vld [vmem:[#allocation2 + $0x40] sm:$0xf]  ;;  %4002 = vst [vmem:[#allocation3 + $0x11c] sm:$0xf] %v3878_v46 }
 0x124   : > { %2400 = vst [vmem:[#allocation3 + $0xe4] sm:$0xf] %v2368_v2  ;;  %2401 = vst [vmem:[#allocation3 + $0x108] sm:$0xf] %v2369_v3  ;;  %v1530_v20 = vld [vmem:[#allocation2 + $0x28] sm:$0xf] }
 0x125   : > { %1561 = vst [vmem:[#allocation3 + $0xd8] sm:$0xf] %v1529_v4  ;;  %v3269_v11 = vld [vmem:[#allocation2 + $0x40] sm:$0xf]  ;;  %1342 = vst [vmem:[#allocation2 + $0x6c] sm:$0xf] %v1341_v39 }
 0x126   : > { %v782_v32 = vmax.f32 %v690_v18, 0.0  ;;  %v6871_v40 = vrot.slane %v2086_v34, 9  ;;  %v2187_v44 = vrot.slane %v8554_v36, 5  ;;  %1562 = vst [vmem:[#allocation3 + $0xfc] sm:$0xf] %v1530_v20  ;;  %v1772_v29 = vshrl.u32 %v1603_v52, 16 }
 0x127   : > { %v8586_v59 = vld [vmem:[#allocation2 + $0x30] sm:$0xf]  ;;  %v2584_v2 = vshrl.u32 %v2439_v17, 16  ;;  %v8591_v18 = vadd.f32 %v7696_v38, %v8355_v58  ;;  %v3393_v39 = vshrl.u32 %v3269_v11, 16  ;;  %v7161_v20 = vpack.c.bf16 %v784_v57, %v784_v57  ;;  %v8601_v52 = vld [vmem:[#allocation2 + $0x8] sm:$0x1] }
 0x128   : > { %v8588_v46 = vld [vmem:[#allocation2 + $0x30] sm:$0xf]  ;;  %v1479_v9 = vld [vmem:[#allocation2 + $0x5c] sm:$0x1]  ;;  %v1049_v8 = vshrl.u32 %v8579_v63, 16  ;;  %v8599_v21 = vpack.c.bf16 %v782_v32, %v782_v32  ;;  %v2188_v58 = vsel %vm8447_vm14, %v6871_v40, %v2187_v44  ;;  %v8615_v3 = vrot.slane %v1772_v29, 4 }
 0x129   : > { %v8595_v4 = vld [vmem:[#allocation2 + $0x30] sm:$0xf]  ;;  %v8611_v34 = vld [vmem:[#allocation2 + $0x54] sm:$0xe]  ;;  %2329 = vst [vmem:[#allocation3 + $0x8] sm:$0xf] %v2188_v58 }
 0x12a   : > { %10772 = vst [vmem:[#allocation5_spill] sm:$0xff] %v8611_v34  ;;  %v8617_v51 = vrot.slane %v2584_v2, 4  ;;  %v8619_v40 = vld [vmem:[#allocation2 + $0x54] sm:$0xf]  ;;  %v8621_v22 = vrot.slane %v3393_v39, 4  ;;  %v1480_v11 = vsel %vm8404_vm11, 0, %v1479_v9 }
 0x12b   : > { %v8623_v13 = vld [vmem:[#allocation2 + $0x54] sm:$0xf]  ;;  %v1052_v57 = vshll.u32 %v8579_v63, 16  ;;  %v1074_v58 = vshrl.u32 %v7161_v20, 16  ;;  %v1587_v47 = vld [vmem:[#allocation2] sm:$0xf] }
 0x12c   : > { %10773 = vst [vmem:[#allocation6_spill] sm:$0xff] %v8617_v51  ;;  %10774 = vst [vmem:[#allocation7_spill] sm:$0xff] %v8623_v13  ;;  %v1476_v29 = vld [vmem:[#allocation2 + $0x50] sm:$0x1]  ;;  %v1072_v2 = vrot.slane %v8549_v15, 4  ;;  %v8630_v24 = vrot.slane %v1049_v8, 7 }
 0x12d   : > { %1481 = vst [vmem:[#allocation2 + $0x5c] sm:$0x1] %v1480_v11  ;;  %v1333_v43 = vld [vmem:[#allocation2 + $0x60] sm:$0xf]  ;;  %v1057_v39 = vshrl.u32 %v8599_v21, 16  ;;  %v1477_v9 = vsel %vm8404_vm11, 0, %v1476_v29 }
 0x12e   : > { %v8633_v25 = vld [vmem:[#allocation2 + $0x4] sm:$0xf]  ;;  %v1430_v63 = vld [vmem:[#allocation2 + $0x6c] sm:$0x1]  ;;  %v1077_v12 = vshll.u32 %v7161_v20, 16  ;;  %v2190_v32 = vrot.slane %v8601_v52, 5  ;;  %v1054_v20 = vor.u32 %v1052_v57, %v8630_v24 }
 0x12f   : > { %v8641_v8 = vld [vmem:[#allocation2 + $0x54] sm:$0xf]  ;;  %1478 = vst [vmem:[#allocation2 + $0x50] sm:$0x1] %v1477_v9  ;;  %v1431_v56 = vsel %vm8371_vm9, 0, %v1430_v63  ;;  %v1060_v7 = vshll.u32 %v8599_v21, 16 }
 0x130   : > { %10775 = vst [vmem:[#allocation8_spill] sm:$0xff] %v8641_v8  ;;  %v1344_v62 = vld [vmem:[#allocation2 + $0x74] sm:$0x1]  ;;  %1432 = vst [vmem:[#allocation2 + $0x6c] sm:$0x1] %v1431_v56  ;;  %v1055_v52 = vrot.slane %v8630_v24, 4  ;;  %v1334_v56 = vsel %vm8363_vm8, %v1054_v20, %v1333_v43 }
 0x131   : > { %v1076_v11 = vrot.slane %v1074_v58, 7  ;;  %v1337_v15 = vld [vmem:[#allocation2 + $0x68] sm:$0x1]  ;;  %v2370_v38 = vld [vmem:[#allocation2 + $0x3c] sm:$0xf]  ;;  %v1059_v17 = vrot.slane %v1057_v39, 7 }
 0x132   : > { %v2189_v9 = vrot.slane %v2187_v44, 4  ;;  %v1639_v63 = vshrl.u32 %v1587_v47, 16  ;;  %v1642_v1 = vshll.u32 %v1587_v47, 16  ;;  %v8651_v0 = vld [vmem:[#allocation2 + $0x10] sm:$0xf]  ;;  %v1648_v24 = vshll.u32 %v8633_v25, 16 }
 0x133   : > { %2402 = vst [vmem:[#allocation3 + $0x12c] sm:$0xf] %v2370_v38  ;;  %v8653_v21 = vld [vmem:[#allocation2 + $0x48] sm:$0xf]  ;;  %v1079_v57 = vor.u32 %v1077_v12, %v1076_v11  ;;  %v1081_v29 = vrot.slane %v1076_v11, 4  ;;  %v1062_v39 = vor.u32 %v1060_v7, %v1059_v17  ;;  %v1064_v28 = vrot.slane %v1059_v17, 4 }
 0x134   : > { %v2371_v58 = vld [vmem:[#allocation2 + $0x40] sm:$0xf]  ;;  %1335 = vst [vmem:[#allocation2 + $0x60] sm:$0xf] %v1334_v56  ;;  %v2191_v36 = vsel %vm8447_vm14, %v2189_v9, %v2190_v32  ;;  %v8660_v47 = vld [vmem:[#allocation2 + $0x8] sm:$0x1] }
 0x135   : > { %v1641_v44 = vrot.slane %v1639_v63, 4  ;;  %v2089_v38 = vld [vmem:[#allocation2 + $0xc] sm:$0xe]  ;;  %v8662_v26 = vld [vmem:[#allocation2 + $0x14] sm:$0x1]  ;;  %v1080_v7 = vsel %vm8379_vm10, %v1072_v2, %v1079_v57  ;;  %v1345_v17 = vsel %vm8371_vm9, %v1081_v29, %v1344_v62  ;;  %v1644_v32 = vrot.slane %v1642_v1, 5 }
 0x136   : > { %2403 = vst [vmem:[#allocation3 + $0x150] sm:$0xf] %v2371_v58  ;;  %v1531_v42 = vld [vmem:[#allocation2 + $0x30] sm:$0xf]  ;;  %v1532_v43 = vld [vmem:[#allocation2 + $0x34] sm:$0xf]  ;;  %v1063_v58 = vsel %vm8379_vm10, %v1055_v52, %v1062_v39  ;;  %v1338_v12 = vsel %vm8371_vm9, %v1064_v28, %v1337_v15  ;;  %v702_v52 = vpop.f32.mrf.mxu0 }
 0x137   : > { %v8665_v11 = vld [vmem:[#allocation2 + $0x48] sm:$0xf]  ;;  %2330 = vst [vmem:[#allocation3 + $0x2c] sm:$0xf] %v2191_v36  ;;  %1563 = vst [vmem:[#allocation3 + $0x120] sm:$0xf] %v1531_v42  ;;  %v1645_v29 = vor.u32 %v1644_v32, %v1641_v44 }
 0x138   : > { %10776 = vst [vmem:[#allocation9_spill] sm:$0xff] %v8665_v11  ;;  %v8667_v20 = vld [vmem:[#allocation2 + $0x48] sm:$0xf]  ;;  %1564 = vst [vmem:[#allocation3 + $0x144] sm:$0xf] %v1532_v43  ;;  %v1652_v2 = vshrl.u32 %v8633_v25, 16 }
 0x139   : > { %10777 = vst [vmem:[#allocation10_spill] sm:$0xff] %v8667_v20  ;;  %v1609_v63 = vld [vmem:[#allocation2 + $0x58] sm:$0xf]  ;;  %1343 = vst [vmem:[#allocation2 + $0x70] sm:$0xf] %v1080_v7  ;;  %v2194_v57 = vrot.slane %v8651_v0, 5 }
 0x13a   : > { %v2445_v56 = vld [vmem:[#allocation2 + $0x58] sm:$0xf]  ;;  %1346 = vst [vmem:[#allocation2 + $0x74] sm:$0x1] %v1345_v17  ;;  %1336 = vst [vmem:[#allocation2 + $0x64] sm:$0xf] %v1063_v58 }
 0x13b   : > { %v3275_v42 = vld [vmem:[#allocation2 + $0x58] sm:$0xf]  ;;  %1339 = vst [vmem:[#allocation2 + $0x68] sm:$0x1] %v1338_v12  ;;  %v1650_v28 = vrot.slane %v1648_v24, 5  ;;  %v1820_v25 = vshrl.u32 %v1609_v63, 16 }
 0x13c   : > { %v8685_v39 = vld [vmem:[#allocation2 + $0x58] sm:$0xf]  ;;  %v1658_v15 = vshll.u32 %v8660_v47, 16  ;;  %v6872_v7 = vrot.slane %v2089_v38, 9  ;;  %v2197_v17 = vrot.slane %v8662_v26, 5  ;;  %v2632_v58 = vshrl.u32 %v2445_v56, 16 }
 0x13d   : > { %10778 = vst [vmem:[#allocation11_spill] sm:$0xff] %v8685_v39  ;;  %v3441_v12 = vshrl.u32 %v3275_v42, 16  ;;  %v1646_v44 = vrot.slane %v1645_v29, 4  ;;  %v1654_v32 = vrot.slane %v1652_v2, 4  ;;  %v2372_v0 = vld [vmem:[#allocation2 + $0x48] sm:$0xf] }
 0x13e   : > { %v10719_v36 = vrot.slane %v8685_v39, 5  ;;  %v1427_v9 = vld [vmem:[#allocation2 + $0x60] sm:$0x1]  ;;  %v7858_v43 = vld [vmem:[%s10714_s6 + $0x1b8] sm:$0xff]   ;;  %v2195_v26 = vsel %vm8447_vm14, %v6872_v7, %v2194_v57  ;;  %v2196_v47 = vrot.slane %v2194_v57, 4  ;;  %v787_v38 = vmax.f32 %v8591_v18, 0.0 }
 0x13f   : > { %2404 = vst [vmem:[#allocation3 + $0x174] sm:$0xf] %v2372_v0  ;;  %v1428_v63 = vsel %vm8371_vm9, 0, %v1427_v9  ;;  %v7854_v56 = vld [vmem:[#allocation3 + $0x8] ss:$36 sps:$4 sm:$0xff]   ;;  %v1651_v42 = vsel %vm8695_vm1, %v1646_v44, %v1650_v28  ;;  %v1655_v29 = vor.u32 %v1654_v32, %v1650_v28  ;;  %v1660_v7 = vrot.slane %v1658_v15, 5 }
 0x140   : > { %v7856_v2 = vld [vmem:[#allocation3 + $0xc] ss:$36 sps:$4 sm:$0xff]   ;;  %2331 = vst [vmem:[#allocation3 + $0x50] sm:$0xf] %v2195_v26  ;;  %1429 = vst [vmem:[#allocation2 + $0x60] sm:$0x1] %v1428_v63  ;;  %v2198_v18 = vsel %vm8447_vm14, %v2196_v47, %v2197_v17  ;;  %v7164_v57 = vpack.c.bf16 %v787_v38, %v787_v38 }
 0x141   : > { %v1485_v62 = vld [vmem:[#allocation2 + $0x74] sm:$0x1]  ;;  %2054 = vst [vmem:[#allocation3 + $0x4] sm:$0xf] %v1651_v42  ;;  %v8712_v0 = vrot.slane %v1820_v25, 4  ;;  %v8714_v44 = vrot.slane %v2632_v58, 4  ;;  %5699 = vmatprep.mubr.bf16.mxu0 %v7856_v2 }
 0x142   : > { %v7873_v9 = vld [vmem:[%s10714_s6 + $0x1f0] sm:$0xff]   ;;  %v1486_v28 = vsel %vm8404_vm11, 0, %v1485_v62  ;;  %v1656_v32 = vrot.slane %v1655_v29, 4  ;;  %2332 = vst [vmem:[#allocation3 + $0x74] sm:$0xf] %v2198_v18  ;;  %v8723_v26 = vrot.slane %v3441_v12, 4  ;;  %5700 = vmatmul.mubr.bf16.vlgmr.msra.gmra.mxu0 %v7854_v56 }
 0x143   : > { %10781 = vst [vmem:[#allocation12_spill] sm:$0xff] %v8714_v44  ;;  %v8718_v15 = vld [vmem:[#allocation2 + $0x14] sm:$0x1]  ;;  %v8725_v47 = vld [vmem:[#allocation2 + $0x6c] sm:$0xf]  ;;  %v1100_v38 = vshrl.u32 %v7164_v57, 16  ;;  %7535 = vmatpush3.bf16.msra.mxu0 %v7858_v43 }
 0x144   : > { %v7874_v17 = vld [vmem:[%s10714_s6 + $0x1b0] sm:$0xff]   ;;  %10782 = vst [vmem:[#allocation13_spill] sm:$0xff] %v8723_v26  ;;  %v8727_v25 = vld [vmem:[#allocation2 + $0x6c] sm:$0xe]  ;;  %1487 = vst [vmem:[#allocation2 + $0x74] sm:$0x1] %v1486_v28  ;;  %7536 = vmatprep.subr.bf16.mxu0 %v7873_v9 }
 0x145   : > { %10783 = vst [vmem:[#allocation14_spill] sm:$0xff] %v8727_v25  ;;  %v1482_v58 = vld [vmem:[#allocation2 + $0x68] sm:$0x1]  ;;  %v8732_v62 = vld [vmem:[%s10713_s5] ss:$0 sm:$0xff]  ;;  %v8740_v2 = vrot.slane %v10719_v36, 4 }
 0x146   : > { %v703_v63 = vadd.f32 %v8732_v62, %v702_v52  ;;  %v7887_v12 = vld [vmem:[%s10714_s6 + $0x1e8] sm:$0xff]   ;;  %v1483_v56 = vsel %vm8404_vm11, 0, %v1482_v58  ;;  %v8748_v28 = vld [vmem:[#allocation2 + $0x70] sm:$0xf]  ;;  %v1661_v52 = vsel %vm8695_vm1, %v1656_v32, %v1660_v7  ;;  %v8752_v1 = vrot.slane %v1100_v38, 7  ;;  %v7867_v8 = vld [vmem:[%s10714_s6 + $0x138] sm:$0xff]  }
 0x147   : > { %10784 = vst [vmem:[#allocation15_spill] sm:$0xff] %v8740_v2  ;;  %v8742_v42 = vld [vmem:[#allocation2 + $0x6c] sm:$0xf]  ;;  %1484 = vst [vmem:[#allocation2 + $0x68] sm:$0x1] %v1483_v56  ;;  %v1103_v45 = vshll.u32 %v7164_v57, 16  ;;  %v7697_v2 = vpop.f32.mrf.mxu0  ;;  %7537 = vmatpush3.bf16.msra.mxu0 %v7874_v17 }
 0x148   : > { %10785 = vst [vmem:[#allocation16_spill] sm:$0xff] %v8742_v42  ;;  %v2373_v29 = vld [vmem:[#allocation2 + $0x4c] sm:$0xf]  ;;  %v1354_v36 = vld [vmem:[#allocation2 + $0x84] sm:$0xf]  ;;  %v10787_v43 = vshrl.u32 %v8454_v33, 16  ;;  %v714_v56 = vadd.f32 %v8732_v62, %v7697_v2  ;;  %7538 = vmatprep.subr.bf16.mxu0 %v7887_v12 }
 0x149   : > { %v8746_v18 = vld [vmem:[#allocation2 + $0x6c] sm:$0xf]  ;;  %2405 = vst [vmem:[#allocation3 + $0x198] sm:$0xf] %v2373_v29  ;;  %v8754_v44 = vld [vmem:[#allocation2 + $0x70] sm:$0xf]  ;;  %v1105_v7 = vor.u32 %v1103_v45, %v8752_v1 }
 0x14a   : > { %10786 = vst [vmem:[#allocation17_spill] sm:$0xff] %v8746_v18  ;;  %2055 = vst [vmem:[#allocation3 + $0x28] sm:$0xf] %v1661_v52  ;;  %v1665_v58 = vrot.slane %v10787_v43, 4  ;;  %v10788_v13 = vshll.u32 %v8454_v33, 16  ;;  %v1672_v57 = vshll.u32 %v8435_v6, 16 }
 0x14b   : > { %v1533_v34 = vld [vmem:[#allocation2 + $0x3c] sm:$0xf]  ;;  %v1682_v32 = vshll.u32 %v8718_v15, 16  ;;  %v785_v9 = vmax.f32 %v703_v63, 0.0  ;;  %v2092_v38 = vld [vmem:[#allocation2 + $0x18] sm:$0xe]  ;;  %v705_v63 = vpop.f32.mrf.mxu0 }
 0x14c   : > { %v1668_v26 = vrot.slane %v10788_v13, 5  ;;  %v2093_v29 = vld [vmem:[#allocation2 + $0x1c] sm:$0xf]  ;;  %v7888_v52 = vld [vmem:[%s10714_s6 + $0x1a8] sm:$0xff]   ;;  %v1534_v43 = vld [vmem:[#allocation2 + $0x40] sm:$0xf] }
 0x14d   : > { %1565 = vst [vmem:[#allocation3 + $0x168] sm:$0xf] %v1533_v34  ;;  %v4038_v45 = vld [vmem:[#allocation3 + $0x50] sm:$0xff]  ;;  %v2094_v6 = vld [vmem:[#allocation2 + $0x20] sm:$0x1]  ;;  %v1674_v11 = vrot.slane %v1672_v57, 5  ;;  %v7162_v12 = vpack.c.bf16 %v785_v9, %v785_v9  ;;  %7539 = vmatpush3.bf16.msra.mxu0 %v7888_v52  ;;  %v7700_v53 = vpop.f32.mrf.mxu0 }
 0x14e   : > { %v1669_v39 = vor.u32 %v1668_v26, %v1665_v58  ;;  %1566 = vst [vmem:[#allocation3 + $0x18c] sm:$0xf] %v1534_v43  ;;  %v7901_v34 = vld [vmem:[%s10714_s6 + $0x1e0] sm:$0xff]   ;;  %v4043_v58 = vld [vmem:[#allocation3 + $0x74] sm:$0xff]  ;;  %v1355_v43 = vsel %vm8363_vm8, %v1105_v7, %v1354_v36  ;;  %v8781_v13 = vrot.slane %v1682_v32, 5  ;;  %v6873_v26 = vrot.slane %v2092_v38, 9 }
 0x14f   : > { %v7862_v17 = vld [vmem:[#allocation3 + $0x54] ss:$36 sps:$4 sm:$0xff]   ;;  %1356 = vst [vmem:[#allocation2 + $0x84] sm:$0xf] %v1355_v43  ;;  %v6931_v33 = vcombine.low %v4038_v45, %v4043_v58  ;;  %v8786_v2 = vld [vmem:[#allocation2 + $0x1c] sm:$0xf]  ;;  %v1679_v9 = vor.u32 %v8456_v37, %v1674_v11  ;;  %7540 = vmatprep.subr.bf16.mxu0 %v7901_v34 }
 0x150   : > { %v1670_v15 = vrot.slane %v1669_v39, 4  ;;  %5707 = vmatprep.mubr.bf16.mxu0 %v7862_v17  ;;  %v2201_v42 = vrot.slane %v2093_v29, 5  ;;  %v2204_v18 = vrot.slane %v2094_v6, 5  ;;  %v788_v25 = vmax.f32 %v714_v56, 0.0  ;;  %v7902_v36 = vld [vmem:[%s10714_s6 + $0x1a0] sm:$0xff]   ;;  %v7915_v39 = vld [vmem:[%s10714_s6 + $0x1d8] sm:$0xff]  }
 0x151   : > { %v7859_v7 = vld [vmem:[#allocation3] ss:$36 sps:$4 sm:$0xff]   ;;  %v1083_v38 = vshrl.u32 %v7162_v12, 16  ;;  %5708 = vmatmul.mubr.bf16.gmra.mxu0 %v6931_v33  ;;  %v8798_v56 = vadd.f32 %v8732_v62, %v705_v63  ;;  %v8800_v29 = vld [vmem:[#allocation2 + $0x70] sm:$0xf]  ;;  %v1086_v52 = vshll.u32 %v7162_v12, 16 }
 0x152   : > { %v7861_v57 = vld [vmem:[#allocation3 + $0x4] ss:$36 sps:$4 sm:$0xff]   ;;  %v1675_v32 = vsel %vm8695_vm1, %v1670_v15, %v1674_v11  ;;  %v1347_v45 = vld [vmem:[#allocation2 + $0x78] sm:$0xf]  ;;  %v2202_v6 = vsel %vm8447_vm14, %v6873_v26, %v2201_v42  ;;  %v2203_v58 = vrot.slane %v2201_v42, 4  ;;  %v7165_v17 = vpack.c.bf16 %v788_v25, %v788_v25  ;;  %v7880_v37 = vld [vmem:[%s10714_s6 + $0x170] sm:$0xff]   ;;  %7541 = vmatpush3.bf16.msra.mxu0 %v7902_v36 }
 0x153   : > { %2056 = vst [vmem:[#allocation3 + $0x4c] sm:$0xf] %v1675_v32  ;;  %5538 = vmatprep.mubr.bf16.mxu1 %v7861_v57  ;;  %v1680_v11 = vrot.slane %v1679_v9, 4  ;;  %v8807_v33 = vrot.slane %v1083_v38, 7  ;;  %2333 = vst [vmem:[#allocation3 + $0x98] sm:$0xf] %v2202_v6  ;;  %7542 = vmatprep.subr.bf16.mxu0 %v7915_v39 }
 0x154   : > { %v8809_v15 = vld [vmem:[#allocation2 + $0x20] sm:$0x1]  ;;  %v10789_v63 = vshrl.u32 %v8523_v10, 16  ;;  %v10790_v43 = vshll.u32 %v8523_v10, 16  ;;  %v7881_v25 = vld [vmem:[%s10714_s6 + $0x130] sm:$0xff]   ;;  %5539 = vmatmul.mubr.bf16.vlgmr.msra.gmra.mxu1 %v7859_v7  ;;  %v2205_v26 = vsel %vm8447_vm14, %v2203_v58, %v2204_v18  ;;  %v1108_v57 = vshrl.u32 %v7165_v17, 16 }
 0x155   : > { %v2374_v42 = vld [vmem:[#allocation2 + $0x54] sm:$0xf]  ;;  %v1111_v32 = vshll.u32 %v7165_v17, 16  ;;  %v1696_v9 = vshll.u32 %v8786_v2, 16  ;;  %v2095_v38 = vld [vmem:[#allocation2 + $0x24] sm:$0xe]  ;;  %v1685_v18 = vsel %vm8695_vm1, %v1680_v11, %v8781_v13  ;;  %v1088_v58 = vor.u32 %v1086_v52, %v8807_v33  ;;  %7423 = vmatpush3.bf16.msra.mxu1 %v7867_v8 }
 0x156   : > { %v1689_v34 = vrot.slane %v10789_v63, 4  ;;  %v1692_v12 = vrot.slane %v10790_v43, 5  ;;  %v7894_v6 = vld [vmem:[%s10714_s6 + $0x168] sm:$0xff]   ;;  %v2375_v10 = vld [vmem:[#allocation2 + $0x58] sm:$0xf]  ;;  %v1106_v20 = vrot.slane %v8752_v1, 4  ;;  %v8839_v8 = vadd.f32 %v8732_v62, %v7700_v53  ;;  %7424 = vmatprep.subr.bf16.mxu1 %v7880_v37 }
 0x157   : > { %2406 = vst [vmem:[#allocation3 + $0x1bc] sm:$0xf] %v2374_v42  ;;  %v7916_v63 = vld [vmem:[%s10714_s6 + $0x198] sm:$0xff]   ;;  %2334 = vst [vmem:[#allocation3 + $0xbc] sm:$0xf] %v2205_v26  ;;  %v7929_v42 = vld [vmem:[%s10714_s6 + $0x1d0] sm:$0xff]   ;;  %v1348_v39 = vsel %vm8363_vm8, %v1088_v58, %v1347_v45 }
 0x158   : > { %v1358_v17 = vld [vmem:[#allocation2 + $0x8c] sm:$0x1]  ;;  %v1693_v43 = vor.u32 %v1692_v12, %v1689_v34  ;;  %v2096_v51 = vld [vmem:[#allocation2 + $0x28] sm:$0xf]  ;;  %2407 = vst [vmem:[#allocation3 + $0x1e0] sm:$0xf] %v2375_v10  ;;  %7543 = vmatpush3.bf16.msra.mxu0 %v7916_v63 }
 0x159   : > { %v1535_v36 = vld [vmem:[#allocation2 + $0x48] sm:$0xf]  ;;  %v8835_v7 = vld [vmem:[#allocation2 + $0x70] sm:$0xf]  ;;  %v1436_v13 = vld [vmem:[#allocation2 + $0x84] sm:$0x1]  ;;  %7425 = vmatpush3.bf16.msra.mxu1 %v7881_v25  ;;  %7544 = vmatprep.subr.bf16.mxu0 %v7929_v42 }
 0x15a   : > { %10791 = vst [vmem:[#allocation18_spill] sm:$0xff] %v8835_v7  ;;  %2057 = vst [vmem:[#allocation3 + $0x70] sm:$0xf] %v1685_v18  ;;  %v1110_v52 = vrot.slane %v1108_v57, 7  ;;  %v1437_v11 = vsel %vm8371_vm9, 0, %v1436_v13  ;;  %v1694_v34 = vrot.slane %v1693_v43, 4  ;;  %7426 = vmatprep.subr.bf16.mxu1 %v7894_v6 }
 0x15b   : > { %1567 = vst [vmem:[#allocation3 + $0x1b0] sm:$0xf] %v1535_v36  ;;  %v1698_v12 = vrot.slane %v1696_v9, 5  ;;  %v1536_v26 = vld [vmem:[#allocation2 + $0x4c] sm:$0xf]  ;;  %v1700_v57 = vshrl.u32 %v8786_v2, 16 }
 0x15c   : > { %1438 = vst [vmem:[#allocation2 + $0x84] sm:$0x1] %v1437_v11  ;;  %1349 = vst [vmem:[#allocation2 + $0x78] sm:$0xf] %v1348_v39  ;;  %v1113_v1 = vor.u32 %v1111_v32, %v1110_v52  ;;  %v1115_v10 = vrot.slane %v1110_v52, 4  ;;  %v1706_v53 = vshll.u32 %v8809_v15, 16 }
 0x15d   : > { %v2097_v18 = vld [vmem:[#allocation2 + $0x2c] sm:$0x1]  ;;  %1568 = vst [vmem:[#allocation3 + $0x1d4] sm:$0xf] %v1536_v26  ;;  %v7930_v37 = vld [vmem:[%s10714_s6 + $0x190] sm:$0xff]   ;;  %v1699_v45 = vsel %vm8695_vm1, %v1694_v34, %v1698_v12  ;;  %v786_v9 = vmax.f32 %v8798_v56, 0.0 }
 0x15e   : > { %v6874_v58 = vrot.slane %v2095_v38, 9  ;;  %v2208_v43 = vrot.slane %v2096_v51, 5  ;;  %v7895_v2 = vld [vmem:[%s10714_s6 + $0x128] sm:$0xff]   ;;  %v10737_v15 = vrot.slane %v8835_v7, 5  ;;  %v1114_v32 = vsel %vm8379_vm10, %v1106_v20, %v1113_v1  ;;  %2058 = vst [vmem:[#allocation3 + $0x94] sm:$0xf] %v1699_v45  ;;  %7545 = vmatpush3.bf16.msra.mxu0 %v7930_v37 }
 0x15f   : > { %v1359_v63 = vsel %vm8371_vm9, %v1115_v10, %v1358_v17  ;;  %v1702_v36 = vrot.slane %v1700_v57, 4  ;;  %v7908_v51 = vld [vmem:[%s10714_s6 + $0x160] sm:$0xff]   ;;  %1357 = vst [vmem:[#allocation2 + $0x88] sm:$0xf] %v1114_v32  ;;  %v8866_v25 = vpack.c.bf16 %v786_v9, %v786_v9  ;;  %v2211_v42 = vrot.slane %v2097_v18, 5  ;;  %v4048_v52 = vld [vmem:[#allocation3 + $0x98] sm:$0xff]  ;;  %7427 = vmatpush3.bf16.msra.mxu1 %v7895_v2 }
 0x160   : > { %v8864_v56 = vld [vmem:[#allocation2 + $0x60] sm:$0xf]  ;;  %1360 = vst [vmem:[#allocation2 + $0x8c] sm:$0x1] %v1359_v63  ;;  %v2209_v38 = vsel %vm8447_vm14, %v6874_v58, %v2208_v43  ;;  %v2210_v20 = vrot.slane %v2208_v43, 4  ;;  %v10792_v6 = vshrl.u32 %v8748_v28, 16  ;;  %7428 = vmatprep.subr.bf16.mxu1 %v7908_v51 }
 0x161   : > { %v7909_v17 = vld [vmem:[%s10714_s6 + $0x120] sm:$0xff]   ;;  %v4053_v11 = vld [vmem:[#allocation3 + $0xbc] sm:$0xff]  ;;  %v1703_v34 = vor.u32 %v1702_v36, %v1698_v12  ;;  %2335 = vst [vmem:[#allocation3 + $0xe0] sm:$0xf] %v2209_v38  ;;  %v791_v26 = vmax.f32 %v8839_v8, 0.0  ;;  %v1708_v57 = vrot.slane %v1706_v53, 5  ;;  %v718_v12 = vpop.f32.mrf.mxu0 }
 0x162   : > { %v8875_v13 = vrot.slane %v10792_v6, 4  ;;  %v7868_v39 = vld [vmem:[#allocation3 + $0x9c] ss:$36 sps:$4 sm:$0xff]   ;;  %v8878_v1 = vld [vmem:[#allocation2 + $0x60] sm:$0xf]  ;;  %v6940_v18 = vcombine.low %v4048_v52, %v4053_v11  ;;  %v2212_v45 = vsel %vm8447_vm14, %v2210_v20, %v2211_v42  ;;  %v10794_v28 = vshrl.u32 %v8754_v44, 16 }
 0x163   : > { %10793 = vst [vmem:[#allocation19_spill] sm:$0xff] %v8878_v1  ;;  %v7864_v10 = vld [vmem:[#allocation3 + $0x4c] ss:$36 sps:$4 sm:$0xff]   ;;  %5715 = vmatprep.mubr.bf16.mxu0 %v7868_v39  ;;  %2336 = vst [vmem:[#allocation3 + $0x104] sm:$0xf] %v2212_v45  ;;  %v7922_v8 = vld [vmem:[%s10714_s6 + $0x158] sm:$0xff]   ;;  %v7701_v42 = vpop.f32.mrf.mxu0  ;;  %7429 = vmatpush3.bf16.msra.mxu1 %v7909_v17 }
 0x164   : > { %v8884_v9 = vrot.slane %v10794_v28, 4  ;;  %v7870_v58 = vld [vmem:[#allocation3 + $0x48] ss:$36 sps:$4 sm:$0xff]   ;;  %v10796_v37 = vshrl.u32 %v8800_v29, 16  ;;  %v8897_v44 = vrot.slane %v10737_v15, 4  ;;  %5546 = vmatprep.mubr.bf16.mxu1 %v7864_v10  ;;  %v1704_v2 = vrot.slane %v1703_v34, 4  ;;  %5716 = vmatmul.mubr.bf16.gmra.mxu0 %v6940_v18 }
 0x165   : > { %v2376_v43 = vld [vmem:[#allocation2 + $0x60] sm:$0xf]  ;;  %v1091_v63 = vshrl.u32 %v8866_v25, 16  ;;  %v1433_v20 = vld [vmem:[#allocation2 + $0x78] sm:$0x1]  ;;  %5547 = vmatmul.mubr.bf16.gmra.mxu1 %v7870_v58  ;;  %v7168_v29 = vpack.c.bf16 %v791_v26, %v791_v26  ;;  %v1094_v11 = vshll.u32 %v8866_v25, 16  ;;  %7430 = vmatprep.subr.bf16.mxu1 %v7922_v8  ;;  %v8943_v15 = vadd.f32 %v8732_v62, %v7701_v42 }
 0x166   : > { %10795 = vst [vmem:[#allocation20_spill] sm:$0xff] %v8884_v9  ;;  %v8889_v53 = vld [vmem:[#allocation2 + $0x60] sm:$0xf]  ;;  %v8893_v32 = vrot.slane %v10796_v37, 4  ;;  %10798 = vst [vmem:[#allocation22_spill] sm:$0xff] %v8897_v44  ;;  %v1434_v6 = vsel %vm8371_vm9, 0, %v1433_v20  ;;  %v1709_v52 = vsel %vm8695_vm1, %v1704_v2, %v1708_v57 }
 0x167   : > { %2408 = vst [vmem:[#allocation3 + $0x204] sm:$0xf] %v2376_v43  ;;  %v2377_v39 = vld [vmem:[#allocation2 + $0x64] sm:$0xf]  ;;  %v7923_v34 = vld [vmem:[%s10714_s6 + $0x118] sm:$0xff]   ;;  %v10799_v26 = vshrl.u32 %v8503_v48, 16 }
 0x168   : > { %10797 = vst [vmem:[#allocation21_spill] sm:$0xff] %v8893_v32  ;;  %1435 = vst [vmem:[#allocation2 + $0x78] sm:$0x1] %v1434_v6  ;;  %v1491_v18 = vld [vmem:[#allocation2 + $0x8c] sm:$0x1]  ;;  %v10800_v28 = vshll.u32 %v8503_v48, 16  ;;  %7431 = vmatpush3.bf16.msra.mxu1 %v7923_v34 }
 0x169   : > { %2059 = vst [vmem:[#allocation3 + $0xb8] sm:$0xf] %v1709_v52  ;;  %v8914_v45 = vrot.slane %v10799_v26, 4  ;;  %2409 = vst [vmem:[#allocation3 + $0x228] sm:$0xf] %v2377_v39  ;;  %v7936_v25 = vld [vmem:[%s10714_s6 + $0x150] sm:$0xff]   ;;  %v719_v26 = vadd.f32 %v8732_v62, %v718_v12 }
 0x16a   : > { %v8918_v57 = vrot.slane %v10800_v28, 5  ;;  %v8924_v58 = vld [vmem:[#allocation2 + $0x84] sm:$0xe]  ;;  %v1089_v43 = vrot.slane %v8807_v33, 4  ;;  %v1492_v37 = vsel %vm8404_vm11, 0, %v1491_v18  ;;  %v1093_v2 = vrot.slane %v1091_v63, 7  ;;  %v721_v28 = vpop.f32.mrf.mxu0  ;;  %7432 = vmatprep.subr.bf16.mxu1 %v7936_v25 }
 0x16b   : > { %10801 = vst [vmem:[#allocation23_spill] sm:$0xff] %v8924_v58  ;;  %v1351_v20 = vld [vmem:[#allocation2 + $0x80] sm:$0x1]  ;;  %v8929_v48 = vld [vmem:[#allocation2 + $0x2c] sm:$0x1]  ;;  %v1134_v52 = vshrl.u32 %v7168_v29, 16 }
 0x16c   : > { %v8932_v8 = vld [vmem:[#allocation2 + $0x84] sm:$0xf]  ;;  %1493 = vst [vmem:[#allocation2 + $0x8c] sm:$0x1] %v1492_v37  ;;  %v1137_v39 = vshll.u32 %v7168_v29, 16  ;;  %v7937_v33 = vld [vmem:[%s10714_s6 + $0x110] sm:$0xff]   ;;  %v1096_v18 = vor.u32 %v1094_v11, %v1093_v2  ;;  %v1717_v36 = vor.u32 %v8918_v57, %v8914_v45  ;;  %v7704_v44 = vpop.f32.mrf.mxu0 }
 0x16d   : > { %v8938_v10 = vld [vmem:[#allocation2 + $0x84] sm:$0xf]  ;;  %v7875_v38 = vld [vmem:[#allocation3 + $0xe4] ss:$36 sps:$4 sm:$0xff]   ;;  %v8946_v29 = vld [vmem:[#allocation2 + $0x88] sm:$0xf]  ;;  %7433 = vmatpush3.bf16.msra.mxu1 %v7937_v33 }
 0x16e   : > { %10802 = vst [vmem:[#allocation24_spill] sm:$0xff] %v8938_v10  ;;  %v8940_v63 = vld [vmem:[#allocation2 + $0x84] sm:$0xf]  ;;  %v1098_v12 = vrot.slane %v1093_v2, 4  ;;  %v4058_v6 = vld [vmem:[#allocation3 + $0xe0] sm:$0xff]  ;;  %v8948_v17 = vrot.slane %v1134_v52, 7  ;;  %v1097_v42 = vsel %vm8379_vm10, %v1089_v43, %v1096_v18  ;;  %5723 = vmatprep.mubr.bf16.mxu0 %v7875_v38  ;;  %v8957_v2 = vadd.f32 %v8732_v62, %v721_v28 }
 0x16f   : > { %10803 = vst [vmem:[#allocation25_spill] sm:$0xff] %v8940_v63  ;;  %v1368_v51 = vld [vmem:[#allocation2 + $0x9c] sm:$0xf]  ;;  %v8952_v11 = vld [vmem:[#allocation2 + $0x88] sm:$0xf]  ;;  %v8960_v52 = vadd.f32 %v8732_v62, %v7704_v44  ;;  %v1730_v43 = vshll.u32 %v8929_v48, 16 }
 0x170   : > { %v8086_v34 = vld [vmem:[#allocation2 + $0x28] sm:$0xf]  ;;  %v2098_v9 = vld [vmem:[#allocation2 + $0x30] sm:$0xe]  ;;  %v2099_v32 = vld [vmem:[#allocation2 + $0x34] sm:$0xf]  ;;  %v1352_v57 = vsel %vm8371_vm9, %v1098_v12, %v1351_v20  ;;  %v1139_v25 = vor.u32 %v1137_v39, %v8948_v17 }
 0x171   : > { %v1720_v37 = vshll.u32 %v8086_v34, 16  ;;  %v1537_v58 = vld [vmem:[#allocation2 + $0x54] sm:$0xf]  ;;  %v7943_v45 = vld [vmem:[%s10714_s6 + $0x1c8] sm:$0xff]   ;;  %1350 = vst [vmem:[#allocation2 + $0x7c] sm:$0xf] %v1097_v42 }
 0x172   : > { %v4063_v38 = vld [vmem:[#allocation3 + $0x104] sm:$0xff]  ;;  %v789_v18 = vmax.f32 %v719_v26, 0.0  ;;  %v1538_v28 = vld [vmem:[#allocation2 + $0x58] sm:$0xf]  ;;  %1569 = vst [vmem:[#allocation3 + $0x1f8] sm:$0xf] %v1537_v58  ;;  %7546 = vmatprep.subr.bf16.mxu0 %v7943_v45  ;;  %v1369_v33 = vsel %vm8363_vm8, %v1139_v25, %v1368_v51 }
 0x173   : > { %1353 = vst [vmem:[#allocation2 + $0x80] sm:$0x1] %v1352_v57  ;;  %v6949_v7 = vcombine.low %v4058_v6, %v4063_v38  ;;  %v2100_v42 = vld [vmem:[#allocation2 + $0x38] sm:$0x1]  ;;  %1570 = vst [vmem:[#allocation3 + $0x21c] sm:$0xf] %v1538_v28 }
 0x174   : > { %v1718_v26 = vrot.slane %v1717_v36, 4  ;;  %v7944_v58 = vld [vmem:[%s10714_s6 + $0x188] sm:$0xff]   ;;  %v7166_v45 = vpack.c.bf16 %v789_v18, %v789_v18  ;;  %1370 = vst [vmem:[#allocation2 + $0x9c] sm:$0xf] %v1369_v33  ;;  %v1722_v28 = vrot.slane %v1720_v37, 5  ;;  %v1732_v20 = vrot.slane %v1730_v43, 5 }
 0x175   : > { %v7871_v6 = vld [vmem:[#allocation3 + $0x94] ss:$36 sps:$4 sm:$0xff]   ;;  %5724 = vmatmul.mubr.bf16.gmra.mxu0 %v6949_v7  ;;  %v6875_v1 = vrot.slane %v2098_v9, 9  ;;  %v2215_v36 = vrot.slane %v2099_v32, 5  ;;  %v2218_v34 = vrot.slane %v2100_v42, 5  ;;  %v792_v44 = vmax.f32 %v8943_v15, 0.0 }
 0x176   : > { %v7877_v38 = vld [vmem:[#allocation3 + $0x90] ss:$36 sps:$4 sm:$0xff]   ;;  %7547 = vmatpush3.bf16.msra.mxu0 %v7944_v58  ;;  %5554 = vmatprep.mubr.bf16.mxu1 %v7871_v6  ;;  %v1117_v48 = vshrl.u32 %v7166_v45, 16  ;;  %v1120_v39 = vshll.u32 %v7166_v45, 16  ;;  %v1600_v57 = vld [vmem:[#allocation2 + $0x34] sm:$0xf]  ;;  %v1723_v7 = vsel %vm8695_vm1, %v1718_v26, %v1722_v28  ;;  %v1727_v51 = vor.u32 %v8505_v49, %v1722_v28 }
 0x177   : > { %v8983_v12 = vld [vmem:[#allocation2 + $0x88] sm:$0xf]  ;;  %5555 = vmatmul.mubr.bf16.gmra.mxu1 %v7877_v38  ;;  %v1361_v37 = vld [vmem:[#allocation2 + $0x90] sm:$0xf]  ;;  %v2216_v9 = vsel %vm8447_vm14, %v6875_v1, %v2215_v36  ;;  %v2217_v32 = vrot.slane %v2215_v36, 4  ;;  %v7169_v18 = vpack.c.bf16 %v792_v44, %v792_v44  ;;  %v10804_v26 = vshrl.u32 %v8586_v59, 16 }
 0x178   : > { %v7950_v25 = vld [vmem:[%s10714_s6 + $0x148] sm:$0xff]   ;;  %2060 = vst [vmem:[#allocation3 + $0xdc] sm:$0xf] %v1723_v7  ;;  %v8995_v15 = vrot.slane %v1117_v48, 7  ;;  %2337 = vst [vmem:[#allocation3 + $0x128] sm:$0xf] %v2216_v9 }
 0x179   : > { %v8993_v43 = vld [vmem:[#allocation2 + $0x88] sm:$0xf]  ;;  %v1601_v42 = vld [vmem:[#allocation2 + $0x38] sm:$0x1]  ;;  %v1737_v49 = vrot.slane %v10804_v26, 4  ;;  %v10805_v58 = vshll.u32 %v8586_v59, 16  ;;  %v2219_v48 = vsel %vm8447_vm14, %v2217_v32, %v2218_v34  ;;  %7434 = vmatprep.subr.bf16.mxu1 %v7950_v25 }
 0x17a   : > { %v2378_v1 = vld [vmem:[#allocation2 + $0x6c] sm:$0xf]  ;;  %v1488_v45 = vld [vmem:[#allocation2 + $0x80] sm:$0x1]  ;;  %v1728_v38 = vrot.slane %v1727_v51, 4  ;;  %v1744_v28 = vshll.u32 %v1600_v57, 16  ;;  %v1122_v9 = vor.u32 %v1120_v39, %v8995_v15 }
 0x17b   : > { %v1740_v6 = vrot.slane %v10805_v58, 5  ;;  %v7951_v33 = vld [vmem:[%s10714_s6 + $0x108] sm:$0xff]   ;;  %v1748_v36 = vshrl.u32 %v1600_v57, 16  ;;  %2410 = vst [vmem:[#allocation3 + $0x24c] sm:$0xf] %v2378_v1  ;;  %v7957_v44 = vld [vmem:[%s10714_s6 + $0x1c0] sm:$0xff]  }
 0x17c   : > { %v1489_v7 = vsel %vm8404_vm11, 0, %v1488_v45  ;;  %2338 = vst [vmem:[#allocation3 + $0x14c] sm:$0xf] %v2219_v48  ;;  %v1142_v51 = vshrl.u32 %v7169_v18, 16  ;;  %v2101_v26 = vld [vmem:[#allocation2 + $0x3c] sm:$0xe]  ;;  %7435 = vmatpush3.bf16.msra.mxu1 %v7951_v33  ;;  %v1733_v57 = vsel %vm8695_vm1, %v1728_v38, %v1732_v20  ;;  %7548 = vmatprep.subr.bf16.mxu0 %v7957_v44  ;;  %v1362_v33 = vsel %vm8363_vm8, %v1122_v9, %v1361_v37 }
 0x17d   : > { %v2379_v58 = vld [vmem:[#allocation2 + $0x70] sm:$0xf]  ;;  %v7958_v34 = vld [vmem:[%s10714_s6 + $0x180] sm:$0xff]   ;;  %1490 = vst [vmem:[#allocation2 + $0x80] sm:$0x1] %v1489_v7  ;;  %v1145_v32 = vshll.u32 %v7169_v18, 16  ;;  %v1741_v1 = vor.u32 %v1740_v6, %v1737_v49 }
 0x17e   : > { %v1372_v25 = vld [vmem:[#allocation2 + $0xa4] sm:$0x1]  ;;  %v1746_v59 = vrot.slane %v1744_v28, 5  ;;  %v2102_v45 = vld [vmem:[#allocation2 + $0x40] sm:$0xf]  ;;  %v1140_v48 = vrot.slane %v8948_v17, 4  ;;  %7549 = vmatpush3.bf16.msra.mxu0 %v7958_v34 }
 0x17f   : > { %2411 = vst [vmem:[#allocation3 + $0x270] sm:$0xf] %v2379_v58  ;;  %v1539_v39 = vld [vmem:[#allocation2 + $0x60] sm:$0xf]  ;;  %v1442_v10 = vld [vmem:[#allocation2 + $0x9c] sm:$0x1] }
 0x180   : > { %2061 = vst [vmem:[#allocation3 + $0x100] sm:$0xf] %v1733_v57  ;;  %v1144_v63 = vrot.slane %v1142_v51, 7  ;;  %v1750_v7 = vrot.slane %v1748_v36, 4  ;;  %1571 = vst [vmem:[#allocation3 + $0x240] sm:$0xf] %v1539_v39 }
 0x181   : > { %v10746_v20 = vrot.slane %v8993_v43, 5  ;;  %v1443_v18 = vsel %vm8371_vm9, 0, %v1442_v10  ;;  %1363 = vst [vmem:[#allocation2 + $0x90] sm:$0xf] %v1362_v33  ;;  %v1742_v49 = vrot.slane %v1741_v1, 4  ;;  %v1754_v6 = vshll.u32 %v1601_v42, 16 }
 0x182   : > { %v1540_v38 = vld [vmem:[#allocation2 + $0x64] sm:$0xf]  ;;  %1444 = vst [vmem:[#allocation2 + $0x9c] sm:$0x1] %v1443_v18  ;;  %v1147_v17 = vor.u32 %v1145_v32, %v1144_v63  ;;  %v1149_v28 = vrot.slane %v1144_v63, 4  ;;  %v1751_v44 = vor.u32 %v1750_v7, %v1746_v59  ;;  %v790_v58 = vmax.f32 %v8957_v2, 0.0 }
 0x183   : > { %v2103_v37 = vld [vmem:[#allocation2 + $0x44] sm:$0x1]  ;;  %1572 = vst [vmem:[#allocation3 + $0x264] sm:$0xf] %v1540_v38  ;;  %v1747_v36 = vsel %vm8695_vm1, %v1742_v49, %v1746_v59  ;;  %v1756_v9 = vrot.slane %v1754_v6, 5  ;;  %v6876_v51 = vrot.slane %v2101_v26, 9 }
 0x184   : > { %v2222_v34 = vrot.slane %v2102_v45, 5  ;;  %v7964_v10 = vld [vmem:[%s10714_s6 + $0x140] sm:$0xff]   ;;  %v1148_v42 = vsel %vm8379_vm10, %v1140_v48, %v1147_v17  ;;  %v1373_v63 = vsel %vm8371_vm9, %v1149_v28, %v1372_v25  ;;  %v1752_v57 = vrot.slane %v1751_v44, 4  ;;  %2062 = vst [vmem:[#allocation3 + $0x124] sm:$0xf] %v1747_v36 }
 0x185   : > { %v7167_v2 = vpack.c.bf16 %v790_v58, %v790_v58  ;;  %v7965_v59 = vld [vmem:[%s10714_s6 + $0x100] sm:$0xff]   ;;  %1371 = vst [vmem:[#allocation2 + $0xa0] sm:$0xf] %v1148_v42  ;;  %1374 = vst [vmem:[#allocation2 + $0xa4] sm:$0x1] %v1373_v63  ;;  %v2225_v48 = vrot.slane %v2103_v37, 5  ;;  %7436 = vmatprep.subr.bf16.mxu1 %v7964_v10  ;;  %v734_v42 = vpop.f32.mrf.mxu0 }
 0x186   : > { %v4068_v32 = vld [vmem:[#allocation3 + $0x128] sm:$0xff]  ;;  %v2223_v45 = vsel %vm8447_vm14, %v6876_v51, %v2222_v34  ;;  %v2224_v39 = vrot.slane %v2222_v34, 4  ;;  %v9039_v33 = vld [vmem:[#allocation2 + $0x78] sm:$0xf]  ;;  %v10807_v7 = vshrl.u32 %v8946_v29, 16  ;;  %v1757_v49 = vsel %vm8695_vm1, %v1752_v57, %v1756_v9  ;;  %7437 = vmatpush3.bf16.msra.mxu1 %v7965_v59 }
 0x187   : > { %v4073_v26 = vld [vmem:[#allocation3 + $0x14c] sm:$0xff]  ;;  %v9041_v25 = vld [vmem:[#allocation2 + $0x78] sm:$0xf]  ;;  %v1125_v6 = vshrl.u32 %v7167_v2, 16  ;;  %2339 = vst [vmem:[#allocation3 + $0x170] sm:$0xf] %v2223_v45 }
 0x188   : > { %v7882_v1 = vld [vmem:[#allocation3 + $0x12c] ss:$36 sps:$4 sm:$0xff]   ;;  %10806 = vst [vmem:[#allocation26_spill] sm:$0xff] %v9041_v25  ;;  %v9045_v18 = vrot.slane %v10807_v7, 4  ;;  %v6958_v38 = vcombine.low %v4068_v32, %v4073_v26  ;;  %v7878_v17 = vld [vmem:[#allocation3 + $0xdc] ss:$36 sps:$4 sm:$0xff]   ;;  %v2226_v58 = vsel %vm8447_vm14, %v2224_v39, %v2225_v48  ;;  %v7705_v39 = vpop.f32.mrf.mxu0 }
 0x189   : > { %5731 = vmatprep.mubr.bf16.mxu0 %v7882_v1  ;;  %v7884_v28 = vld [vmem:[#allocation3 + $0xd8] ss:$36 sps:$4 sm:$0xff]   ;;  %2063 = vst [vmem:[#allocation3 + $0x148] sm:$0xf] %v1757_v49  ;;  %v1128_v44 = vshll.u32 %v7167_v2, 16  ;;  %v9051_v36 = vrot.slane %v1125_v6, 7  ;;  %5562 = vmatprep.mubr.bf16.mxu1 %v7878_v17 }
 0x18a   : > { %v1439_v37 = vld [vmem:[#allocation2 + $0x90] sm:$0x1]  ;;  %5732 = vmatmul.mubr.bf16.gmra.mxu0 %v6958_v38  ;;  %2340 = vst [vmem:[#allocation3 + $0x194] sm:$0xf] %v2226_v58  ;;  %v795_v29 = vmax.f32 %v8960_v52, 0.0  ;;  %v10808_v9 = vshrl.u32 %v8556_v31, 16  ;;  %5563 = vmatmul.mubr.bf16.gmra.mxu1 %v7884_v28 }
 0x18b   : > { %v10809_v34 = vshll.u32 %v8556_v31, 16  ;;  %v9058_v63 = vld [vmem:[#allocation2 + $0x78] sm:$0xf]  ;;  %v10810_v57 = vshrl.u32 %v8952_v11, 16  ;;  %v10812_v59 = vshrl.u32 %v8983_v12, 16  ;;  %v9070_v52 = vrot.slane %v10746_v20, 4 }
 0x18c   : > { %v1761_v51 = vrot.slane %v10808_v9, 4  ;;  %v1123_v26 = vrot.slane %v8995_v15, 4  ;;  %v9073_v31 = vld [vmem:[#allocation2 + $0x44] sm:$0x1]  ;;  %v9077_v11 = vld [vmem:[#allocation2 + $0x9c] sm:$0xe]  ;;  %v1130_v15 = vor.u32 %v1128_v44, %v9051_v36  ;;  %v9088_v9 = vpack.c.bf16 %v795_v29, %v795_v29 }
 0x18d   : > { %v1764_v10 = vrot.slane %v10809_v34, 5  ;;  %v9062_v2 = vrot.slane %v10810_v57, 4  ;;  %v9066_v32 = vrot.slane %v10812_v59, 4  ;;  %10814 = vst [vmem:[#allocation29_spill] sm:$0xff] %v9070_v52  ;;  %v2380_v12 = vld [vmem:[#allocation2 + $0x78] sm:$0xf]  ;;  %v746_v20 = vadd.f32 %v8732_v62, %v7705_v39 }
 0x18e   : > { %v1440_v49 = vsel %vm8371_vm9, 0, %v1439_v37  ;;  %v2381_v6 = vld [vmem:[#allocation2 + $0x7c] sm:$0xf]  ;;  %2412 = vst [vmem:[#allocation3 + $0x294] sm:$0xf] %v2380_v12  ;;  %v1131_v44 = vsel %vm8379_vm10, %v1123_v26, %v1130_v15  ;;  %v1778_v29 = vshll.u32 %v9073_v31, 16 }
 0x18f   : > { %10811 = vst [vmem:[#allocation27_spill] sm:$0xff] %v9062_v2  ;;  %10813 = vst [vmem:[#allocation28_spill] sm:$0xff] %v9066_v32  ;;  %v9086_v58 = vld [vmem:[#allocation2 + $0x9c] sm:$0xf]  ;;  %v1497_v28 = vld [vmem:[#allocation2 + $0xa4] sm:$0x1]  ;;  %v1765_v34 = vor.u32 %v1764_v10, %v1761_v51  ;;  %v735_v51 = vadd.f32 %v8732_v62, %v734_v42  ;;  %v737_v10 = vpop.f32.mrf.mxu0 }
 0x190   : > { %1441 = vst [vmem:[#allocation2 + $0x90] sm:$0x1] %v1440_v49  ;;  %2413 = vst [vmem:[#allocation3 + $0x2b8] sm:$0xf] %v2381_v6  ;;  %v1498_v37 = vsel %vm8404_vm11, 0, %v1497_v28  ;;  %v1132_v26 = vrot.slane %v9051_v36, 4  ;;  %v9117_v52 = vadd.f32 %v8732_v62, %v737_v10 }
 0x191   : > { %v1365_v59 = vld [vmem:[#allocation2 + $0x98] sm:$0x1]  ;;  %v8087_v12 = vld [vmem:[#allocation2 + $0x40] sm:$0xf]  ;;  %v9095_v48 = vld [vmem:[#allocation2 + $0x9c] sm:$0xf]  ;;  %v7708_v2 = vpop.f32.mrf.mxu0 }
 0x192   : > { %v1768_v7 = vshll.u32 %v8087_v12, 16  ;;  %10815 = vst [vmem:[#allocation30_spill] sm:$0xff] %v9095_v48  ;;  %1499 = vst [vmem:[#allocation2 + $0xa4] sm:$0x1] %v1498_v37  ;;  %v7885_v49 = vld [vmem:[#allocation3 + $0x124] ss:$36 sps:$4 sm:$0xff]   ;;  %v1366_v36 = vsel %vm8371_vm9, %v1132_v26, %v1365_v59  ;;  %v9124_v59 = vadd.f32 %v8732_v62, %v7708_v2 }
 0x193   : > { %1364 = vst [vmem:[#allocation2 + $0x94] sm:$0xf] %v1131_v44  ;;  %v9101_v57 = vld [vmem:[#allocation2 + $0x9c] sm:$0xf]  ;;  %v4078_v15 = vld [vmem:[#allocation3 + $0x170] sm:$0xff]  ;;  %5570 = vmatprep.mubr.bf16.mxu1 %v7885_v49  ;;  %v1168_v31 = vshrl.u32 %v9088_v9, 16 }
 0x194   : > { %10816 = vst [vmem:[#allocation31_spill] sm:$0xff] %v9101_v57  ;;  %v4083_v12 = vld [vmem:[#allocation3 + $0x194] sm:$0xff]  ;;  %v2104_v17 = vld [vmem:[#allocation2 + $0x48] sm:$0xe]  ;;  %v7973_v37 = vld [vmem:[%s10714_s6 + $0x238] sm:$0xff]   ;;  %v1766_v38 = vrot.slane %v1765_v34, 4 }
 0x195   : > { %v9107_v44 = vld [vmem:[#allocation2 + $0xa0] sm:$0xf]  ;;  %v7889_v42 = vld [vmem:[#allocation3 + $0x174] ss:$36 sps:$4 sm:$0xff]   ;;  %v1171_v6 = vshll.u32 %v9088_v9, 16  ;;  %v1770_v1 = vrot.slane %v1768_v7, 5  ;;  %7710 = vmatprep.subr.bf16.mxu0 %v7973_v37  ;;  %7758 = vmatprep.subr.bf16.mxu1 %v7973_v37  ;;  %v6967_v25 = vcombine.low %v4078_v15, %v4083_v12 }
 0x196   : > { %v9111_v28 = vld [vmem:[#allocation2 + $0xa0] sm:$0xf]  ;;  %v7891_v45 = vld [vmem:[#allocation3 + $0x120] ss:$36 sps:$4 sm:$0xff]   ;;  %1367 = vst [vmem:[#allocation2 + $0x98] sm:$0x1] %v1366_v36  ;;  %5739 = vmatprep.mubr.bf16.mxu0 %v7889_v42 }
 0x197   : > { %v9119_v49 = vld [vmem:[#allocation2 + $0xa0] sm:$0xf]  ;;  %v9121_v39 = vrot.slane %v1168_v31, 7  ;;  %v1382_v34 = vld [vmem:[#allocation2 + $0xb4] sm:$0xf]  ;;  %v793_v32 = vmax.f32 %v735_v51, 0.0  ;;  %5571 = vmatmul.mubr.bf16.gmra.mxu1 %v7891_v45  ;;  %v1771_v26 = vsel %vm8695_vm1, %v1766_v38, %v1770_v1  ;;  %v1775_v37 = vor.u32 %v8615_v3, %v1770_v1  ;;  %5740 = vmatmul.mubr.bf16.gmra.mxu0 %v6967_v25 }
 0x198   : > { %v1541_v9 = vld [vmem:[#allocation2 + $0x6c] sm:$0xf]  ;;  %v2106_v31 = vld [vmem:[#allocation2 + $0x50] sm:$0x1]  ;;  %v1780_v62 = vrot.slane %v1778_v29, 5  ;;  %v6877_v2 = vrot.slane %v2104_v17, 9 }
 0x199   : > { %v2105_v42 = vld [vmem:[#allocation2 + $0x4c] sm:$0xf]  ;;  %1573 = vst [vmem:[#allocation3 + $0x288] sm:$0xf] %v1541_v9  ;;  %2064 = vst [vmem:[#allocation3 + $0x16c] sm:$0xf] %v1771_v26  ;;  %v1173_v3 = vor.u32 %v1171_v6, %v9121_v39  ;;  %v7170_v9 = vpack.c.bf16 %v793_v32, %v793_v32 }
 0x19a   : > { %v1542_v12 = vld [vmem:[#allocation2 + $0x70] sm:$0xf]  ;;  %v1964_v36 = vshrl.u32 %v9107_v44, 16  ;;  %v1776_v1 = vrot.slane %v1775_v37, 4  ;;  %v2229_v10 = vrot.slane %v2105_v42, 5  ;;  %v2232_v7 = vrot.slane %v2106_v31, 5 }
 0x19b   : > { %1574 = vst [vmem:[#allocation3 + $0x2ac] sm:$0xf] %v1542_v12  ;;  %v1606_v51 = vld [vmem:[#allocation2 + $0x4c] sm:$0xf]  ;;  %v1383_v29 = vsel %vm8363_vm8, %v1173_v3, %v1382_v34  ;;  %v796_v25 = vmax.f32 %v746_v20, 0.0  ;;  %v10817_v26 = vshrl.u32 %v8653_v21, 16 }
 0x19c   : > { %v1607_v17 = vld [vmem:[#allocation2 + $0x50] sm:$0x1]  ;;  %v10818_v15 = vshll.u32 %v8653_v21, 16  ;;  %1384 = vst [vmem:[#allocation2 + $0xb4] sm:$0xf] %v1383_v29  ;;  %v1781_v6 = vsel %vm8695_vm1, %v1776_v1, %v1780_v62  ;;  %v1151_v37 = vshrl.u32 %v7170_v9, 16  ;;  %v2230_v42 = vsel %vm8447_vm14, %v6877_v2, %v2229_v10 }
 0x19d   : > { %v1785_v44 = vrot.slane %v10817_v26, 4  ;;  %v1154_v32 = vshll.u32 %v7170_v9, 16  ;;  %v2107_v31 = vld [vmem:[#allocation2 + $0x54] sm:$0xe]  ;;  %v2382_v12 = vld [vmem:[#allocation2 + $0x84] sm:$0xf]  ;;  %v7173_v26 = vpack.c.bf16 %v796_v25, %v796_v25 }
 0x19e   : > { %v1788_v45 = vrot.slane %v10818_v15, 5  ;;  %v1494_v34 = vld [vmem:[#allocation2 + $0x98] sm:$0x1]  ;;  %2065 = vst [vmem:[#allocation3 + $0x190] sm:$0xf] %v1781_v6  ;;  %v2231_v3 = vrot.slane %v2229_v10, 4 }
 0x19f   : > { %v1375_v20 = vld [vmem:[#allocation2 + $0xa8] sm:$0xf]  ;;  %2341 = vst [vmem:[#allocation3 + $0x1b8] sm:$0xf] %v2230_v42  ;;  %v1792_v21 = vshll.u32 %v1606_v51, 16  ;;  %v1495_v62 = vsel %vm8404_vm11, 0, %v1494_v34 }
 0x1a0   : > { %v1789_v38 = vor.u32 %v1788_v45, %v1785_v44  ;;  %v2108_v15 = vld [vmem:[#allocation2 + $0x58] sm:$0xf]  ;;  %v2383_v29 = vld [vmem:[#allocation2 + $0x88] sm:$0xf]  ;;  %2414 = vst [vmem:[#allocation3 + $0x2dc] sm:$0xf] %v2382_v12  ;;  %v2233_v10 = vsel %vm8447_vm14, %v2231_v3, %v2232_v7 }
 0x1a1   : > { %v9149_v1 = vrot.slane %v1151_v37, 7  ;;  %v1796_v9 = vshrl.u32 %v1606_v51, 16  ;;  %v1802_v2 = vshll.u32 %v1607_v17, 16  ;;  %2415 = vst [vmem:[#allocation3 + $0x300] sm:$0xf] %v2383_v29  ;;  %v1176_v6 = vshrl.u32 %v7173_v26, 16 }
 0x1a2   : > { %v1543_v48 = vld [vmem:[#allocation2 + $0x78] sm:$0xf]  ;;  %1496 = vst [vmem:[#allocation2 + $0x98] sm:$0x1] %v1495_v62  ;;  %v1179_v25 = vshll.u32 %v7173_v26, 16  ;;  %v1790_v45 = vrot.slane %v1789_v38, 4 }
 0x1a3   : > { %v1544_v44 = vld [vmem:[#allocation2 + $0x7c] sm:$0xf]  ;;  %1575 = vst [vmem:[#allocation3 + $0x2d0] sm:$0xf] %v1543_v48  ;;  %v9153_v42 = vrot.slane %v1964_v36, 4  ;;  %v1156_v12 = vor.u32 %v1154_v32, %v9149_v1  ;;  %v1794_v37 = vrot.slane %v1792_v21, 5 }
 0x1a4   : > { %2342 = vst [vmem:[#allocation3 + $0x1dc] sm:$0xf] %v2233_v10  ;;  %v1798_v34 = vrot.slane %v1796_v9, 4  ;;  %1576 = vst [vmem:[#allocation3 + $0x2f4] sm:$0xf] %v1544_v44  ;;  %v1174_v51 = vrot.slane %v9121_v39, 4 }
 0x1a5   : > { %v1178_v17 = vrot.slane %v1176_v6, 7  ;;  %v794_v29 = vmax.f32 %v9117_v52, 0.0  ;;  %v2109_v62 = vld [vmem:[#allocation2 + $0x5c] sm:$0x1]  ;;  %v6878_v7 = vrot.slane %v2107_v31, 9  ;;  %v1376_v38 = vsel %vm8363_vm8, %v1156_v12, %v1375_v20 }
 0x1a6   : > { %v1386_v3 = vld [vmem:[#allocation2 + $0xbc] sm:$0x1]  ;;  %v1795_v48 = vsel %vm8695_vm1, %v1790_v45, %v1794_v37  ;;  %v1799_v36 = vor.u32 %v1798_v34, %v1794_v37  ;;  %v2236_v32 = vrot.slane %v2108_v15, 5  ;;  %v9162_v26 = vld [vmem:[#allocation2 + $0xa0] sm:$0xf]  ;;  %v1804_v10 = vrot.slane %v1802_v2, 5 }
 0x1a7   : > { %v1448_v21 = vld [vmem:[#allocation2 + $0xb4] sm:$0x1]  ;;  %1377 = vst [vmem:[#allocation2 + $0xa8] sm:$0xf] %v1376_v38  ;;  %v1181_v9 = vor.u32 %v1179_v25, %v1178_v17  ;;  %v1183_v39 = vrot.slane %v1178_v17, 4  ;;  %v7171_v52 = vpack.c.bf16 %v794_v29, %v794_v29  ;;  %v1157_v20 = vrot.slane %v9149_v1, 4 }
 0x1a8   : > { %2066 = vst [vmem:[#allocation3 + $0x1b4] sm:$0xf] %v1795_v48  ;;  %v1449_v31 = vsel %vm8371_vm9, 0, %v1448_v21  ;;  %v7892_v6 = vld [vmem:[#allocation3 + $0x16c] ss:$36 sps:$4 sm:$0xff]   ;;  %v2237_v45 = vsel %vm8447_vm14, %v6878_v7, %v2236_v32  ;;  %v2239_v44 = vrot.slane %v2109_v62, 5 }
 0x1a9   : > { %1450 = vst [vmem:[#allocation2 + $0xb4] sm:$0x1] %v1449_v31  ;;  %v4088_v15 = vld [vmem:[#allocation3 + $0x1b8] sm:$0xff]  ;;  %v1182_v12 = vsel %vm8379_vm10, %v1174_v51, %v1181_v9  ;;  %v1387_v2 = vsel %vm8371_vm9, %v1183_v39, %v1386_v3  ;;  %v7898_v25 = vld [vmem:[#allocation3 + $0x168] ss:$36 sps:$4 sm:$0xff]   ;;  %v1800_v37 = vrot.slane %v1799_v36, 4  ;;  %5578 = vmatprep.mubr.bf16.mxu1 %v7892_v6 }
 0x1aa   : > { %v1159_v34 = vshrl.u32 %v7171_v52, 16  ;;  %2343 = vst [vmem:[#allocation3 + $0x200] sm:$0xf] %v2237_v45  ;;  %1385 = vst [vmem:[#allocation2 + $0xb8] sm:$0xf] %v1182_v12  ;;  %v1162_v1 = vshll.u32 %v7171_v52, 16  ;;  %5579 = vmatmul.mubr.bf16.gmra.mxu1 %v7898_v25 }
 0x1ab   : > { %1388 = vst [vmem:[#allocation2 + $0xbc] sm:$0x1] %v1387_v2  ;;  %v1379_v17 = vld [vmem:[#allocation2 + $0xb0] sm:$0x1]  ;;  %v2238_v29 = vrot.slane %v2236_v32, 4  ;;  %v799_v62 = vmax.f32 %v9124_v59, 0.0  ;;  %v1805_v3 = vsel %vm8695_vm1, %v1800_v37, %v1804_v10  ;;  %v750_v32 = vpop.f32.mrf.mxu0 }
 0x1ac   : > { %v10819_v7 = vshrl.u32 %v8619_v40, 16  ;;  %v2384_v48 = vld [vmem:[#allocation2 + $0x90] sm:$0xf]  ;;  %v4093_v51 = vld [vmem:[#allocation3 + $0x1dc] sm:$0xff]  ;;  %v1161_v36 = vrot.slane %v1159_v34, 7  ;;  %v10820_v39 = vshll.u32 %v8619_v40, 16 }
 0x1ad   : > { %v7896_v21 = vld [vmem:[#allocation3 + $0x1bc] ss:$36 sps:$4 sm:$0xff]   ;;  %v1610_v9 = vld [vmem:[#allocation2 + $0x5c] sm:$0x1]  ;;  %2416 = vst [vmem:[#allocation3 + $0x324] sm:$0xf] %v2384_v48  ;;  %v6976_v2 = vcombine.low %v4088_v15, %v4093_v51  ;;  %v2240_v10 = vsel %vm8447_vm14, %v2238_v29, %v2239_v44  ;;  %v7176_v48 = vpack.c.bf16 %v799_v62, %v799_v62 }
 0x1ae   : > { %v1809_v38 = vrot.slane %v10819_v7, 4  ;;  %v1812_v31 = vrot.slane %v10820_v39, 5  ;;  %v8088_v52 = vld [vmem:[#allocation2 + $0x58] sm:$0xf]  ;;  %v10821_v59 = vshrl.u32 %v9111_v28, 16  ;;  %v10751_v12 = vrot.slane %v9162_v26, 5  ;;  %5747 = vmatprep.mubr.bf16.mxu0 %v7896_v21 }
 0x1af   : > { %v1816_v6 = vshll.u32 %v8088_v52, 16  ;;  %2067 = vst [vmem:[#allocation3 + $0x1d8] sm:$0xf] %v1805_v3  ;;  %v2385_v25 = vld [vmem:[#allocation2 + $0x94] sm:$0xf]  ;;  %v1164_v40 = vor.u32 %v1162_v1, %v1161_v36  ;;  %v1166_v7 = vrot.slane %v1161_v36, 4  ;;  %5748 = vmatmul.mubr.bf16.gmra.mxu0 %v6976_v2  ;;  %v7709_v36 = vpop.f32.mrf.mxu0 }
 0x1b0   : > { %v9182_v45 = vrot.slane %v10821_v59, 4  ;;  %v1545_v37 = vld [vmem:[#allocation2 + $0x84] sm:$0xf]  ;;  %v9187_v34 = vld [vmem:[#allocation2 + $0x90] sm:$0xf]  ;;  %v1813_v39 = vor.u32 %v1812_v31, %v1809_v38  ;;  %v9211_v59 = vrot.slane %v10751_v12, 4 }
 0x1b1   : > { %2344 = vst [vmem:[#allocation3 + $0x224] sm:$0xf] %v2240_v10  ;;  %2417 = vst [vmem:[#allocation3 + $0x348] sm:$0xf] %v2385_v25  ;;  %v1546_v28 = vld [vmem:[#allocation2 + $0x88] sm:$0xf]  ;;  %v1165_v38 = vsel %vm8379_vm10, %v1157_v20, %v1164_v40  ;;  %v1380_v51 = vsel %vm8371_vm9, %v1166_v7, %v1379_v17 }
 0x1b2   : > { %10822 = vst [vmem:[#allocation32_spill] sm:$0xff] %v9182_v45  ;;  %1577 = vst [vmem:[#allocation3 + $0x318] sm:$0xf] %v1545_v37  ;;  %v9189_v52 = vld [vmem:[#allocation2 + $0x90] sm:$0xf]  ;;  %v1818_v15 = vrot.slane %v1816_v6, 5 }
 0x1b3   : > { %10823 = vst [vmem:[#allocation33_spill] sm:$0xff] %v9189_v52  ;;  %v1445_v3 = vld [vmem:[#allocation2 + $0xa8] sm:$0x1]  ;;  %v8089_v44 = vld [vmem:[%s10713_s5] ss:$0 sm:$0xff]  ;;  %v1814_v21 = vrot.slane %v1813_v39, 4 }
 0x1b4   : > { %v9194_v29 = vadd.f32 %v8089_v44, %v750_v32  ;;  %1578 = vst [vmem:[#allocation3 + $0x33c] sm:$0xf] %v1546_v28  ;;  %v9196_v1 = vld [vmem:[#allocation2 + $0x90] sm:$0xf]  ;;  %v1446_v62 = vsel %vm8371_vm9, 0, %v1445_v3  ;;  %v10824_v6 = vshrl.u32 %v9119_v49, 16  ;;  %v1823_v39 = vor.u32 %v8712_v0, %v1818_v15 }
 0x1b5   : > { %10826 = vst [vmem:[#allocation35_spill] sm:$0xff] %v9211_v59  ;;  %1447 = vst [vmem:[#allocation2 + $0xa8] sm:$0x1] %v1446_v62  ;;  %v1826_v2 = vshll.u32 %v1610_v9, 16  ;;  %v1503_v25 = vld [vmem:[#allocation2 + $0xbc] sm:$0x1]  ;;  %v1819_v7 = vsel %vm8695_vm1, %v1814_v21, %v1818_v15  ;;  %v753_v62 = vpop.f32.mrf.mxu0  ;;  %v762_v20 = vadd.f32 %v8089_v44, %v7709_v36 }
 0x1b6   : > { %v9207_v32 = vrot.slane %v10824_v6, 4  ;;  %1378 = vst [vmem:[#allocation2 + $0xac] sm:$0xf] %v1165_v38  ;;  %1381 = vst [vmem:[#allocation2 + $0xb0] sm:$0x1] %v1380_v51  ;;  %v1202_v37 = vshrl.u32 %v7176_v48, 16  ;;  %v9235_v31 = vadd.f32 %v8089_v44, %v753_v62 }
 0x1b7   : > { %v1504_v40 = vsel %vm8404_vm11, 0, %v1503_v25  ;;  %v9222_v28 = vld [vmem:[#allocation2 + $0xb4] sm:$0xf]  ;;  %v1205_v3 = vshll.u32 %v7176_v48, 16  ;;  %2068 = vst [vmem:[#allocation3 + $0x1fc] sm:$0xf] %v1819_v7 }
 0x1b8   : > { %10825 = vst [vmem:[#allocation34_spill] sm:$0xff] %v9207_v32  ;;  %v9224_v9 = vld [vmem:[#allocation2 + $0xb4] sm:$0xe]  ;;  %1505 = vst [vmem:[#allocation2 + $0xbc] sm:$0x1] %v1504_v40  ;;  %v4098_v6 = vld [vmem:[#allocation3 + $0x200] sm:$0xff] }
 0x1b9   : > { %10827 = vst [vmem:[#allocation36_spill] sm:$0xff] %v9224_v9  ;;  %v9226_v38 = vld [vmem:[#allocation2 + $0xb4] sm:$0xf]  ;;  %v7899_v51 = vld [vmem:[#allocation3 + $0x1b4] ss:$36 sps:$4 sm:$0xff]   ;;  %v1828_v10 = vrot.slane %v1826_v2, 5 }
 0x1ba   : > { %10828 = vst [vmem:[#allocation37_spill] sm:$0xff] %v9226_v38  ;;  %v9228_v17 = vld [vmem:[#allocation2 + $0xb4] sm:$0xf]  ;;  %v4103_v25 = vld [vmem:[#allocation3 + $0x224] sm:$0xff]  ;;  %v9230_v21 = vrot.slane %v1202_v37, 7  ;;  %5586 = vmatprep.mubr.bf16.mxu1 %v7899_v51  ;;  %v1824_v40 = vrot.slane %v1823_v39, 4 }
 0x1bb   : > { %10829 = vst [vmem:[#allocation38_spill] sm:$0xff] %v9228_v17  ;;  %v7903_v49 = vld [vmem:[#allocation3 + $0x204] ss:$36 sps:$4 sm:$0xff]   ;;  %v1396_v0 = vld [vmem:[#allocation2 + $0xcc] sm:$0xf]  ;;  %v797_v48 = vmax.f32 %v9194_v29, 0.0  ;;  %v6985_v45 = vcombine.low %v4098_v6, %v4103_v25 }
 0x1bc   : > { %v9232_v15 = vld [vmem:[#allocation2 + $0xb8] sm:$0xf]  ;;  %v7905_v12 = vld [vmem:[#allocation3 + $0x1b0] ss:$36 sps:$4 sm:$0xff]   ;;  %v2110_v7 = vld [vmem:[#allocation2 + $0x60] sm:$0xe]  ;;  %5755 = vmatprep.mubr.bf16.mxu0 %v7903_v49  ;;  %v1207_v37 = vor.u32 %v1205_v3, %v9230_v21 }
 0x1bd   : > { %v2111_v32 = vld [vmem:[#allocation2 + $0x64] sm:$0xf]  ;;  %v2112_v52 = vld [vmem:[#allocation2 + $0x68] sm:$0x1]  ;;  %v1500_v44 = vld [vmem:[#allocation2 + $0xb0] sm:$0x1]  ;;  %5587 = vmatmul.mubr.bf16.gmra.mxu1 %v7905_v12  ;;  %5756 = vmatmul.mubr.bf16.gmra.mxu0 %v6985_v45  ;;  %v1829_v12 = vsel %vm8695_vm1, %v1824_v40, %v1828_v10  ;;  %v7174_v29 = vpack.c.bf16 %v797_v48, %v797_v48 }
 0x1be   : > { %v1612_v62 = vld [vmem:[#allocation2 + $0x64] sm:$0xf]  ;;  %v1501_v6 = vsel %vm8404_vm11, 0, %v1500_v44  ;;  %v1613_v25 = vld [vmem:[#allocation2 + $0x68] sm:$0x1]  ;;  %v1397_v36 = vsel %vm8363_vm8, %v1207_v37, %v1396_v0  ;;  %v6879_v49 = vrot.slane %v2110_v7, 9 }
 0x1bf   : > { %1502 = vst [vmem:[#allocation2 + $0xb0] sm:$0x1] %v1501_v6  ;;  %v2386_v2 = vld [vmem:[#allocation2 + $0x9c] sm:$0xf]  ;;  %v2387_v39 = vld [vmem:[#allocation2 + $0xa0] sm:$0xf] }
 0x1c0   : > { %1398 = vst [vmem:[#allocation2 + $0xcc] sm:$0xf] %v1397_v36  ;;  %2069 = vst [vmem:[#allocation3 + $0x220] sm:$0xf] %v1829_v12  ;;  %v2243_v51 = vrot.slane %v2111_v32, 5  ;;  %v2246_v3 = vrot.slane %v2112_v52, 5 }
 0x1c1   : > { %v800_v44 = vmax.f32 %v762_v20, 0.0  ;;  %2418 = vst [vmem:[#allocation3 + $0x36c] sm:$0xf] %v2386_v2  ;;  %2419 = vst [vmem:[#allocation3 + $0x390] sm:$0xf] %v2387_v39  ;;  %v1185_v6 = vshrl.u32 %v7174_v29, 16 }
 0x1c2   : > { %v1547_v45 = vld [vmem:[#allocation2 + $0x90] sm:$0xf]  ;;  %v1188_v59 = vshll.u32 %v7174_v29, 16  ;;  %v10830_v9 = vshrl.u32 %v8864_v56, 16  ;;  %v10831_v37 = vshll.u32 %v8864_v56, 16  ;;  %v2244_v7 = vsel %vm8447_vm14, %v6879_v49, %v2243_v51 }
 0x1c3   : > { %v1548_v40 = vld [vmem:[#allocation2 + $0x94] sm:$0xf]  ;;  %1579 = vst [vmem:[#allocation3 + $0x360] sm:$0xf] %v1547_v45  ;;  %v1389_v48 = vld [vmem:[#allocation2 + $0xc0] sm:$0xf]  ;;  %v7177_v52 = vpack.c.bf16 %v800_v44, %v800_v44 }
 0x1c4   : > { %v1833_v0 = vrot.slane %v10830_v9, 4  ;;  %v1836_v10 = vrot.slane %v10831_v37, 5  ;;  %v2245_v32 = vrot.slane %v2243_v51, 4  ;;  %v1840_v20 = vshll.u32 %v1612_v62, 16  ;;  %1580 = vst [vmem:[#allocation3 + $0x384] sm:$0xf] %v1548_v40 }
 0x1c5   : > { %v9260_v2 = vrot.slane %v1185_v6, 7  ;;  %2345 = vst [vmem:[#allocation3 + $0x248] sm:$0xf] %v2244_v7  ;;  %v1844_v29 = vshrl.u32 %v1612_v62, 16  ;;  %v1850_v36 = vshll.u32 %v1613_v25, 16  ;;  %v1210_v12 = vshrl.u32 %v7177_v52, 16 }
 0x1c6   : > { %v1837_v39 = vor.u32 %v1836_v10, %v1833_v0  ;;  %v2113_v9 = vld [vmem:[#allocation2 + $0x6c] sm:$0xe]  ;;  %v2247_v56 = vsel %vm8447_vm14, %v2245_v32, %v2246_v3  ;;  %v1213_v45 = vshll.u32 %v7177_v52, 16  ;;  %v1842_v37 = vrot.slane %v1840_v20, 5  ;;  %v2114_v38 = vld [vmem:[#allocation2 + $0x70] sm:$0xf] }
 0x1c7   : > { %v1190_v49 = vor.u32 %v1188_v59, %v9260_v2  ;;  %2346 = vst [vmem:[#allocation3 + $0x26c] sm:$0xf] %v2247_v56  ;;  %v1400_v44 = vld [vmem:[#allocation2 + $0xd4] sm:$0x1]  ;;  %v1846_v40 = vrot.slane %v1844_v29, 4  ;;  %v1212_v0 = vrot.slane %v1210_v12, 7 }
 0x1c8   : > { %v1838_v6 = vrot.slane %v1837_v39, 4  ;;  %v2115_v7 = vld [vmem:[#allocation2 + $0x74] sm:$0x1]  ;;  %v1852_v62 = vrot.slane %v1850_v36, 5  ;;  %v798_v25 = vmax.f32 %v9235_v31, 0.0  ;;  %v6880_v10 = vrot.slane %v2113_v9, 9 }
 0x1c9   : > { %v2388_v17 = vld [vmem:[#allocation2 + $0xa8] sm:$0xf]  ;;  %v1454_v3 = vld [vmem:[#allocation2 + $0xcc] sm:$0x1]  ;;  %v7906_v32 = vld [vmem:[#allocation3 + $0x1fc] ss:$36 sps:$4 sm:$0xff]   ;;  %v1390_v52 = vsel %vm8363_vm8, %v1190_v49, %v1389_v48  ;;  %v1847_v20 = vor.u32 %v1846_v40, %v1842_v37  ;;  %v1215_v29 = vor.u32 %v1213_v45, %v1212_v0 }
 0x1ca   : > { %v1843_v59 = vsel %vm8695_vm1, %v1838_v6, %v1842_v37  ;;  %v2250_v56 = vrot.slane %v2114_v38, 5  ;;  %v1616_v51 = vld [vmem:[#allocation2 + $0x74] sm:$0x1]  ;;  %2420 = vst [vmem:[#allocation3 + $0x3b4] sm:$0xf] %v2388_v17  ;;  %v1455_v39 = vsel %vm8371_vm9, 0, %v1454_v3  ;;  %v7175_v9 = vpack.c.bf16 %v798_v25, %v798_v25  ;;  %5594 = vmatprep.mubr.bf16.mxu1 %v7906_v32 }
 0x1cb   : > { %1391 = vst [vmem:[#allocation2 + $0xc0] sm:$0xf] %v1390_v52  ;;  %v1217_v31 = vrot.slane %v1212_v0, 4  ;;  %v7912_v36 = vld [vmem:[#allocation3 + $0x1f8] ss:$36 sps:$4 sm:$0xff]   ;;  %v1848_v48 = vrot.slane %v1847_v20, 4 }
 0x1cc   : > { %2070 = vst [vmem:[#allocation3 + $0x244] sm:$0xf] %v1843_v59  ;;  %v2116_v12 = vld [vmem:[#allocation2 + $0x78] sm:$0xe]  ;;  %v2117_v57 = vld [vmem:[#allocation2 + $0x7c] sm:$0xf]  ;;  %v2251_v38 = vsel %vm8447_vm14, %v6880_v10, %v2250_v56  ;;  %5595 = vmatmul.mubr.bf16.gmra.mxu1 %v7912_v36 }
 0x1cd   : > { %v2389_v14 = vld [vmem:[#allocation2 + $0xac] sm:$0xf]  ;;  %1456 = vst [vmem:[#allocation2 + $0xcc] sm:$0x1] %v1455_v39  ;;  %v2252_v37 = vrot.slane %v2250_v56, 4  ;;  %v2253_v17 = vrot.slane %v2115_v7, 5  ;;  %v1401_v25 = vsel %vm8371_vm9, %v1217_v31, %v1400_v44  ;;  %v1853_v7 = vsel %vm8695_vm1, %v1848_v48, %v1852_v62 }
 0x1ce   : > { %2421 = vst [vmem:[#allocation3 + $0x3d8] sm:$0xf] %v2389_v14  ;;  %v1549_v49 = vld [vmem:[#allocation2 + $0x9c] sm:$0xf]  ;;  %v10832_v6 = vmov 0   ;;  %v4108_v45 = vld [vmem:[#allocation3 + $0x248] sm:$0xff] }
 0x1cf   : > { %1520 = vst [vmem:[#allocation2 + $0xcc] sm:$0xf] %v10832_v6  ;;  %v10833_v40 = vrot.slane %v9230_v21, 4  ;;  %v1193_v3 = vshrl.u32 %v7175_v9, 16  ;;  %v1196_v32 = vshll.u32 %v7175_v9, 16  ;;  %v2254_v21 = vsel %vm8447_vm14, %v2252_v37, %v2253_v17  ;;  %v4113_v39 = vld [vmem:[#allocation3 + $0x26c] sm:$0xff] }
 0x1d0   : > { %2347 = vst [vmem:[#allocation3 + $0x290] sm:$0xf] %v2251_v38  ;;  %v1550_v10 = vld [vmem:[#allocation2 + $0xa0] sm:$0xf]  ;;  %1581 = vst [vmem:[#allocation3 + $0x3a8] sm:$0xf] %v1549_v49  ;;  %v6994_v48 = vcombine.low %v4108_v45, %v4113_v39 }
 0x1d1   : > { %v1216_v0 = vsel %vm8379_vm10, %v10833_v40, %v1215_v29  ;;  %1402 = vst [vmem:[#allocation2 + $0xd4] sm:$0x1] %v1401_v25  ;;  %v10834_v52 = vshrl.u32 %v8725_v47, 16  ;;  %v10835_v20 = vshll.u32 %v8725_v47, 16  ;;  %v2118_v56 = vld [vmem:[#allocation2 + $0x80] sm:$0x1] }
 0x1d2   : > { %1399 = vst [vmem:[#allocation2 + $0xd0] sm:$0xf] %v1216_v0  ;;  %1582 = vst [vmem:[#allocation3 + $0x3cc] sm:$0xf] %v1550_v10  ;;  %v7910_v29 = vld [vmem:[#allocation3 + $0x24c] ss:$36 sps:$4 sm:$0xff]  }
 0x1d3   : > { %v1857_v59 = vrot.slane %v10834_v52, 4  ;;  %v1860_v44 = vrot.slane %v10835_v20, 5  ;;  %1521 = vst [vmem:[#allocation2 + $0xd0] sm:$0xf] %v10832_v6  ;;  %2071 = vst [vmem:[#allocation3 + $0x268] sm:$0xf] %v1853_v7  ;;  %5763 = vmatprep.mubr.bf16.mxu0 %v7910_v29 }
 0x1d4   : > { %v1195_v31 = vrot.slane %v1193_v3, 7  ;;  %2348 = vst [vmem:[#allocation3 + $0x2b4] sm:$0xf] %v2254_v21  ;;  %v8090_v36 = vld [vmem:[#allocation2 + $0x70] sm:$0xf]  ;;  %v1874_v9 = vshll.u32 %v1616_v51, 16  ;;  %5764 = vmatmul.mubr.bf16.gmra.mxu0 %v6994_v48 }
 0x1d5   : > { %v1864_v62 = vshll.u32 %v8090_v36, 16  ;;  %v1393_v14 = vld [vmem:[#allocation2 + $0xc8] sm:$0x1]  ;;  %v1861_v38 = vor.u32 %v1860_v44, %v1857_v59  ;;  %v6881_v37 = vrot.slane %v2116_v12, 9  ;;  %v2257_v17 = vrot.slane %v2117_v57, 5 }
 0x1d6   : > { %v1618_v49 = vld [vmem:[#allocation2 + $0x7c] sm:$0xf]  ;;  %v9291_v47 = vld [vmem:[#allocation2 + $0xb8] sm:$0xf]  ;;  %v1198_v0 = vor.u32 %v1196_v32, %v1195_v31  ;;  %v1200_v25 = vrot.slane %v1195_v31, 4  ;;  %v1876_v7 = vrot.slane %v1874_v9, 5 }
 0x1d7   : > { %v9293_v40 = vld [vmem:[#allocation2 + $0xb8] sm:$0xf]  ;;  %v1866_v10 = vrot.slane %v1864_v62, 5  ;;  %v2390_v3 = vld [vmem:[#allocation2 + $0xb4] sm:$0xf]  ;;  %v1862_v52 = vrot.slane %v1861_v38, 4  ;;  %v2258_v51 = vsel %vm8447_vm14, %v6881_v37, %v2257_v17 }
 0x1d8   : > { %v1451_v21 = vld [vmem:[#allocation2 + $0xc0] sm:$0x1]  ;;  %v2259_v45 = vrot.slane %v2257_v17, 4  ;;  %v2260_v12 = vrot.slane %v2118_v56, 5  ;;  %2422 = vst [vmem:[#allocation3 + $0x3fc] sm:$0xf] %v2390_v3  ;;  %v1394_v44 = vsel %vm8371_vm9, %v1200_v25, %v1393_v14 }
 0x1d9   : > { %v9297_v57 = vld [vmem:[#allocation2 + $0x80] sm:$0x1]  ;;  %v1452_v59 = vsel %vm8371_vm9, 0, %v1451_v21  ;;  %v10836_v32 = vrot.slane %v9260_v2, 4  ;;  %v1871_v39 = vor.u32 %v8875_v13, %v1866_v10  ;;  %2349 = vst [vmem:[#allocation3 + $0x2d8] sm:$0xf] %v2258_v51  ;;  %v1867_v56 = vsel %vm8695_vm1, %v1862_v52, %v1866_v10 }
 0x1da   : > { %v2391_v29 = vld [vmem:[#allocation2 + $0xb8] sm:$0xf]  ;;  %v1551_v31 = vld [vmem:[#allocation2 + $0xa8] sm:$0xf]  ;;  %1453 = vst [vmem:[#allocation2 + $0xc0] sm:$0x1] %v1452_v59  ;;  %v2261_v2 = vsel %vm8447_vm14, %v2259_v45, %v2260_v12 }
 0x1db   : > { %v1199_v20 = vsel %vm8379_vm10, %v10836_v32, %v1198_v0  ;;  %1395 = vst [vmem:[#allocation2 + $0xc8] sm:$0x1] %v1394_v44  ;;  %v10837_v35 = vshrl.u32 %v9039_v33, 16  ;;  %v10838_v30 = vshll.u32 %v9039_v33, 16  ;;  %v2119_v9 = vld [vmem:[#allocation2 + $0x84] sm:$0xe] }
 0x1dc   : > { %1392 = vst [vmem:[#allocation2 + $0xc4] sm:$0xf] %v1199_v20  ;;  %v2120_v13 = vld [vmem:[#allocation2 + $0x88] sm:$0xf]  ;;  %2423 = vst [vmem:[#allocation3 + $0x420] sm:$0xf] %v2391_v29 }
 0x1dd   : > { %v1881_v36 = vrot.slane %v10837_v35, 4  ;;  %v1884_v62 = vrot.slane %v10838_v30, 5  ;;  %v1552_v14 = vld [vmem:[#allocation2 + $0xac] sm:$0xf]  ;;  %1583 = vst [vmem:[#allocation3 + $0x3f0] sm:$0xf] %v1551_v31 }
 0x1de   : > { %v1509_v48 = vld [vmem:[#allocation2 + $0xd4] sm:$0x1]  ;;  %v4118_v38 = vld [vmem:[#allocation3 + $0x290] sm:$0xff]  ;;  %v1872_v37 = vrot.slane %v1871_v39, 4  ;;  %2072 = vst [vmem:[#allocation3 + $0x28c] sm:$0xf] %v1867_v56 }
 0x1df   : > { %2350 = vst [vmem:[#allocation3 + $0x2fc] sm:$0xf] %v2261_v2  ;;  %v1888_v17 = vshll.u32 %v1618_v49, 16  ;;  %v1892_v0 = vshrl.u32 %v1618_v49, 16  ;;  %1584 = vst [vmem:[#allocation3 + $0x414] sm:$0xf] %v1552_v14  ;;  %v1885_v21 = vor.u32 %v1884_v62, %v1881_v36 }
 0x1e0   : > { %v2824_v25 = vshrl.u32 %v9291_v47, 16  ;;  %v3633_v10 = vshrl.u32 %v9293_v40, 16  ;;  %v1510_v33 = vsel %vm8404_vm11, 0, %v1509_v48  ;;  %v7913_v3 = vld [vmem:[#allocation3 + $0x244] ss:$36 sps:$4 sm:$0xff]   ;;  %v4123_v52 = vld [vmem:[#allocation3 + $0x2b4] sm:$0xff]  ;;  %v1877_v12 = vsel %vm8695_vm1, %v1872_v37, %v1876_v7 }
 0x1e1   : > { %1511 = vst [vmem:[#allocation2 + $0xd4] sm:$0x1] %v1510_v33  ;;  %v7917_v51 = vld [vmem:[#allocation3 + $0x294] ss:$36 sps:$4 sm:$0xff]   ;;  %v7919_v45 = vld [vmem:[#allocation3 + $0x240] ss:$36 sps:$4 sm:$0xff]   ;;  %5602 = vmatprep.mubr.bf16.mxu1 %v7913_v3  ;;  %v7003_v49 = vcombine.low %v4118_v38, %v4123_v52 }
 0x1e2   : > { %v1898_v59 = vshll.u32 %v9297_v57, 16  ;;  %1522 = vst [vmem:[#allocation2 + $0xd4] sm:$0x1] %v10832_v6  ;;  %2073 = vst [vmem:[#allocation3 + $0x2b0] sm:$0xf] %v1877_v12  ;;  %v1886_v32 = vrot.slane %v1885_v21, 4  ;;  %5771 = vmatprep.mubr.bf16.mxu0 %v7917_v51  ;;  %5603 = vmatmul.mubr.bf16.gmra.mxu1 %v7919_v45 }
 0x1e3   : > { %v1890_v20 = vrot.slane %v1888_v17, 5  ;;  %v1894_v44 = vrot.slane %v1892_v0, 4  ;;  %v2121_v39 = vld [vmem:[#allocation2 + $0x8c] sm:$0x1]  ;;  %v9324_v29 = vld [vmem:[#allocation2 + $0xa8] sm:$0xf]  ;;  %5772 = vmatmul.mubr.bf16.gmra.mxu0 %v7003_v49 }
 0x1e4   : > { %v9326_v31 = vld [vmem:[#allocation2 + $0xb8] sm:$0xf]  ;;  %v6882_v56 = vrot.slane %v2119_v9, 9  ;;  %v2264_v2 = vrot.slane %v2120_v13, 5  ;;  %v1622_v7 = vld [vmem:[#allocation2 + $0x8c] sm:$0x1] }
 0x1e5   : > { %v1891_v6 = vsel %vm8695_vm1, %v1886_v32, %v1890_v20  ;;  %v1895_v57 = vor.u32 %v1894_v44, %v1890_v20  ;;  %v10839_v35 = vshrl.u32 %v8932_v8, 16  ;;  %v10840_v30 = vshll.u32 %v8932_v8, 16  ;;  %v2122_v14 = vld [vmem:[#allocation2 + $0x90] sm:$0xe]  ;;  %v2123_v48 = vld [vmem:[#allocation2 + $0x94] sm:$0xf] }
 0x1e6   : > { %v1506_v38 = vld [vmem:[#allocation2 + $0xc8] sm:$0x1]  ;;  %v1900_v37 = vrot.slane %v1898_v59, 5  ;;  %2074 = vst [vmem:[#allocation3 + $0x2d4] sm:$0xf] %v1891_v6  ;;  %v2265_v9 = vsel %vm8447_vm14, %v6882_v56, %v2264_v2  ;;  %v2267_v13 = vrot.slane %v2121_v39, 5 }
 0x1e7   : > { %v1905_v36 = vrot.slane %v10839_v35, 4  ;;  %v1908_v62 = vrot.slane %v10840_v30, 5  ;;  %v2124_v17 = vld [vmem:[#allocation2 + $0x98] sm:$0x1]  ;;  %v1975_v0 = vshrl.u32 %v9324_v29, 16  ;;  %v10841_v33 = vshrl.u32 %v9232_v15, 16 }
 0x1e8   : > { %v4128_v8 = vld [vmem:[#allocation3 + $0x2d8] sm:$0xff]  ;;  %2351 = vst [vmem:[#allocation3 + $0x320] sm:$0xf] %v2265_v9  ;;  %v1978_v51 = vshll.u32 %v9324_v29, 16  ;;  %v1507_v45 = vsel %vm8404_vm11, 0, %v1506_v38  ;;  %v1896_v59 = vrot.slane %v1895_v57, 4 }
 0x1e9   : > { %v9339_v3 = vrot.slane %v10841_v33, 4  ;;  %v4133_v52 = vld [vmem:[#allocation3 + $0x2fc] sm:$0xff]  ;;  %v2266_v49 = vrot.slane %v2264_v2, 4  ;;  %1508 = vst [vmem:[#allocation2 + $0xc8] sm:$0x1] %v1507_v45  ;;  %v1909_v20 = vor.u32 %v1908_v62, %v1905_v36  ;;  %v1922_v56 = vshll.u32 %v1622_v7, 16 }
 0x1ea   : > { %v7924_v12 = vld [vmem:[#allocation3 + $0x2dc] ss:$36 sps:$4 sm:$0xff]   ;;  %v8091_v44 = vld [vmem:[#allocation2 + $0x88] sm:$0xf]  ;;  %v6883_v6 = vrot.slane %v2122_v14, 9  ;;  %v1901_v9 = vsel %vm8695_vm1, %v1896_v59, %v1900_v37  ;;  %v7012_v21 = vcombine.low %v4128_v8, %v4133_v52  ;;  %v2271_v57 = vrot.slane %v2123_v48, 5 }
 0x1eb   : > { %v1624_v32 = vld [vmem:[#allocation2 + $0x94] sm:$0xf]  ;;  %v1912_v39 = vshll.u32 %v8091_v44, 16  ;;  %v1625_v35 = vld [vmem:[#allocation2 + $0x98] sm:$0x1]  ;;  %5779 = vmatprep.mubr.bf16.mxu0 %v7924_v12  ;;  %v2268_v19 = vsel %vm8447_vm14, %v2266_v49, %v2267_v13  ;;  %v1910_v36 = vrot.slane %v1909_v20, 4 }
 0x1ec   : > { %v2125_v30 = vld [vmem:[#allocation2 + $0x9c] sm:$0xe]  ;;  %v7920_v33 = vld [vmem:[#allocation3 + $0x28c] ss:$36 sps:$4 sm:$0xff]   ;;  %v2126_v2 = vld [vmem:[#allocation2 + $0xa0] sm:$0xf]  ;;  %v2272_v12 = vsel %vm8447_vm14, %v6883_v6, %v2271_v57  ;;  %5780 = vmatmul.mubr.bf16.gmra.mxu0 %v7012_v21 }
 0x1ed   : > { %v7926_v38 = vld [vmem:[#allocation3 + $0x288] ss:$36 sps:$4 sm:$0xff]   ;;  %2075 = vst [vmem:[#allocation3 + $0x2f8] sm:$0xf] %v1901_v9  ;;  %2352 = vst [vmem:[#allocation3 + $0x344] sm:$0xf] %v2268_v19  ;;  %5610 = vmatprep.mubr.bf16.mxu1 %v7920_v33 }
 0x1ee   : > { %v1914_v62 = vrot.slane %v1912_v39, 5  ;;  %v1924_v7 = vrot.slane %v1922_v56, 5  ;;  %v2274_v14 = vrot.slane %v2124_v17, 5  ;;  %v9349_v45 = vld [vmem:[#allocation2 + $0xa4] sm:$0x1]  ;;  %v2273_v37 = vrot.slane %v2271_v57, 4  ;;  %5611 = vmatmul.mubr.bf16.gmra.mxu1 %v7926_v38 }
 0x1ef   : > { %v10842_v8 = vshrl.u32 %v9187_v34, 16  ;;  %v10843_v48 = vshll.u32 %v9187_v34, 16  ;;  %v2392_v59 = vld [vmem:[#allocation2 + $0xc0] sm:$0xf]  ;;  %2353 = vst [vmem:[#allocation3 + $0x368] sm:$0xf] %v2272_v12 }
 0x1f0   : > { %v1915_v49 = vsel %vm8695_vm1, %v1910_v36, %v1914_v62  ;;  %v1919_v17 = vor.u32 %v9045_v18, %v1914_v62  ;;  %v1936_v20 = vshll.u32 %v1624_v32, 16  ;;  %v1940_v44 = vshrl.u32 %v1624_v32, 16  ;;  %v2393_v39 = vld [vmem:[#allocation2 + $0xc4] sm:$0xf]  ;;  %2424 = vst [vmem:[#allocation3 + $0x444] sm:$0xf] %v2392_v59 }
 0x1f1   : > { %v1929_v52 = vrot.slane %v10842_v8, 4  ;;  %v1932_v13 = vrot.slane %v10843_v48, 5  ;;  %2076 = vst [vmem:[#allocation3 + $0x31c] sm:$0xf] %v1915_v49  ;;  %v2275_v56 = vsel %vm8447_vm14, %v2273_v37, %v2274_v14  ;;  %v1946_v34 = vshll.u32 %v1625_v35, 16  ;;  %v4138_v12 = vld [vmem:[#allocation3 + $0x320] sm:$0xff] }
 0x1f2   : > { %v6884_v33 = vrot.slane %v2125_v30, 9  ;;  %v1628_v9 = vld [vmem:[#allocation2 + $0xa4] sm:$0x1]  ;;  %2425 = vst [vmem:[#allocation3 + $0x468] sm:$0xf] %v2393_v39  ;;  %v1920_v19 = vrot.slane %v1919_v17, 4 }
 0x1f3   : > { %v1933_v6 = vor.u32 %v1932_v13, %v1929_v52  ;;  %v1553_v21 = vld [vmem:[#allocation2 + $0xb4] sm:$0xf]  ;;  %2354 = vst [vmem:[#allocation3 + $0x38c] sm:$0xf] %v2275_v56  ;;  %v1938_v57 = vrot.slane %v1936_v20, 5  ;;  %v1942_v38 = vrot.slane %v1940_v44, 4 }
 0x1f4   : > { %v2278_v18 = vrot.slane %v2126_v2, 5  ;;  %v2128_v36 = vld [vmem:[#allocation2 + $0xa8] sm:$0xe]  ;;  %v2129_v62 = vld [vmem:[#allocation2 + $0xac] sm:$0xf]  ;;  %v1948_v48 = vrot.slane %v1946_v34, 5  ;;  %v1925_v52 = vsel %vm8695_vm1, %v1920_v19, %v1924_v7 }
 0x1f5   : > { %v1554_v32 = vld [vmem:[#allocation2 + $0xb8] sm:$0xf]  ;;  %1585 = vst [vmem:[#allocation3 + $0x438] sm:$0xf] %v1553_v21  ;;  %v1934_v8 = vrot.slane %v1933_v6, 4  ;;  %v2281_v14 = vrot.slane %v9349_v45, 5  ;;  %v1943_v13 = vor.u32 %v1942_v38, %v1938_v57 }
 0x1f6   : > { %v10844_v35 = vshrl.u32 %v9086_v58, 16  ;;  %v2130_v37 = vld [vmem:[#allocation2 + $0xb0] sm:$0x1]  ;;  %1586 = vst [vmem:[#allocation3 + $0x45c] sm:$0xf] %v1554_v32  ;;  %v2279_v2 = vsel %vm8447_vm14, %v6884_v33, %v2278_v18  ;;  %v2280_v59 = vrot.slane %v2278_v18, 4 }
 0x1f7   : > { %v3195_v49 = vld [vmem:[#allocation2 + $0x18] sm:$0xf]  ;;  %v3196_v17 = vld [vmem:[#allocation2 + $0x1c] sm:$0xf]  ;;  %v7927_v20 = vld [vmem:[#allocation3 + $0x2d4] ss:$36 sps:$4 sm:$0xff]   ;;  %v1939_v45 = vsel %vm8695_vm1, %v1934_v8, %v1938_v57 }
 0x1f8   : > { %v1953_v30 = vrot.slane %v10844_v35, 4  ;;  %v4143_v44 = vld [vmem:[#allocation3 + $0x344] sm:$0xff]  ;;  %2077 = vst [vmem:[#allocation3 + $0x340] sm:$0xf] %v1925_v52  ;;  %2355 = vst [vmem:[#allocation3 + $0x3b0] sm:$0xf] %v2279_v2  ;;  %v2282_v38 = vsel %vm8447_vm14, %v2280_v59, %v2281_v14  ;;  %5618 = vmatprep.mubr.bf16.mxu1 %v7927_v20 }
 0x1f9   : > { %v10845_v39 = vshll.u32 %v9086_v58, 16  ;;  %v8092_v6 = vld [vmem:[#allocation2 + $0xa0] sm:$0xf]  ;;  %3227 = vst [vmem:[#allocation3 + $0x18] sm:$0xf] %v3195_v49  ;;  %v7021_v33 = vcombine.low %v4138_v12, %v4143_v44  ;;  %v1944_v19 = vrot.slane %v1943_v13, 4 }
 0x1fa   : > { %v1960_v34 = vshll.u32 %v8092_v6, 16  ;;  %3228 = vst [vmem:[#allocation3 + $0x3c] sm:$0xf] %v3196_v17  ;;  %v7931_v7 = vld [vmem:[#allocation3 + $0x324] ss:$36 sps:$4 sm:$0xff]   ;;  %v1970_v18 = vshll.u32 %v1628_v9, 16 }
 0x1fb   : > { %v1956_v56 = vrot.slane %v10845_v39, 5  ;;  %v7933_v21 = vld [vmem:[#allocation3 + $0x2d0] ss:$36 sps:$4 sm:$0xff]   ;;  %2078 = vst [vmem:[#allocation3 + $0x364] sm:$0xf] %v1939_v45  ;;  %v6885_v8 = vrot.slane %v2128_v36, 9  ;;  %5787 = vmatprep.mubr.bf16.mxu0 %v7931_v7  ;;  %v1949_v52 = vsel %vm8695_vm1, %v1944_v19, %v1948_v48 }
 0x1fc   : > { %2356 = vst [vmem:[#allocation3 + $0x3d4] sm:$0xf] %v2282_v38  ;;  %v1962_v32 = vrot.slane %v1960_v34, 5  ;;  %v2285_v58 = vrot.slane %v2129_v62, 5  ;;  %v1630_v35 = vld [vmem:[#allocation2 + $0xac] sm:$0xf]  ;;  %5619 = vmatmul.mubr.bf16.gmra.mxu1 %v7933_v21  ;;  %5788 = vmatmul.mubr.bf16.gmra.mxu0 %v7021_v33 }
 0x1fd   : > { %v1957_v57 = vor.u32 %v1956_v56, %v1953_v30  ;;  %v1972_v2 = vrot.slane %v1970_v18, 5  ;;  %v2288_v12 = vrot.slane %v2130_v37, 5  ;;  %v1631_v13 = vld [vmem:[#allocation2 + $0xb0] sm:$0x1]  ;;  %v1977_v49 = vrot.slane %v1975_v0, 4  ;;  %v4148_v44 = vld [vmem:[#allocation3 + $0x368] sm:$0xff] }
 0x1fe   : > { %v7938_v9 = vld [vmem:[#allocation3 + $0x36c] ss:$36 sps:$4 sm:$0xff]   ;;  %2079 = vst [vmem:[#allocation3 + $0x388] sm:$0xf] %v1949_v52  ;;  %v1967_v30 = vor.u32 %v9153_v42, %v1962_v32  ;;  %v2286_v36 = vsel %vm8447_vm14, %v6885_v8, %v2285_v58  ;;  %v2287_v62 = vrot.slane %v2285_v58, 4  ;;  %v9384_v48 = vrot.slane %v2824_v25, 4 }
 0x1ff   : > { %v1958_v14 = vrot.slane %v1957_v57, 4  ;;  %v2131_v59 = vld [vmem:[#allocation2 + $0xb4] sm:$0xe]  ;;  %2357 = vst [vmem:[#allocation3 + $0x3f8] sm:$0xf] %v2286_v36  ;;  %v1980_v37 = vrot.slane %v1978_v51, 5  ;;  %5795 = vmatprep.mubr.bf16.mxu0 %v7938_v9 }
 0x200   : > { %v1984_v0 = vshll.u32 %v1630_v35, 16  ;;  %v1988_v17 = vshrl.u32 %v1630_v35, 16  ;;  %v2132_v20 = vld [vmem:[#allocation2 + $0xb8] sm:$0xf]  ;;  %v4153_v45 = vld [vmem:[#allocation3 + $0x38c] sm:$0xff]  ;;  %v1968_v39 = vrot.slane %v1967_v30, 4  ;;  %v2289_v56 = vsel %vm8447_vm14, %v2287_v62, %v2288_v12 }
 0x201   : > { %v1963_v42 = vsel %vm8695_vm1, %v1958_v14, %v1962_v32  ;;  %v1994_v47 = vshll.u32 %v1631_v13, 16  ;;  %v2133_v25 = vld [vmem:[#allocation2 + $0xbc] sm:$0x1]  ;;  %v7934_v6 = vld [vmem:[#allocation3 + $0x31c] ss:$36 sps:$4 sm:$0xff]   ;;  %v1981_v29 = vor.u32 %v1980_v37, %v1977_v49  ;;  %v9394_v7 = vrot.slane %v3633_v10, 4 }
 0x202   : > { %2080 = vst [vmem:[#allocation3 + $0x3ac] sm:$0xf] %v1963_v42  ;;  %2358 = vst [vmem:[#allocation3 + $0x41c] sm:$0xf] %v2289_v56  ;;  %v1986_v51 = vrot.slane %v1984_v0, 5  ;;  %v1973_v21 = vsel %vm8695_vm1, %v1968_v39, %v1972_v2  ;;  %v1990_v33 = vrot.slane %v1988_v17, 4  ;;  %5626 = vmatprep.mubr.bf16.mxu1 %v7934_v6  ;;  %v7030_v32 = vcombine.low %v4148_v44, %v4153_v45 }
 0x203   : > { %v1634_v34 = vld [vmem:[#allocation2 + $0xbc] sm:$0x1]  ;;  %v6886_v19 = vrot.slane %v2131_v59, 9  ;;  %v9400_v18 = vld [vmem:[#allocation2 + $0xa8] sm:$0xf]  ;;  %v1982_v8 = vrot.slane %v1981_v29, 4 }
 0x204   : > { %v9398_v38 = vld [vmem:[#allocation2 + $0x1c] sm:$0xf]  ;;  %v7940_v57 = vld [vmem:[#allocation3 + $0x318] ss:$36 sps:$4 sm:$0xff]   ;;  %2081 = vst [vmem:[#allocation3 + $0x3d0] sm:$0xf] %v1973_v21  ;;  %v1991_v40 = vor.u32 %v1990_v33, %v1986_v51  ;;  %5796 = vmatmul.mubr.bf16.gmra.mxu0 %v7030_v32 }
 0x205   : > { %v2292_v58 = vrot.slane %v2132_v20, 5  ;;  %v2295_v35 = vrot.slane %v2133_v25, 5  ;;  %v9402_v52 = vld [vmem:[#allocation3 + $0x3b0] sm:$0xff]  ;;  %v1996_v10 = vrot.slane %v1994_v47, 5  ;;  %v10846_v12 = vshrl.u32 %v9222_v28, 16  ;;  %5627 = vmatmul.mubr.bf16.gmra.mxu1 %v7940_v57 }
 0x206   : > { %v10847_v13 = vshll.u32 %v9222_v28, 16  ;;  %v3197_v9 = vld [vmem:[#allocation2 + $0x24] sm:$0xf]  ;;  %v7941_v14 = vld [vmem:[#allocation3 + $0x364] ss:$36 sps:$4 sm:$0xff]   ;;  %v1987_v36 = vsel %vm8695_vm1, %v1982_v8, %v1986_v51  ;;  %v4163_v37 = vld [vmem:[#allocation3 + $0x3d4] sm:$0xff] }
 0x207   : > { %v2001_v2 = vrot.slane %v10846_v12, 4  ;;  %v7945_v30 = vld [vmem:[#allocation3 + $0x3b4] ss:$36 sps:$4 sm:$0xff]   ;;  %v2293_v62 = vsel %vm8447_vm14, %v6886_v19, %v2292_v58  ;;  %v2294_v59 = vrot.slane %v2292_v58, 4  ;;  %3229 = vst [vmem:[#allocation3 + $0x60] sm:$0xf] %v3197_v9  ;;  %5634 = vmatprep.mubr.bf16.mxu1 %v7941_v14  ;;  %v7039_v19 = vcombine.low %v9402_v52, %v4163_v37 }
 0x208   : > { %v2004_v49 = vrot.slane %v10847_v13, 5  ;;  %v1992_v0 = vrot.slane %v1991_v40, 4  ;;  %2082 = vst [vmem:[#allocation3 + $0x3f4] sm:$0xf] %v1987_v36  ;;  %2359 = vst [vmem:[#allocation3 + $0x440] sm:$0xf] %v2293_v62  ;;  %5803 = vmatprep.mubr.bf16.mxu0 %v7945_v30 }
 0x209   : > { %v2008_v28 = vshll.u32 %v9232_v15, 16  ;;  %v2018_v20 = vshll.u32 %v1634_v34, 16  ;;  %v3198_v44 = vld [vmem:[#allocation2 + $0x28] sm:$0xf]  ;;  %v2296_v45 = vsel %vm8447_vm14, %v2294_v59, %v2295_v35  ;;  %v10848_v42 = vshrl.u32 %v8547_v16, 16 }
 0x20a   : > { %v2005_v17 = vor.u32 %v2004_v49, %v2001_v2  ;;  %v10849_v56 = vshll.u32 %v8547_v16, 16  ;;  %v3317_v25 = vshll.u32 %v9398_v38, 16  ;;  %3230 = vst [vmem:[#allocation3 + $0x84] sm:$0xf] %v3198_v44  ;;  %v2787_v6 = vshrl.u32 %v9400_v18, 16  ;;  %v9431_v49 = vld [vmem:[#allocation3 + $0x3f8] sm:$0xff] }
 0x20b   : > { %v3310_v39 = vrot.slane %v10848_v42, 4  ;;  %v1997_v15 = vsel %vm8695_vm1, %v1992_v0, %v1996_v10  ;;  %2360 = vst [vmem:[#allocation3 + $0x464] sm:$0xf] %v2296_v45  ;;  %v2010_v51 = vrot.slane %v2008_v28, 5  ;;  %v3261_v34 = vld [vmem:[#allocation2 + $0x20] sm:$0x1] }
 0x20c   : > { %v3313_v47 = vrot.slane %v10849_v56, 5  ;;  %v2006_v29 = vrot.slane %v2005_v17, 4  ;;  %v2790_v21 = vshll.u32 %v9400_v18, 16  ;;  %v9424_v33 = vld [vmem:[#allocation2 + $0xa8] sm:$0xf]  ;;  %v2020_v16 = vrot.slane %v2018_v20, 5  ;;  %5804 = vmatmul.mubr.bf16.gmra.mxu0 %v7039_v19 }
 0x20d   : > { %2083 = vst [vmem:[#allocation3 + $0x418] sm:$0xf] %v1997_v15  ;;  %v2428_v32 = vld [vmem:[#allocation2 + $0x14] sm:$0x1]  ;;  %v7947_v8 = vld [vmem:[#allocation3 + $0x360] ss:$36 sps:$4 sm:$0xff]   ;;  %v2015_v35 = vor.u32 %v9339_v3, %v2010_v51 }
 0x20e   : > { %v3314_v57 = vor.u32 %v3313_v47, %v3310_v39  ;;  %v2011_v58 = vsel %vm8695_vm1, %v2006_v29, %v2010_v51  ;;  %v3319_v40 = vrot.slane %v3317_v25, 5  ;;  %v3321_v10 = vshrl.u32 %v9398_v38, 16  ;;  %v2922_v12 = vld [vmem:[#allocation2 + $0xc] sm:$0xe]  ;;  %v2923_v2 = vld [vmem:[#allocation2 + $0x10] sm:$0xf]  ;;  %5635 = vmatmul.mubr.bf16.gmra.mxu1 %v7947_v8 }
 0x20f   : > { %v2924_v13 = vld [vmem:[#allocation2 + $0x14] sm:$0x1]  ;;  %2084 = vst [vmem:[#allocation3 + $0x43c] sm:$0xf] %v2011_v58  ;;  %v3327_v9 = vshll.u32 %v3261_v34, 16  ;;  %v10850_v14 = vshrl.u32 %v8478_v5, 16 }
 0x210   : > { %v3315_v52 = vrot.slane %v3314_v57, 4  ;;  %v10851_v36 = vshll.u32 %v8478_v5, 16  ;;  %v7948_v59 = vld [vmem:[#allocation3 + $0x3ac] ss:$36 sps:$4 sm:$0xff]   ;;  %v2016_v37 = vrot.slane %v2015_v35, 4  ;;  %v3323_v3 = vrot.slane %v3321_v10, 4 }
 0x211   : > { %v2477_v30 = vrot.slane %v10850_v14, 4  ;;  %v8093_v0 = vld [vmem:[#allocation2 + $0x10] sm:$0xf]  ;;  %v2494_v38 = vshll.u32 %v2428_v32, 16  ;;  %v3596_v28 = vshrl.u32 %v9424_v33, 16  ;;  %v3599_v20 = vshll.u32 %v9424_v33, 16  ;;  %5642 = vmatprep.mubr.bf16.mxu1 %v7948_v59 }
 0x212   : > { %v2480_v62 = vrot.slane %v10851_v36, 5  ;;  %v2484_v17 = vshll.u32 %v8093_v0, 16  ;;  %v9439_v44 = vld [vmem:[#allocation3 + $0x41c] sm:$0xff]  ;;  %v3320_v42 = vsel %vm8695_vm1, %v3315_v52, %v3319_v40  ;;  %v2021_v5 = vsel %vm8695_vm1, %v2016_v37, %v2020_v16  ;;  %v3199_v15 = vld [vmem:[#allocation2 + $0x30] sm:$0xf] }
 0x213   : > { %v7952_v45 = vld [vmem:[#allocation3 + $0x3fc] ss:$36 sps:$4 sm:$0xff]   ;;  %v3324_v56 = vor.u32 %v3323_v3, %v3319_v40  ;;  %v3329_v47 = vrot.slane %v3327_v9, 5  ;;  %3723 = vst [vmem:[#allocation3 + $0x1c] sm:$0xf] %v3320_v42  ;;  %v6887_v34 = vrot.slane %v2922_v12, 9  ;;  %v7048_v19 = vcombine.low %v9431_v49, %v9439_v44 }
 0x214   : > { %v2481_v39 = vor.u32 %v2480_v62, %v2477_v30  ;;  %v2486_v25 = vrot.slane %v2484_v17, 5  ;;  %v3200_v29 = vld [vmem:[#allocation2 + $0x34] sm:$0xf]  ;;  %5811 = vmatprep.mubr.bf16.mxu0 %v7952_v45  ;;  %2085 = vst [vmem:[#allocation3 + $0x460] sm:$0xf] %v2021_v5  ;;  %v3020_v57 = vrot.slane %v2923_v2, 5 }
 0x215   : > { %v3023_v32 = vrot.slane %v2924_v13, 5  ;;  %3231 = vst [vmem:[#allocation3 + $0xa8] sm:$0xf] %v3199_v15  ;;  %3232 = vst [vmem:[#allocation3 + $0xcc] sm:$0xf] %v3200_v29  ;;  %v3325_v16 = vrot.slane %v3324_v56, 4  ;;  %5812 = vmatmul.mubr.bf16.gmra.mxu0 %v7048_v19 }
 0x216   : > { %v2482_v51 = vrot.slane %v2481_v39, 4  ;;  %v9445_v8 = vld [vmem:[#allocation2 + $0xc0] sm:$0xf]  ;;  %v2491_v58 = vor.u32 %v8460_v41, %v2486_v25  ;;  %v2496_v35 = vrot.slane %v2494_v38, 5  ;;  %v3264_v40 = vld [vmem:[#allocation2 + $0x2c] sm:$0x1]  ;;  %v3021_v12 = vsel %vm8447_vm14, %v6887_v34, %v3020_v57 }
 0x217   : > { %v3022_v2 = vrot.slane %v3020_v57, 4  ;;  %v10852_v13 = vshrl.u32 %v8513_v60, 16  ;;  %v2430_v9 = vld [vmem:[#allocation2 + $0x1c] sm:$0xf]  ;;  %v2431_v14 = vld [vmem:[#allocation2 + $0x20] sm:$0x1]  ;;  %v3330_v49 = vsel %vm8695_vm1, %v3325_v16, %v3329_v47 }
 0x218   : > { %v2487_v10 = vsel %vm8695_vm1, %v2482_v51, %v2486_v25  ;;  %v7954_v30 = vld [vmem:[#allocation3 + $0x3a8] ss:$36 sps:$4 sm:$0xff]   ;;  %v2492_v36 = vrot.slane %v2491_v58, 4  ;;  %3162 = vst [vmem:[#allocation3 + $0x14] sm:$0xf] %v3021_v12  ;;  %v10853_v41 = vshll.u32 %v8513_v60, 16 }
 0x219   : > { %v3334_v52 = vrot.slane %v10852_v13, 4  ;;  %2890 = vst [vmem:[#allocation3 + $0x10] sm:$0xf] %v2487_v10  ;;  %v8094_v59 = vld [vmem:[#allocation2 + $0x28] sm:$0xf]  ;;  %v3024_v3 = vsel %vm8447_vm14, %v3022_v2, %v3023_v32  ;;  %v3351_v0 = vshll.u32 %v3264_v40, 16  ;;  %5643 = vmatmul.mubr.bf16.gmra.mxu1 %v7954_v30 }
 0x21a   : > { %v3337_v62 = vrot.slane %v10853_v41, 5  ;;  %v3341_v37 = vshll.u32 %v8094_v59, 16  ;;  %3724 = vst [vmem:[#allocation3 + $0x40] sm:$0xf] %v3330_v49  ;;  %v10854_v17 = vshrl.u32 %v8531_v23, 16  ;;  %v10855_v44 = vshll.u32 %v8531_v23, 16 }
 0x21b   : > { %v2925_v42 = vld [vmem:[#allocation2 + $0x18] sm:$0xe]  ;;  %v2926_v39 = vld [vmem:[#allocation2 + $0x1c] sm:$0xf]  ;;  %v7955_v5 = vld [vmem:[#allocation3 + $0x3f4] ss:$36 sps:$4 sm:$0xff]   ;;  %v2497_v60 = vsel %vm8695_vm1, %v2492_v36, %v2496_v35 }
 0x21c   : > { %v2501_v38 = vrot.slane %v10854_v17, 4  ;;  %v2504_v45 = vrot.slane %v10855_v44, 5  ;;  %v7959_v56 = vld [vmem:[#allocation3 + $0x444] ss:$36 sps:$4 sm:$0xff]   ;;  %3163 = vst [vmem:[#allocation3 + $0x38] sm:$0xf] %v3024_v3  ;;  %v3338_v47 = vor.u32 %v3337_v62, %v3334_v52  ;;  %5650 = vmatprep.mubr.bf16.mxu1 %v7955_v5 }
 0x21d   : > { %v3343_v25 = vrot.slane %v3341_v37, 5  ;;  %v2508_v15 = vshll.u32 %v2430_v9, 16  ;;  %v2835_v29 = vshrl.u32 %v9445_v8, 16  ;;  %2891 = vst [vmem:[#allocation3 + $0x34] sm:$0xf] %v2497_v60  ;;  %v2512_v34 = vshrl.u32 %v2430_v9, 16  ;;  %5819 = vmatprep.mubr.bf16.mxu0 %v7959_v56 }
 0x21e   : > { %v2505_v51 = vor.u32 %v2504_v45, %v2501_v38  ;;  %v2518_v57 = vshll.u32 %v2431_v14, 16  ;;  %v3201_v23 = vld [vmem:[#allocation2 + $0x3c] sm:$0xf]  ;;  %v2838_v32 = vshll.u32 %v9445_v8, 16  ;;  %v3339_v16 = vrot.slane %v3338_v47, 4 }
 0x21f   : > { %v3348_v58 = vor.u32 %v8515_v61, %v3343_v25  ;;  %v3353_v35 = vrot.slane %v3351_v0, 5  ;;  %v2927_v40 = vld [vmem:[#allocation2 + $0x20] sm:$0x1]  ;;  %3233 = vst [vmem:[#allocation3 + $0xf0] sm:$0xf] %v3201_v23  ;;  %v2510_v12 = vrot.slane %v2508_v15, 5 }
 0x220   : > { %v2506_v10 = vrot.slane %v2505_v51, 4  ;;  %v2514_v2 = vrot.slane %v2512_v34, 4  ;;  %v2520_v13 = vrot.slane %v2518_v57, 5  ;;  %v3202_v52 = vld [vmem:[#allocation2 + $0x40] sm:$0xf]  ;;  %v4178_v30 = vld [vmem:[#allocation3 + $0x440] sm:$0xff]  ;;  %v3344_v9 = vsel %vm8695_vm1, %v3339_v16, %v3343_v25 }
 0x221   : > { %v3349_v14 = vrot.slane %v3348_v58, 4  ;;  %v6888_v49 = vrot.slane %v2925_v42, 9  ;;  %v3027_v36 = vrot.slane %v2926_v39, 5  ;;  %v3266_v19 = vld [vmem:[#allocation2 + $0x34] sm:$0xf]  ;;  %v4183_v41 = vld [vmem:[#allocation3 + $0x464] sm:$0xff] }
 0x222   : > { %3234 = vst [vmem:[#allocation3 + $0x114] sm:$0xf] %v3202_v52  ;;  %3725 = vst [vmem:[#allocation3 + $0x64] sm:$0xf] %v3344_v9  ;;  %v2511_v61 = vsel %vm8695_vm1, %v2506_v10, %v2510_v12  ;;  %v2515_v62 = vor.u32 %v2514_v2, %v2510_v12  ;;  %v3030_v59 = vrot.slane %v2927_v40, 5  ;;  %v10856_v3 = vshrl.u32 %v8595_v4, 16 }
 0x223   : > { %v3267_v37 = vld [vmem:[#allocation2 + $0x38] sm:$0x1]  ;;  %v7961_v17 = vld [vmem:[#allocation3 + $0x3f0] ss:$36 sps:$4 sm:$0xff]   ;;  %v3354_v38 = vsel %vm8695_vm1, %v3349_v14, %v3353_v35  ;;  %2892 = vst [vmem:[#allocation3 + $0x58] sm:$0xf] %v2511_v61  ;;  %v3028_v44 = vsel %vm8447_vm14, %v6888_v49, %v3027_v36  ;;  %v7057_v51 = vcombine.low %v4178_v30, %v4183_v41 }
 0x224   : > { %v3358_v0 = vrot.slane %v10856_v3, 4  ;;  %v3029_v45 = vrot.slane %v3027_v36, 4  ;;  %v2434_v42 = vld [vmem:[#allocation2 + $0x2c] sm:$0x1]  ;;  %3726 = vst [vmem:[#allocation3 + $0x88] sm:$0xf] %v3354_v38  ;;  %5651 = vmatmul.mubr.bf16.gmra.mxu1 %v7961_v17 }
 0x225   : > { %v2516_v39 = vrot.slane %v2515_v62, 4  ;;  %3164 = vst [vmem:[#allocation3 + $0x5c] sm:$0xf] %v3028_v44  ;;  %v10857_v5 = vshll.u32 %v8595_v4, 16  ;;  %v3365_v60 = vshll.u32 %v3266_v19, 16  ;;  %v3369_v47 = vshrl.u32 %v3266_v19, 16  ;;  %5820 = vmatmul.mubr.bf16.gmra.mxu0 %v7057_v51 }
 0x226   : > { %v2928_v25 = vld [vmem:[#allocation2 + $0x24] sm:$0xe]  ;;  %v7962_v15 = vld [vmem:[#allocation3 + $0x43c] ss:$36 sps:$4 sm:$0xff]   ;;  %v3031_v34 = vsel %vm8447_vm14, %v3029_v45, %v3030_v59  ;;  %v3375_v57 = vshll.u32 %v3267_v37, 16  ;;  %v10858_v2 = vshrl.u32 %v8507_v54, 16 }
 0x227   : > { %v3361_v56 = vrot.slane %v10857_v5, 5  ;;  %v2929_v23 = vld [vmem:[#allocation2 + $0x28] sm:$0xf]  ;;  %v7968_v16 = vld [vmem:[#allocation3 + $0x1c] ss:$36 sps:$4 sm:$0xff]   ;;  %v2521_v58 = vsel %vm8695_vm1, %v2516_v39, %v2520_v13  ;;  %v3367_v40 = vrot.slane %v3365_v60, 5  ;;  %5658 = vmatprep.mubr.bf16.mxu1 %v7962_v15 }
 0x228   : > { %3165 = vst [vmem:[#allocation3 + $0x80] sm:$0xf] %v3031_v34  ;;  %v3371_v4 = vrot.slane %v3369_v47, 4  ;;  %v2930_v10 = vld [vmem:[#allocation2 + $0x2c] sm:$0x1]  ;;  %v3377_v12 = vrot.slane %v3375_v57, 5  ;;  %6021 = vmatprep.mubr.bf16.mxu0 %v7968_v16 }
 0x229   : > { %v3362_v35 = vor.u32 %v3361_v56, %v3358_v0  ;;  %2893 = vst [vmem:[#allocation3 + $0x7c] sm:$0xf] %v2521_v58  ;;  %v2525_v52 = vrot.slane %v10858_v2, 4  ;;  %v10859_v30 = vshll.u32 %v8507_v54, 16  ;;  %v8095_v14 = vld [vmem:[#allocation2 + $0x28] sm:$0xf] }
 0x22a   : > { %v2532_v49 = vshll.u32 %v8095_v14, 16  ;;  %v3372_v13 = vor.u32 %v3371_v4, %v3367_v40  ;;  %v2542_v19 = vshll.u32 %v2434_v42, 16  ;;  %v6889_v41 = vrot.slane %v2928_v25, 9  ;;  %v3203_v61 = vld [vmem:[#allocation2 + $0x48] sm:$0xf]  ;;  %v9501_v25 = vld [vmem:[%s10714_s6 + $0x230] sm:$0xff]  }
 0x22b   : > { %v2528_v9 = vrot.slane %v10859_v30, 5  ;;  %v3363_v36 = vrot.slane %v3362_v35, 4  ;;  %v3034_v37 = vrot.slane %v2929_v23, 5  ;;  %v3037_v3 = vrot.slane %v2930_v10, 5  ;;  %v3204_v0 = vld [vmem:[#allocation2 + $0x4c] sm:$0xf] }
 0x22c   : > { %v2534_v59 = vrot.slane %v2532_v49, 5  ;;  %3235 = vst [vmem:[#allocation3 + $0x138] sm:$0xf] %v3203_v61  ;;  %v7969_v17 = vld [vmem:[#allocation3 + $0x438] ss:$36 sps:$4 sm:$0xff]   ;;  %v3373_v54 = vrot.slane %v3372_v13, 4 }
 0x22d   : > { %v2529_v62 = vor.u32 %v2528_v9, %v2525_v52  ;;  %v3368_v38 = vsel %vm8695_vm1, %v3363_v36, %v3367_v40  ;;  %v2544_v44 = vrot.slane %v2542_v19, 5  ;;  %v3270_v45 = vld [vmem:[#allocation2 + $0x44] sm:$0x1]  ;;  %v10860_v39 = vshrl.u32 %v8572_v50, 16  ;;  %3236 = vst [vmem:[#allocation3 + $0x15c] sm:$0xf] %v3204_v0  ;;  %5659 = vmatmul.mubr.bf16.gmra.mxu1 %v7969_v17 }
 0x22e   : > { %3727 = vst [vmem:[#allocation3 + $0xac] sm:$0xf] %v3368_v38  ;;  %v2539_v56 = vor.u32 %v8509_v55, %v2534_v59  ;;  %v3035_v60 = vsel %vm8447_vm14, %v6889_v41, %v3034_v37  ;;  %v3036_v47 = vrot.slane %v3034_v37, 4  ;;  %v2436_v15 = vld [vmem:[#allocation2 + $0x34] sm:$0xf]  ;;  %v3378_v34 = vsel %vm8695_vm1, %v3373_v54, %v3377_v12  ;;  %v9524_v17 = vld [vmem:[%s10714_s6 + $0x228] sm:$0xff]  }
 0x22f   : > { %v3382_v5 = vrot.slane %v10860_v39, 4  ;;  %v2530_v42 = vrot.slane %v2529_v62, 4  ;;  %v7966_v51 = vld [vmem:[#allocation3 + $0x18] ss:$36 sps:$4 sm:$0xff]   ;;  %3166 = vst [vmem:[#allocation3 + $0xa4] sm:$0xf] %v3035_v60 }
 0x230   : > { %v10861_v57 = vshll.u32 %v8572_v50, 16  ;;  %v8096_v16 = vld [vmem:[#allocation2 + $0x40] sm:$0xf]  ;;  %v2437_v58 = vld [vmem:[#allocation2 + $0x38] sm:$0x1]  ;;  %v2540_v4 = vrot.slane %v2539_v56, 4  ;;  %v3038_v10 = vsel %vm8447_vm14, %v3036_v47, %v3037_v3  ;;  %6022 = vmatmul.mubr.bf16.vlgmr.msra.gmra.mxu0 %v7966_v51 }
 0x231   : > { %v3389_v55 = vshll.u32 %v8096_v16, 16  ;;  %v7972_v35 = vld [vmem:[#allocation3 + $0x14] ss:$36 sps:$4 sm:$0xff]   ;;  %3728 = vst [vmem:[#allocation3 + $0xd0] sm:$0xf] %v3378_v34  ;;  %v2535_v40 = vsel %vm8695_vm1, %v2530_v42, %v2534_v59  ;;  %v3399_v2 = vshll.u32 %v3270_v45, 16 }
 0x232   : > { %v3385_v23 = vrot.slane %v10861_v57, 5  ;;  %v2931_v52 = vld [vmem:[#allocation2 + $0x30] sm:$0xe]  ;;  %v7974_v12 = vld [vmem:[#allocation3 + $0x64] ss:$36 sps:$4 sm:$0xff]   ;;  %5860 = vmatprep.mubr.bf16.mxu1 %v7972_v35  ;;  %v2545_v14 = vsel %vm8695_vm1, %v2540_v4, %v2544_v44  ;;  %v10862_v36 = vshrl.u32 %v8588_v46, 16 }
 0x233   : > { %2894 = vst [vmem:[#allocation3 + $0xa0] sm:$0xf] %v2535_v40  ;;  %3167 = vst [vmem:[#allocation3 + $0xc8] sm:$0xf] %v3038_v10  ;;  %v3391_v30 = vrot.slane %v3389_v55, 5  ;;  %v3401_v49 = vrot.slane %v3399_v2, 5  ;;  %6029 = vmatprep.mubr.bf16.mxu0 %v7974_v12 }
 0x234   : > { %v3386_v50 = vor.u32 %v3385_v23, %v3382_v5  ;;  %v2932_v9 = vld [vmem:[#allocation2 + $0x34] sm:$0xf]  ;;  %v2549_v13 = vrot.slane %v10862_v36, 4  ;;  %v10863_v19 = vshll.u32 %v8588_v46, 16  ;;  %v2933_v61 = vld [vmem:[#allocation2 + $0x38] sm:$0x1] }
 0x235   : > { %v8097_v62 = vld [vmem:[%s10714_s6 + $0x238] sm:$0xff]   ;;  %2895 = vst [vmem:[#allocation3 + $0xc4] sm:$0xf] %v2545_v14  ;;  %v3396_v37 = vor.u32 %v8621_v22, %v3391_v30  ;;  %v2556_v3 = vshll.u32 %v2436_v15, 16  ;;  %v2560_v0 = vshrl.u32 %v2436_v15, 16  ;;  %v2566_v44 = vshll.u32 %v2437_v58, 16 }
 0x236   : > { %v2552_v41 = vrot.slane %v10863_v19, 5  ;;  %7711 = vmatpush3.bf16.msra.mxu0 %v8097_v62  ;;  %v3387_v59 = vrot.slane %v3386_v50, 4  ;;  %v3205_v46 = vld [vmem:[#allocation2 + $0x54] sm:$0xf]  ;;  %v4040_v38 = vld [vmem:[#allocation3 + $0x60] sm:$0xff]  ;;  %v6890_v45 = vrot.slane %v2931_v52, 9 }
 0x237   : > { %7712 = vmatprep.subr.bf16.mxu0 %v9501_v25  ;;  %v3041_v39 = vrot.slane %v2932_v9, 5  ;;  %v3206_v5 = vld [vmem:[#allocation2 + $0x58] sm:$0xf]  ;;  %3237 = vst [vmem:[#allocation3 + $0x180] sm:$0xf] %v3205_v46  ;;  %v4045_v42 = vld [vmem:[#allocation3 + $0x84] sm:$0xff] }
 0x238   : > { %v2553_v54 = vor.u32 %v2552_v41, %v2549_v13  ;;  %v3392_v22 = vsel %vm8695_vm1, %v3387_v59, %v3391_v30  ;;  %v3397_v56 = vrot.slane %v3396_v37, 4  ;;  %v2558_v60 = vrot.slane %v2556_v3, 5  ;;  %v3272_v15 = vld [vmem:[#allocation2 + $0x4c] sm:$0xf]  ;;  %3238 = vst [vmem:[#allocation3 + $0x1a4] sm:$0xf] %v3206_v5 }
 0x239   : > { %v2562_v47 = vrot.slane %v2560_v0, 4  ;;  %v9529_v51 = vld [vmem:[#allocation2 + $0xc0] sm:$0xf]  ;;  %3729 = vst [vmem:[#allocation3 + $0xf4] sm:$0xf] %v3392_v22  ;;  %v2568_v57 = vrot.slane %v2566_v44, 5  ;;  %v3042_v23 = vsel %vm8447_vm14, %v6890_v45, %v3041_v39  ;;  %v6935_v30 = vcombine.low %v4040_v38, %v4045_v42 }
 0x23a   : > { %v2554_v34 = vrot.slane %v2553_v54, 4  ;;  %v3043_v16 = vrot.slane %v3041_v39, 4  ;;  %v3273_v55 = vld [vmem:[#allocation2 + $0x50] sm:$0x1]  ;;  %v7970_v58 = vld [vmem:[#allocation3 + $0x10] ss:$36 sps:$4 sm:$0xff]   ;;  %7713 = vmatpush3.bf16.msra.mxu0 %v9501_v25  ;;  %v3402_v35 = vsel %vm8695_vm1, %v3397_v56, %v3401_v49 }
 0x23b   : > { %v2563_v40 = vor.u32 %v2562_v47, %v2558_v60  ;;  %v3044_v4 = vrot.slane %v2933_v61, 5  ;;  %3168 = vst [vmem:[#allocation3 + $0xec] sm:$0xf] %v3042_v23  ;;  %v10864_v10 = vld [vmem:[#allocation10_spill] sm:$0xff]  ;;  %v2440_v12 = vld [vmem:[#allocation2 + $0x44] sm:$0x1]  ;;  %7714 = vmatprep.subr.bf16.mxu0 %v9524_v17  ;;  %5861 = vmatmul.mubr.bf16.vlgmr.msra.gmra.mxu1 %v7970_v58 }
 0x23c   : > { %v10865_v2 = vshrl.u32 %v10864_v10, 16  ;;  %v7976_v50 = vld [vmem:[#allocation3 + $0x5c] ss:$36 sps:$4 sm:$0xff]   ;;  %3730 = vst [vmem:[#allocation3 + $0x118] sm:$0xf] %v3402_v35  ;;  %v2559_v9 = vsel %vm8695_vm1, %v2554_v34, %v2558_v60  ;;  %v10866_v14 = vshll.u32 %v10864_v10, 16  ;;  %7766 = vmatpush3.bf16.msra.mxu1 %v8097_v62  ;;  %6030 = vmatmul.mubr.bf16.gmra.mxu0 %v6935_v30 }
 0x23d   : > { %v3413_v13 = vshll.u32 %v3272_v15, 16  ;;  %v2564_v49 = vrot.slane %v2563_v40, 4  ;;  %2896 = vst [vmem:[#allocation3 + $0xe8] sm:$0xf] %v2559_v9  ;;  %v3045_v19 = vsel %vm8447_vm14, %v3043_v16, %v3044_v4  ;;  %v3417_v41 = vshrl.u32 %v3272_v15, 16  ;;  %v9548_v37 = vld [vmem:[%s10714_s6 + $0x220] sm:$0xff]   ;;  %5868 = vmatprep.mubr.bf16.mxu1 %v7976_v50  ;;  %7759 = vmatprep.subr.bf16.mxu1 %v9501_v25 }
 0x23e   : > { %v3406_v52 = vrot.slane %v10865_v2, 4  ;;  %v3409_v36 = vrot.slane %v10866_v14, 5  ;;  %v3423_v61 = vshll.u32 %v3273_v55, 16  ;;  %v2934_v59 = vld [vmem:[#allocation2 + $0x3c] sm:$0xe]  ;;  %v3644_v54 = vshrl.u32 %v9529_v51, 16  ;;  %7715 = vmatpush3.bf16.msra.mxu0 %v9524_v17 }
 0x23f   : > { %v7978_v3 = vld [vmem:[#allocation3 + $0xac] ss:$36 sps:$4 sm:$0xff]   ;;  %3169 = vst [vmem:[#allocation3 + $0x110] sm:$0xf] %v3045_v19  ;;  %v3415_v46 = vrot.slane %v3413_v13, 5  ;;  %v2569_v44 = vsel %vm8695_vm1, %v2564_v49, %v2568_v57  ;;  %v3419_v45 = vrot.slane %v3417_v41, 4  ;;  %7716 = vmatprep.subr.bf16.mxu0 %v9548_v37 }
 0x240   : > { %v3410_v0 = vor.u32 %v3409_v36, %v3406_v52  ;;  %v2935_v38 = vld [vmem:[#allocation2 + $0x40] sm:$0xf]  ;;  %v10867_v39 = vld [vmem:[#allocation4_spill] sm:$0xff]  ;;  %v2936_v22 = vld [vmem:[#allocation2 + $0x44] sm:$0x1]  ;;  %6037 = vmatprep.mubr.bf16.mxu0 %v7978_v3  ;;  %v2590_v16 = vshll.u32 %v2440_v12, 16  ;;  %7767 = vmatpush3.bf16.msra.mxu1 %v9501_v25 }
 0x241   : > { %v10868_v5 = vshrl.u32 %v10867_v39, 16  ;;  %v9559_v62 = vld [vmem:[%s10714_s6 + $0x218] sm:$0xff]   ;;  %v4050_v56 = vld [vmem:[#allocation3 + $0xa8] sm:$0xff]  ;;  %2897 = vst [vmem:[#allocation3 + $0x10c] sm:$0xf] %v2569_v44  ;;  %v10869_v15 = vshll.u32 %v10867_v39, 16  ;;  %v3420_v55 = vor.u32 %v3419_v45, %v3415_v46  ;;  %7760 = vmatprep.subr.bf16.mxu1 %v9524_v17 }
 0x242   : > { %v4055_v60 = vld [vmem:[#allocation3 + $0xcc] sm:$0xff]  ;;  %v3411_v47 = vrot.slane %v3410_v0, 4  ;;  %v8098_v57 = vld [vmem:[#allocation2 + $0x40] sm:$0xf]  ;;  %v3425_v58 = vrot.slane %v3423_v61, 5  ;;  %v6891_v35 = vrot.slane %v2934_v59, 9  ;;  %7717 = vmatpush3.bf16.msra.mxu0 %v9548_v37 }
 0x243   : > { %v2573_v42 = vrot.slane %v10868_v5, 4  ;;  %v2576_v34 = vrot.slane %v10869_v15, 5  ;;  %v2580_v23 = vshll.u32 %v8098_v57, 16  ;;  %v3048_v40 = vrot.slane %v2935_v38, 5  ;;  %v3207_v4 = vld [vmem:[#allocation2 + $0x60] sm:$0xf]  ;;  %7718 = vmatprep.subr.bf16.mxu0 %v9559_v62 }
 0x244   : > { %v3416_v10 = vsel %vm8695_vm1, %v3411_v47, %v3415_v46  ;;  %v3051_v50 = vrot.slane %v2936_v22, 5  ;;  %v3276_v30 = vld [vmem:[#allocation2 + $0x5c] sm:$0x1]  ;;  %v3208_v9 = vld [vmem:[#allocation2 + $0x64] sm:$0xf]  ;;  %v6944_v14 = vcombine.low %v4050_v56, %v4055_v60  ;;  %v3421_v36 = vrot.slane %v3420_v55, 4  ;;  %7768 = vmatpush3.bf16.msra.mxu1 %v9524_v17 }
 0x245   : > { %v2577_v2 = vor.u32 %v2576_v34, %v2573_v42  ;;  %v2582_v52 = vrot.slane %v2580_v23, 5  ;;  %3239 = vst [vmem:[#allocation3 + $0x1c8] sm:$0xf] %v3207_v4  ;;  %v7980_v12 = vld [vmem:[#allocation3 + $0x58] ss:$36 sps:$4 sm:$0xff]   ;;  %v2592_v13 = vrot.slane %v2590_v16, 5  ;;  %v3049_v49 = vsel %vm8447_vm14, %v6891_v35, %v3048_v40  ;;  %7761 = vmatprep.subr.bf16.mxu1 %v9548_v37 }
 0x246   : > { %3731 = vst [vmem:[#allocation3 + $0x13c] sm:$0xf] %v3416_v10  ;;  %3240 = vst [vmem:[#allocation3 + $0x1ec] sm:$0xf] %v3208_v9  ;;  %v7981_v25 = vld [vmem:[#allocation3 + $0xa4] ss:$36 sps:$4 sm:$0xff]   ;;  %5869 = vmatmul.mubr.bf16.gmra.mxu1 %v7980_v12  ;;  %v3426_v38 = vsel %vm8695_vm1, %v3421_v36, %v3425_v58  ;;  %6038 = vmatmul.mubr.bf16.gmra.mxu0 %v6944_v14  ;;  %v7326_v10 = vpop.f32.mrf.mxu0 }
 0x247   : > { %v2578_v19 = vrot.slane %v2577_v2, 4  ;;  %v10870_v41 = vld [vmem:[#allocation6_spill] sm:$0xff]  ;;  %v3050_v59 = vrot.slane %v3048_v40, 4  ;;  %3170 = vst [vmem:[#allocation3 + $0x134] sm:$0xf] %v3049_v49  ;;  %v10871_v3 = vld [vmem:[#allocation8_spill] sm:$0xff]  ;;  %5876 = vmatprep.mubr.bf16.mxu1 %v7981_v25  ;;  %7719 = vmatpush3.bf16.msra.mxu0 %v9559_v62 }
 0x248   : > { %v2587_v61 = vor.u32 %v10870_v41, %v2582_v52  ;;  %v10872_v0 = vshrl.u32 %v10871_v3, 16  ;;  %v10873_v44 = vshll.u32 %v10871_v3, 16  ;;  %v8099_v39 = vld [vmem:[#allocation2 + $0x58] sm:$0xf]  ;;  %v3447_v42 = vshll.u32 %v3276_v30, 16  ;;  %v9583_v56 = vld [vmem:[%s10714_s6 + $0x210] sm:$0xff]   ;;  %7769 = vmatpush3.bf16.msra.mxu1 %v9548_v37 }
 0x249   : > { %v3437_v5 = vshll.u32 %v8099_v39, 16  ;;  %v2442_v22 = vld [vmem:[#allocation2 + $0x4c] sm:$0xf]  ;;  %3732 = vst [vmem:[#allocation3 + $0x160] sm:$0xf] %v3426_v38  ;;  %v2583_v47 = vsel %vm8695_vm1, %v2578_v19, %v2582_v52  ;;  %v3052_v34 = vsel %vm8447_vm14, %v3050_v59, %v3051_v50  ;;  %v10874_v23 = vld [vmem:[#allocation9_spill] sm:$0xff]  ;;  %7720 = vmatprep.subr.bf16.mxu0 %v9583_v56  ;;  %7762 = vmatprep.subr.bf16.mxu1 %v9559_v62 }
 0x24a   : > { %v3430_v46 = vrot.slane %v10872_v0, 4  ;;  %v3433_v45 = vrot.slane %v10873_v44, 5  ;;  %v7986_v60 = vld [vmem:[#allocation3 + $0xf4] ss:$36 sps:$4 sm:$0xff]   ;;  %v2588_v15 = vrot.slane %v2587_v61, 4  ;;  %v10875_v16 = vshrl.u32 %v10874_v23, 16 }
 0x24b   : > { %v2443_v57 = vld [vmem:[#allocation2 + $0x50] sm:$0x1]  ;;  %2898 = vst [vmem:[#allocation3 + $0x130] sm:$0xf] %v2583_v47  ;;  %3171 = vst [vmem:[#allocation3 + $0x158] sm:$0xf] %v3052_v34  ;;  %6045 = vmatprep.mubr.bf16.mxu0 %v7986_v60  ;;  %7721 = vmatpush3.bf16.msra.mxu0 %v9583_v56 }
 0x24c   : > { %v2597_v55 = vrot.slane %v10875_v16, 4  ;;  %v3434_v58 = vor.u32 %v3433_v45, %v3430_v46  ;;  %v3439_v35 = vrot.slane %v3437_v5, 5  ;;  %v2937_v40 = vld [vmem:[#allocation2 + $0x48] sm:$0xe]  ;;  %v2938_v4 = vld [vmem:[#allocation2 + $0x4c] sm:$0xf]  ;;  %v2593_v17 = vsel %vm8695_vm1, %v2588_v15, %v2592_v13  ;;  %v7327_v13 = vpop.f32.mrf.mxu0  ;;  %7770 = vmatpush3.bf16.msra.mxu1 %v9559_v62 }
 0x24d   : > { %v10876_v2 = vld [vmem:[#allocation11_spill] sm:$0xff]  ;;  %v10878_v30 = vld [vmem:[#allocation5_spill] sm:$0xff]  ;;  %v3449_v12 = vrot.slane %v3447_v42, 5  ;;  %v10880_v14 = vshll.u32 %v10874_v23, 16  ;;  %v2604_v49 = vshll.u32 %v2442_v22, 16  ;;  %v2608_v3 = vshrl.u32 %v2442_v22, 16  ;;  %7763 = vmatprep.subr.bf16.mxu1 %v9583_v56 }
 0x24e   : > { %v10877_v52 = vrot.slane %v10876_v2, 5  ;;  %v10879_v50 = vrot.slane %v10878_v30, 9  ;;  %v2939_v25 = vld [vmem:[#allocation2 + $0x50] sm:$0x1]  ;;  %v7987_v19 = vld [vmem:[#allocation3 + $0xa0] ss:$36 sps:$4 sm:$0xff]   ;;  %v9619_v23 = vpop.f32.mrf.mxu0 }
 0x24f   : > { %v2600_v36 = vrot.slane %v10880_v14, 5  ;;  %2899 = vst [vmem:[#allocation3 + $0x154] sm:$0xf] %v2593_v17  ;;  %v3435_v41 = vrot.slane %v3434_v58, 4  ;;  %v10881_v61 = vld [vmem:[#allocation13_spill] sm:$0xff]  ;;  %v2614_v0 = vshll.u32 %v2443_v57, 16  ;;  %5877 = vmatmul.mubr.bf16.gmra.mxu1 %v7987_v19  ;;  %v9635_v17 = vadd.f32 %v7327_v13, %v7326_v10 }
 0x250   : > { %v3889_v9 = vsel %vm8447_vm14, %v10879_v50, %v10877_v52  ;;  %v3444_v59 = vor.u32 %v10881_v61, %v3439_v35  ;;  %v9605_v46 = vld [vmem:[#allocation2 + $0x64] sm:$0xf]  ;;  %v3209_v38 = vld [vmem:[#allocation2 + $0x6c] sm:$0xf]  ;;  %v2606_v39 = vrot.slane %v2604_v49, 5  ;;  %v6892_v5 = vrot.slane %v2937_v40, 9  ;;  %v9637_v14 = vpop.f32.mrf.mxu0  ;;  %7771 = vmatpush3.bf16.msra.mxu1 %v9583_v56 }
 0x251   : > { %4005 = vst [vmem:[#allocation3 + $0x188] sm:$0xf] %v3889_v9  ;;  %v9611_v44 = vld [vmem:[%s10714_s6 + $0x208] sm:$0xff]   ;;  %v2601_v45 = vor.u32 %v2600_v36, %v2597_v55  ;;  %v3055_v42 = vrot.slane %v2938_v4, 5  ;;  %v3210_v60 = vld [vmem:[#allocation2 + $0x70] sm:$0xf]  ;;  %v3440_v22 = vsel %vm8695_vm1, %v3435_v41, %v3439_v35 }
 0x252   : > { %3241 = vst [vmem:[#allocation3 + $0x210] sm:$0xf] %v3209_v38  ;;  %v3445_v47 = vrot.slane %v3444_v59, 4  ;;  %v2610_v15 = vrot.slane %v2608_v3, 4  ;;  %v2616_v34 = vrot.slane %v2614_v0, 5  ;;  %v3058_v40 = vrot.slane %v2939_v25, 5  ;;  %7722 = vmatprep.subr.bf16.mxu0 %v9611_v44  ;;  %7764 = vmatprep.subr.bf16.mxu1 %v9611_v44 }
 0x253   : > { %v9616_v57 = vld [vmem:[#allocation2 + $0x68] sm:$0x1]  ;;  %3242 = vst [vmem:[#allocation3 + $0x234] sm:$0xf] %v3210_v60  ;;  %3733 = vst [vmem:[#allocation3 + $0x184] sm:$0xf] %v3440_v22  ;;  %v3056_v58 = vsel %vm8447_vm14, %v6892_v5, %v3055_v42  ;;  %7723 = vmatpush3.bf16.msra.mxu0 %v9611_v44 }
 0x254   : > { %v7988_v16 = vld [vmem:[#allocation3 + $0xec] ss:$36 sps:$4 sm:$0xff]   ;;  %v2602_v55 = vrot.slane %v2601_v45, 4  ;;  %v3057_v37 = vrot.slane %v3055_v42, 4  ;;  %v3450_v2 = vsel %vm8695_vm1, %v3445_v47, %v3449_v12  ;;  %v2611_v52 = vor.u32 %v2610_v15, %v2606_v39  ;;  %3172 = vst [vmem:[#allocation3 + $0x17c] sm:$0xf] %v3056_v58  ;;  %7772 = vmatpush3.bf16.msra.mxu1 %v9611_v44 }
 0x255   : > { %v9627_v35 = vld [vmem:[%s10714_s6 + $0x200] sm:$0xff]   ;;  %v7984_v4 = vld [vmem:[#allocation3 + $0xf0] ss:$36 sps:$4 sm:$0xff]   ;;  %v10882_v30 = vshrl.u32 %v8889_v53, 16  ;;  %v9633_v9 = vld [vmem:[#allocation2 + $0x5c] sm:$0x1]  ;;  %5884 = vmatprep.mubr.bf16.mxu1 %v7988_v16 }
 0x256   : > { %v7992_v36 = vld [vmem:[#allocation3 + $0x13c] ss:$36 sps:$4 sm:$0xff]   ;;  %3734 = vst [vmem:[#allocation3 + $0x1a8] sm:$0xf] %v3450_v2  ;;  %v2607_v49 = vsel %vm8695_vm1, %v2602_v55, %v2606_v39  ;;  %v3059_v12 = vsel %vm8447_vm14, %v3057_v37, %v3058_v40  ;;  %v10883_v25 = vshll.u32 %v8889_v53, 16  ;;  %v3461_v41 = vshll.u32 %v9605_v46, 16  ;;  %6046 = vmatmul.mubr.bf16.gmra.mxu0 %v7984_v4  ;;  %v7332_v37 = vpop.f32.mrf.mxu0  ;;  %7724 = vmatprep.subr.bf16.mxu0 %v9627_v35 }
 0x257   : > { %v3454_v50 = vrot.slane %v10882_v30, 4  ;;  %v2612_v10 = vrot.slane %v2611_v52, 4  ;;  %2900 = vst [vmem:[#allocation3 + $0x178] sm:$0xf] %v2607_v49  ;;  %3173 = vst [vmem:[#allocation3 + $0x1a0] sm:$0xf] %v3059_v12  ;;  %6053 = vmatprep.mubr.bf16.mxu0 %v7992_v36  ;;  %7725 = vmatpush3.bf16.msra.mxu0 %v9627_v35 }
 0x258   : > { %v3457_v19 = vrot.slane %v10883_v25, 5  ;;  %v3465_v61 = vshrl.u32 %v9605_v46, 16  ;;  %v3471_v59 = vshll.u32 %v9616_v57, 16  ;;  %v10884_v3 = vld [vmem:[#allocation7_spill] sm:$0xff]  ;;  %v3647_v53 = vshll.u32 %v9529_v51, 16  ;;  %v10886_v5 = vld [vmem:[#allocation18_spill] sm:$0xff]  ;;  %7765 = vmatprep.subr.bf16.mxu1 %v9627_v35 }
 0x259   : > { %v10885_v0 = vshrl.u32 %v10884_v3, 16  ;;  %v2940_v13 = vld [vmem:[#allocation2 + $0x54] sm:$0xe]  ;;  %v3463_v39 = vrot.slane %v3461_v41, 5  ;;  %v2941_v62 = vld [vmem:[#allocation2 + $0x58] sm:$0xf]  ;;  %v2617_v15 = vsel %vm8695_vm1, %v2612_v10, %v2616_v34  ;;  %v7333_v41 = vpop.f32.mrf.mxu0  ;;  %7773 = vmatpush3.bf16.msra.mxu1 %v9627_v35 }
 0x25a   : > { %v3458_v45 = vor.u32 %v3457_v19, %v3454_v50  ;;  %v10887_v42 = vrot.slane %v10886_v5, 5  ;;  %v10888_v60 = vld [vmem:[#allocation14_spill] sm:$0xff]  ;;  %v7993_v47 = vld [vmem:[#allocation3 + $0xe8] ss:$36 sps:$4 sm:$0xff]   ;;  %v3467_v57 = vrot.slane %v3465_v61, 4  ;;  %v10890_v16 = vshll.u32 %v10884_v3, 16  ;;  %v7214_v5 = vpop.f32.mrf.mxu1 }
 0x25b   : > { %v2621_v38 = vrot.slane %v10885_v0, 4  ;;  %v10889_v46 = vrot.slane %v10888_v60, 9  ;;  %v2942_v58 = vld [vmem:[#allocation2 + $0x5c] sm:$0x1]  ;;  %v7994_v40 = vld [vmem:[#allocation3 + $0x134] ss:$36 sps:$4 sm:$0xff]   ;;  %5885 = vmatmul.mubr.bf16.gmra.mxu1 %v7993_v47 }
 0x25c   : > { %v2624_v55 = vrot.slane %v10890_v16, 5  ;;  %2901 = vst [vmem:[#allocation3 + $0x19c] sm:$0xf] %v2617_v15  ;;  %v3459_v4 = vrot.slane %v3458_v45, 4  ;;  %v8100_v2 = vld [vmem:[#allocation2 + $0x58] sm:$0xf]  ;;  %v3468_v34 = vor.u32 %v3467_v57, %v3463_v39  ;;  %5892 = vmatprep.mubr.bf16.mxu1 %v7994_v40  ;;  %v7215_v47 = vpop.f32.mrf.mxu1 }
 0x25d   : > { %v3903_v22 = vsel %vm8447_vm14, %v10889_v46, %v10887_v42  ;;  %v2628_v52 = vshll.u32 %v8100_v2, 16  ;;  %v2638_v30 = vshll.u32 %v9633_v9, 16  ;;  %v6893_v50 = vrot.slane %v2940_v13, 9  ;;  %v3282_v36 = vld [vmem:[#allocation2 + $0x74] sm:$0x1]  ;;  %v10891_v0 = vld [vmem:[#allocation17_spill] sm:$0xff] }
 0x25e   : > { %4009 = vst [vmem:[#allocation3 + $0x218] sm:$0xf] %v3903_v22  ;;  %v3473_v49 = vrot.slane %v3471_v59, 5  ;;  %v2625_v12 = vor.u32 %v2624_v55, %v2621_v38  ;;  %v3062_v25 = vrot.slane %v2941_v62, 5  ;;  %v3211_v19 = vld [vmem:[#allocation2 + $0x78] sm:$0xf]  ;;  %v3464_v10 = vsel %vm8695_vm1, %v3459_v4, %v3463_v39 }
 0x25f   : > { %v2630_v61 = vrot.slane %v2628_v52, 5  ;;  %v3065_v3 = vrot.slane %v2942_v58, 5  ;;  %v10892_v45 = vshrl.u32 %v10891_v0, 16  ;;  %v3212_v13 = vld [vmem:[#allocation2 + $0x7c] sm:$0xf]  ;;  %v3469_v59 = vrot.slane %v3468_v34, 4 }
 0x260   : > { %3243 = vst [vmem:[#allocation3 + $0x258] sm:$0xf] %v3211_v19  ;;  %v7990_v56 = vld [vmem:[#allocation3 + $0x138] ss:$36 sps:$4 sm:$0xff]   ;;  %3735 = vst [vmem:[#allocation3 + $0x1cc] sm:$0xf] %v3464_v10  ;;  %v3063_v62 = vsel %vm8447_vm14, %v6893_v50, %v3062_v25  ;;  %v9676_v39 = vadd.f32 %v7333_v41, %v7332_v37  ;;  %v9686_v50 = vpop.f32.mrf.mxu0  ;;  %v7217_v19 = vpop.f32.mrf.mxu1 }
 0x261   : > { %v3478_v9 = vrot.slane %v10892_v45, 4  ;;  %v2640_v38 = vrot.slane %v2638_v30, 5  ;;  %3244 = vst [vmem:[#allocation3 + $0x27c] sm:$0xf] %v3212_v13  ;;  %v7999_v42 = vld [vmem:[#allocation3 + $0x184] ss:$36 sps:$4 sm:$0xff]   ;;  %6054 = vmatmul.mubr.bf16.gmra.mxu0 %v7990_v56  ;;  %v3474_v55 = vsel %vm8695_vm1, %v3469_v59, %v3473_v49  ;;  %v9693_v45 = vadd.f32 %v7215_v47, %v7214_v5 }
 0x262   : > { %v2626_v60 = vrot.slane %v2625_v12, 4  ;;  %v10893_v46 = vld [vmem:[#allocation12_spill] sm:$0xff]  ;;  %v3064_v15 = vrot.slane %v3062_v25, 4  ;;  %3174 = vst [vmem:[#allocation3 + $0x1c4] sm:$0xf] %v3063_v62  ;;  %v10894_v57 = vshll.u32 %v10891_v0, 16  ;;  %6061 = vmatprep.mubr.bf16.mxu0 %v7999_v42  ;;  %v9697_v13 = vadd.f32 %v9637_v14, %v9619_v23 }
 0x263   : > { %v2635_v22 = vor.u32 %v10893_v46, %v2630_v61  ;;  %v8101_v58 = vld [vmem:[#allocation2 + $0x70] sm:$0xf]  ;;  %v3495_v4 = vshll.u32 %v3282_v36, 16  ;;  %v2448_v40 = vld [vmem:[#allocation2 + $0x64] sm:$0xf] }
 0x264   : > { %v3481_v16 = vrot.slane %v10894_v57, 5  ;;  %v3485_v37 = vshll.u32 %v8101_v58, 16  ;;  %v10895_v2 = vld [vmem:[#allocation19_spill] sm:$0xff]  ;;  %3736 = vst [vmem:[#allocation3 + $0x1f0] sm:$0xf] %v3474_v55  ;;  %v2631_v44 = vsel %vm8695_vm1, %v2626_v60, %v2630_v61  ;;  %v3066_v49 = vsel %vm8447_vm14, %v3064_v15, %v3065_v3  ;;  %v7336_v55 = vpop.f32.mrf.mxu0 }
 0x265   : > { %v10896_v52 = vshrl.u32 %v10895_v2, 16  ;;  %v2636_v34 = vrot.slane %v2635_v22, 4  ;;  %v2449_v25 = vld [vmem:[#allocation2 + $0x68] sm:$0x1]  ;;  %v2943_v36 = vld [vmem:[#allocation2 + $0x60] sm:$0xe] }
 0x266   : > { %v3482_v12 = vor.u32 %v3481_v16, %v3478_v9  ;;  %v8000_v41 = vld [vmem:[#allocation3 + $0x130] ss:$36 sps:$4 sm:$0xff]   ;;  %2902 = vst [vmem:[#allocation3 + $0x1c0] sm:$0xf] %v2631_v44  ;;  %3175 = vst [vmem:[#allocation3 + $0x1e8] sm:$0xf] %v3066_v49 }
 0x267   : > { %v2645_v30 = vrot.slane %v10896_v52, 4  ;;  %v3487_v10 = vrot.slane %v3485_v37, 5  ;;  %v2944_v0 = vld [vmem:[#allocation2 + $0x64] sm:$0xf]  ;;  %v10897_v61 = vrot.slane %v8993_v43, 5  ;;  %v10898_v56 = vld [vmem:[#allocation23_spill] sm:$0xff]  ;;  %v2641_v9 = vsel %vm8695_vm1, %v2636_v34, %v2640_v38  ;;  %v7218_v52 = vpop.f32.mrf.mxu1  ;;  %5893 = vmatmul.mubr.bf16.gmra.mxu1 %v8000_v41 }
 0x268   : > { %v10899_v59 = vrot.slane %v10898_v56, 9  ;;  %v3483_v62 = vrot.slane %v3482_v12, 4  ;;  %v3497_v42 = vrot.slane %v3495_v4, 5  ;;  %v10900_v60 = vshll.u32 %v10895_v2, 16  ;;  %v2945_v46 = vld [vmem:[#allocation2 + $0x68] sm:$0x1] }
 0x269   : > { %v7997_v23 = vld [vmem:[#allocation3 + $0x180] ss:$36 sps:$4 sm:$0xff]   ;;  %2903 = vst [vmem:[#allocation3 + $0x1e4] sm:$0xf] %v2641_v9  ;;  %v10901_v43 = vld [vmem:[#allocation21_spill] sm:$0xff]  ;;  %v2652_v15 = vshll.u32 %v2448_v40, 16  ;;  %v7338_v9 = vpop.f32.mrf.mxu0 }
 0x26a   : > { %v3917_v3 = vsel %vm8447_vm14, %v10899_v59, %v10897_v61  ;;  %v2648_v5 = vrot.slane %v10900_v60, 5  ;;  %v8001_v14 = vld [vmem:[#allocation3 + $0x17c] ss:$36 sps:$4 sm:$0xff]   ;;  %v3492_v22 = vor.u32 %v10901_v43, %v3487_v10  ;;  %v2656_v57 = vshrl.u32 %v2448_v40, 16  ;;  %v3284_v47 = vld [vmem:[#allocation2 + $0x7c] sm:$0xf]  ;;  %6062 = vmatmul.mubr.bf16.gmra.mxu0 %v7997_v23 }
 0x26b   : > { %4013 = vst [vmem:[#allocation3 + $0x2a8] sm:$0xf] %v3917_v3  ;;  %v2662_v16 = vshll.u32 %v2449_v25, 16  ;;  %v3488_v38 = vsel %vm8695_vm1, %v3483_v62, %v3487_v10  ;;  %v6894_v37 = vrot.slane %v2943_v36, 9  ;;  %v3069_v4 = vrot.slane %v2944_v0, 5  ;;  %5900 = vmatprep.mubr.bf16.mxu1 %v8001_v14  ;;  %v9727_v14 = vpop.f32.mrf.mxu1 }
 0x26c   : > { %v2649_v58 = vor.u32 %v2648_v5, %v2645_v30  ;;  %v3213_v2 = vld [vmem:[#allocation2 + $0x84] sm:$0xf]  ;;  %v3493_v35 = vrot.slane %v3492_v22, 4  ;;  %3737 = vst [vmem:[#allocation3 + $0x214] sm:$0xf] %v3488_v38  ;;  %v2654_v44 = vrot.slane %v2652_v15, 5  ;;  %v9719_v3 = vadd.f32 %v7218_v52, %v7217_v19 }
 0x26d   : > { %v2658_v34 = vrot.slane %v2656_v57, 4  ;;  %v2664_v49 = vrot.slane %v2662_v16, 5  ;;  %v3214_v12 = vld [vmem:[#allocation2 + $0x88] sm:$0xf]  ;;  %3245 = vst [vmem:[#allocation3 + $0x2a0] sm:$0xf] %v3213_v2  ;;  %v3070_v25 = vsel %vm8447_vm14, %v6894_v37, %v3069_v4  ;;  %v9731_v52 = vpop.f32.mrf.mxu1 }
 0x26e   : > { %v2650_v40 = vrot.slane %v2649_v58, 4  ;;  %v3071_v61 = vrot.slane %v3069_v4, 4  ;;  %v3072_v10 = vrot.slane %v2945_v46, 5  ;;  %v3285_v30 = vld [vmem:[#allocation2 + $0x80] sm:$0x1]  ;;  %v3498_v41 = vsel %vm8695_vm1, %v3493_v35, %v3497_v42  ;;  %v10904_v15 = vld [vmem:[#allocation16_spill] sm:$0xff]  ;;  %v7339_v58 = vpop.f32.mrf.mxu0 }
 0x26f   : > { %3246 = vst [vmem:[#allocation3 + $0x2c4] sm:$0xf] %v3214_v12  ;;  %v8005_v36 = vld [vmem:[#allocation3 + $0x1cc] ss:$36 sps:$4 sm:$0xff]   ;;  %v2659_v0 = vor.u32 %v2658_v34, %v2654_v44  ;;  %3176 = vst [vmem:[#allocation3 + $0x20c] sm:$0xf] %v3070_v25  ;;  %v9733_v35 = vadd.f32 %v7339_v58, %v7338_v9  ;;  %v7223_v9 = vpop.f32.mrf.mxu1 }
 0x270   : > { %v10902_v56 = vshrl.u32 %v9058_v63, 16  ;;  %3738 = vst [vmem:[#allocation3 + $0x238] sm:$0xf] %v3498_v41  ;;  %v2655_v62 = vsel %vm8695_vm1, %v2650_v40, %v2654_v44  ;;  %v3073_v60 = vsel %vm8447_vm14, %v3071_v61, %v3072_v10  ;;  %v10903_v5 = vshll.u32 %v9058_v63, 16  ;;  %v2452_v42 = vld [vmem:[#allocation2 + $0x74] sm:$0x1]  ;;  %6069 = vmatprep.mubr.bf16.mxu0 %v8005_v36  ;;  %v7341_v41 = vpop.f32.mrf.mxu0 }
 0x271   : > { %v3509_v23 = vshll.u32 %v3284_v47, 16  ;;  %v2660_v43 = vrot.slane %v2659_v0, 4  ;;  %2904 = vst [vmem:[#allocation3 + $0x208] sm:$0xf] %v2655_v62  ;;  %3177 = vst [vmem:[#allocation3 + $0x230] sm:$0xf] %v3073_v60  ;;  %v9746_v36 = vadd.f32 %v7336_v55, %v9686_v50 }
 0x272   : > { %v3502_v59 = vrot.slane %v10902_v56, 4  ;;  %v3505_v46 = vrot.slane %v10903_v5, 5  ;;  %v3513_v19 = vshrl.u32 %v3284_v47, 16  ;;  %v3519_v22 = vshll.u32 %v3285_v30, 16  ;;  %v2946_v38 = vld [vmem:[#allocation2 + $0x6c] sm:$0xe] }
 0x273   : > { %v10905_v57 = vshrl.u32 %v10904_v15, 16  ;;  %v8006_v37 = vld [vmem:[#allocation3 + $0x178] ss:$36 sps:$4 sm:$0xff]   ;;  %v3511_v2 = vrot.slane %v3509_v23, 5  ;;  %v10906_v44 = vrot.slane %v9162_v26, 5  ;;  %v10907_v34 = vrot.slane %v9077_v11, 9 }
 0x274   : > { %v3506_v4 = vor.u32 %v3505_v46, %v3502_v59  ;;  %v2947_v63 = vld [vmem:[#allocation2 + $0x70] sm:$0xf]  ;;  %v8007_v12 = vld [vmem:[#allocation3 + $0x1c4] ss:$36 sps:$4 sm:$0xff]   ;;  %v2665_v40 = vsel %vm8695_vm1, %v2660_v43, %v2664_v49  ;;  %v3515_v25 = vrot.slane %v3513_v19, 4  ;;  %v10908_v61 = vshll.u32 %v10904_v15, 16  ;;  %5901 = vmatmul.mubr.bf16.gmra.mxu1 %v8006_v37 }
 0x275   : > { %v2669_v16 = vrot.slane %v10905_v57, 4  ;;  %v3931_v47 = vsel %vm8447_vm14, %v10907_v34, %v10906_v44  ;;  %v2948_v30 = vld [vmem:[#allocation2 + $0x74] sm:$0x1]  ;;  %2905 = vst [vmem:[#allocation3 + $0x22c] sm:$0xf] %v2665_v40  ;;  %v2686_v56 = vshll.u32 %v2452_v42, 16  ;;  %5908 = vmatprep.mubr.bf16.mxu1 %v8007_v12 }
 0x276   : > { %v2672_v10 = vrot.slane %v10908_v61, 5  ;;  %4017 = vst [vmem:[#allocation3 + $0x338] sm:$0xf] %v3931_v47  ;;  %v3507_v26 = vrot.slane %v3506_v4, 4  ;;  %v8102_v11 = vld [vmem:[#allocation2 + $0x70] sm:$0xf]  ;;  %v3516_v49 = vor.u32 %v3515_v25, %v3511_v2  ;;  %v7342_v4 = vpop.f32.mrf.mxu0 }
 0x277   : > { %v2676_v0 = vshll.u32 %v8102_v11, 16  ;;  %v6895_v59 = vrot.slane %v2946_v38, 9  ;;  %v8003_v62 = vld [vmem:[#allocation3 + $0x1c8] ss:$36 sps:$4 sm:$0xff]   ;;  %v3521_v60 = vrot.slane %v3519_v22, 5  ;;  %v3076_v46 = vrot.slane %v2947_v63, 5 }
 0x278   : > { %v2673_v5 = vor.u32 %v2672_v10, %v2669_v16  ;;  %v3288_v23 = vld [vmem:[#allocation2 + $0x8c] sm:$0x1]  ;;  %v3512_v50 = vsel %vm8695_vm1, %v3507_v26, %v3511_v2  ;;  %v3079_v43 = vrot.slane %v2948_v30, 5  ;;  %v10909_v19 = vld [vmem:[#allocation25_spill] sm:$0xff]  ;;  %6070 = vmatmul.mubr.bf16.gmra.mxu0 %v8003_v62  ;;  %v3517_v22 = vrot.slane %v3516_v49, 4  ;;  %v10911_v63 = vld [vmem:[#allocation20_spill] sm:$0xff]  ;;  %v7224_v10 = vpop.f32.mrf.mxu1 }
 0x279   : > { %v2678_v55 = vrot.slane %v2676_v0, 5  ;;  %v10910_v15 = vshrl.u32 %v10909_v19, 16  ;;  %v9755_v42 = vld [vmem:[%s10715_s7] ss:$0 sm:$0xff]  ;;  %v8012_v38 = vld [vmem:[#allocation3 + $0x214] ss:$36 sps:$4 sm:$0xff]   ;;  %v3077_v58 = vsel %vm8447_vm14, %v6895_v59, %v3076_v46 }
 0x27a   : > { %3739 = vst [vmem:[#allocation3 + $0x25c] sm:$0xf] %v3512_v50  ;;  %v2688_v16 = vrot.slane %v2686_v56, 5  ;;  %v9761_v37 = vadd.f32 %v9693_v45, %v9755_v42  ;;  %v2674_v2 = vrot.slane %v2673_v5, 4  ;;  %v3078_v34 = vrot.slane %v3076_v46, 4  ;;  %6077 = vmatprep.mubr.bf16.mxu0 %v8012_v38  ;;  %v10913_v0 = vld [vmem:[#allocation26_spill] sm:$0xff] }
 0x27b   : > { %v3526_v57 = vrot.slane %v10910_v15, 4  ;;  %v2683_v44 = vor.u32 %v10911_v63, %v2678_v55  ;;  %3178 = vst [vmem:[#allocation3 + $0x254] sm:$0xf] %v3077_v58  ;;  %v10912_v47 = vshll.u32 %v10909_v19, 16  ;;  %v2454_v40 = vld [vmem:[#allocation2 + $0x7c] sm:$0xf]  ;;  %v3522_v30 = vsel %vm8695_vm1, %v3517_v22, %v3521_v60 }
 0x27c   : > { %v9766_v25 = vld [vmem:[#allocation2 + $0x80] sm:$0x1]  ;;  %v3215_v61 = vld [vmem:[#allocation2 + $0x90] sm:$0xf]  ;;  %v8103_v45 = vld [vmem:[#allocation2 + $0x88] sm:$0xf]  ;;  %v2679_v5 = vsel %vm8695_vm1, %v2674_v2, %v2678_v55  ;;  %v3080_v50 = vsel %vm8447_vm14, %v3078_v34, %v3079_v43  ;;  %v9778_v22 = vadd.f32 %v9731_v52, %v9727_v14  ;;  %v9780_v58 = vadd.f32 %v7224_v10, %v7223_v9  ;;  %v9784_v55 = vpop.f32.mrf.mxu0 }
 0x27d   : > { %v3529_v12 = vrot.slane %v10912_v47, 5  ;;  %v3533_v26 = vshll.u32 %v8103_v45, 16  ;;  %v3543_v11 = vshll.u32 %v3288_v23, 16  ;;  %v10914_v56 = vshrl.u32 %v10913_v0, 16  ;;  %v3216_v62 = vld [vmem:[#allocation2 + $0x94] sm:$0xf] }
 0x27e   : > { %3247 = vst [vmem:[#allocation3 + $0x2e8] sm:$0xf] %v3215_v61  ;;  %v8013_v49 = vld [vmem:[#allocation3 + $0x1c0] ss:$36 sps:$4 sm:$0xff]   ;;  %3740 = vst [vmem:[#allocation3 + $0x280] sm:$0xf] %v3522_v30  ;;  %v9782_v63 = vadd.f32 %v7342_v4, %v7341_v41  ;;  %v10010_v8 = vadd.f32 %v9635_v17, %v9761_v37 }
 0x27f   : > { %v2693_v59 = vrot.slane %v10914_v56, 4  ;;  %v2684_v46 = vrot.slane %v2683_v44, 4  ;;  %v3530_v19 = vor.u32 %v3529_v12, %v3526_v57  ;;  %v2949_v15 = vld [vmem:[#allocation2 + $0x78] sm:$0xe]  ;;  %3248 = vst [vmem:[#allocation3 + $0x30c] sm:$0xf] %v3216_v62  ;;  %5909 = vmatmul.mubr.bf16.gmra.mxu1 %v8013_v49  ;;  %v9796_v62 = vadd.f32 %v9719_v3, %v9755_v42 }
 0x280   : > { %2906 = vst [vmem:[#allocation3 + $0x250] sm:$0xf] %v2679_v5  ;;  %3179 = vst [vmem:[#allocation3 + $0x278] sm:$0xf] %v3080_v50  ;;  %v3535_v60 = vrot.slane %v3533_v26, 5  ;;  %v3545_v44 = vrot.slane %v3543_v11, 5  ;;  %v7226_v26 = vpop.f32.mrf.mxu1 }
 0x281   : > { %v2950_v23 = vld [vmem:[#allocation2 + $0x7c] sm:$0xf]  ;;  %v2951_v38 = vld [vmem:[#allocation2 + $0x80] sm:$0x1]  ;;  %v8014_v2 = vld [vmem:[#allocation3 + $0x20c] ss:$36 sps:$4 sm:$0xff]   ;;  %v2689_v43 = vsel %vm8695_vm1, %v2684_v46, %v2688_v16 }
 0x282   : > { %v3531_v57 = vrot.slane %v3530_v19, 4  ;;  %v10915_v34 = vshll.u32 %v10913_v0, 16  ;;  %v8010_v12 = vld [vmem:[#allocation3 + $0x210] ss:$36 sps:$4 sm:$0xff]   ;;  %2907 = vst [vmem:[#allocation3 + $0x274] sm:$0xf] %v2689_v43  ;;  %5916 = vmatprep.mubr.bf16.mxu1 %v8014_v2  ;;  %v7227_v19 = vpop.f32.mrf.mxu1 }
 0x283   : > { %v10916_v14 = vld [vmem:[#allocation28_spill] sm:$0xff]  ;;  %v2700_v9 = vshll.u32 %v2454_v40, 16  ;;  %v2704_v61 = vshrl.u32 %v2454_v40, 16  ;;  %v2710_v41 = vshll.u32 %v9766_v25, 16  ;;  %v6896_v16 = vrot.slane %v2949_v15, 9  ;;  %6078 = vmatmul.mubr.bf16.gmra.mxu0 %v8010_v12  ;;  %v9798_v25 = vpop.f32.mrf.mxu0 }
 0x284   : > { %v2696_v47 = vrot.slane %v10915_v34, 5  ;;  %v3540_v52 = vor.u32 %v10916_v14, %v3535_v60  ;;  %v3536_v4 = vsel %vm8695_vm1, %v3531_v57, %v3535_v60  ;;  %v3083_v30 = vrot.slane %v2950_v23, 5  ;;  %v3290_v45 = vld [vmem:[#allocation2 + $0x94] sm:$0xf]  ;;  %v3291_v40 = vld [vmem:[#allocation2 + $0x98] sm:$0x1] }
 0x285   : > { %3741 = vst [vmem:[#allocation3 + $0x2a4] sm:$0xf] %v3536_v4  ;;  %v2702_v0 = vrot.slane %v2700_v9, 5  ;;  %v2706_v56 = vrot.slane %v2704_v61, 4  ;;  %v3086_v46 = vrot.slane %v2951_v38, 5  ;;  %v2712_v43 = vrot.slane %v2710_v41, 5  ;;  %v7229_v9 = vpop.f32.mrf.mxu1 }
 0x286   : > { %v2697_v10 = vor.u32 %v2696_v47, %v2693_v59  ;;  %v3541_v11 = vrot.slane %v3540_v52, 4  ;;  %v3084_v59 = vsel %vm8447_vm14, %v6896_v16, %v3083_v30  ;;  %v3085_v5 = vrot.slane %v3083_v30, 4  ;;  %v3217_v50 = vld [vmem:[#allocation2 + $0x9c] sm:$0xf]  ;;  %v8018_v15 = vld [vmem:[#allocation3 + $0x25c] ss:$36 sps:$4 sm:$0xff]  }
 0x287   : > { %v8019_v60 = vld [vmem:[#allocation3 + $0x208] ss:$36 sps:$4 sm:$0xff]   ;;  %v2707_v2 = vor.u32 %v2706_v56, %v2702_v0  ;;  %3180 = vst [vmem:[#allocation3 + $0x29c] sm:$0xf] %v3084_v59  ;;  %v10917_v3 = vshrl.u32 %v9196_v1, 16  ;;  %v10918_v12 = vshll.u32 %v9196_v1, 16  ;;  %6085 = vmatprep.mubr.bf16.mxu0 %v8018_v15 }
 0x288   : > { %v2698_v49 = vrot.slane %v2697_v10, 4  ;;  %v3546_v23 = vsel %vm8695_vm1, %v3541_v11, %v3545_v44  ;;  %v2458_v34 = vld [vmem:[#allocation2 + $0x8c] sm:$0x1]  ;;  %3249 = vst [vmem:[#allocation3 + $0x330] sm:$0xf] %v3217_v50  ;;  %v3087_v38 = vsel %vm8447_vm14, %v3085_v5, %v3086_v46  ;;  %v3557_v52 = vshll.u32 %v3290_v45, 16  ;;  %5917 = vmatmul.mubr.bf16.gmra.mxu1 %v8019_v60  ;;  %v7230_v60 = vpop.f32.mrf.mxu1 }
 0x289   : > { %v3550_v57 = vrot.slane %v10917_v3, 4  ;;  %3742 = vst [vmem:[#allocation3 + $0x2c8] sm:$0xf] %v3546_v23  ;;  %v3553_v14 = vrot.slane %v10918_v12, 5  ;;  %v3218_v44 = vld [vmem:[#allocation2 + $0xa0] sm:$0xf]  ;;  %v9818_v5 = vadd.f32 %v9778_v22, %v9755_v42  ;;  %v9820_v46 = vadd.f32 %v7227_v19, %v7226_v26 }
 0x28a   : > { %v2703_v47 = vsel %vm8695_vm1, %v2698_v49, %v2702_v0  ;;  %v2708_v61 = vrot.slane %v2707_v2, 4  ;;  %3181 = vst [vmem:[#allocation3 + $0x2c0] sm:$0xf] %v3087_v38  ;;  %v3561_v41 = vshrl.u32 %v3290_v45, 16  ;;  %v3567_v4 = vshll.u32 %v3291_v40, 16  ;;  %v10919_v10 = vld [vmem:[#allocation24_spill] sm:$0xff]  ;;  %v9814_v0 = vpop.f32.mrf.mxu0 }
 0x28b   : > { %2908 = vst [vmem:[#allocation3 + $0x298] sm:$0xf] %v2703_v47  ;;  %v10920_v16 = vshrl.u32 %v10919_v10, 16  ;;  %v2952_v11 = vld [vmem:[#allocation2 + $0x84] sm:$0xe]  ;;  %v3554_v49 = vor.u32 %v3553_v14, %v3550_v57  ;;  %v3559_v1 = vrot.slane %v3557_v52, 5  ;;  %v9828_v3 = vadd.f32 %v9780_v58, %v9755_v42 }
 0x28c   : > { %3250 = vst [vmem:[#allocation3 + $0x354] sm:$0xf] %v3218_v44  ;;  %v8020_v56 = vld [vmem:[#allocation3 + $0x254] ss:$36 sps:$4 sm:$0xff]   ;;  %v2953_v59 = vld [vmem:[#allocation2 + $0x88] sm:$0xf]  ;;  %v2713_v45 = vsel %vm8695_vm1, %v2708_v61, %v2712_v43  ;;  %v7348_v52 = vpop.f32.mrf.mxu0 }
 0x28d   : > { %v2717_v30 = vrot.slane %v10920_v16, 4  ;;  %v8016_v50 = vld [vmem:[#allocation3 + $0x258] ss:$36 sps:$4 sm:$0xff]   ;;  %v3563_v40 = vrot.slane %v3561_v41, 4  ;;  %v10921_v15 = vshll.u32 %v10919_v10, 16  ;;  %5924 = vmatprep.mubr.bf16.mxu1 %v8020_v56  ;;  %v3555_v22 = vrot.slane %v3554_v49, 4 }
 0x28e   : > { %v2954_v2 = vld [vmem:[#allocation2 + $0x8c] sm:$0x1]  ;;  %2909 = vst [vmem:[#allocation3 + $0x2bc] sm:$0xf] %v2713_v45  ;;  %v8104_v57 = vld [vmem:[#allocation2 + $0x88] sm:$0xf]  ;;  %6086 = vmatmul.mubr.bf16.gmra.mxu0 %v8016_v50 }
 0x28f   : > { %v2720_v23 = vrot.slane %v10921_v15, 5  ;;  %v2724_v26 = vshll.u32 %v8104_v57, 16  ;;  %v2734_v19 = vshll.u32 %v2458_v34, 16  ;;  %v6897_v47 = vrot.slane %v2952_v11, 9  ;;  %v3294_v41 = vld [vmem:[#allocation2 + $0xa4] sm:$0x1] }
 0x290   : > { %v3564_v38 = vor.u32 %v3563_v40, %v3559_v1  ;;  %v3569_v43 = vrot.slane %v3567_v4, 5  ;;  %v3090_v14 = vrot.slane %v2953_v59, 5  ;;  %v3560_v44 = vsel %vm8695_vm1, %v3555_v22, %v3559_v1  ;;  %v10922_v10 = vld [vmem:[#allocation31_spill] sm:$0xff]  ;;  %v8025_v49 = vld [vmem:[#allocation3 + $0x2a4] ss:$36 sps:$4 sm:$0xff]  }
 0x291   : > { %v2721_v12 = vor.u32 %v2720_v23, %v2717_v30  ;;  %v2726_v61 = vrot.slane %v2724_v26, 5  ;;  %v3093_v58 = vrot.slane %v2954_v2, 5  ;;  %v10923_v16 = vshrl.u32 %v10922_v10, 16  ;;  %v8026_v45 = vld [vmem:[#allocation3 + $0x250] ss:$36 sps:$4 sm:$0xff]   ;;  %v10924_v50 = vld [vmem:[#allocation27_spill] sm:$0xff]  ;;  %6093 = vmatprep.mubr.bf16.mxu0 %v8025_v49 }
 0x292   : > { %v3565_v34 = vrot.slane %v3564_v38, 4  ;;  %3743 = vst [vmem:[#allocation3 + $0x2ec] sm:$0xf] %v3560_v44  ;;  %v2736_v11 = vrot.slane %v2734_v19, 5  ;;  %v3091_v4 = vsel %vm8447_vm14, %v6897_v47, %v3090_v14  ;;  %v9836_v30 = vadd.f32 %v7230_v60, %v7229_v9  ;;  %v2460_v2 = vld [vmem:[#allocation2 + $0x94] sm:$0xf]  ;;  %5925 = vmatmul.mubr.bf16.gmra.mxu1 %v8026_v45 }
 0x293   : > { %v3574_v56 = vrot.slane %v10923_v16, 4  ;;  %v2722_v59 = vrot.slane %v2721_v12, 4  ;;  %v2731_v40 = vor.u32 %v10924_v50, %v2726_v61  ;;  %v3092_v1 = vrot.slane %v3090_v14, 4  ;;  %3182 = vst [vmem:[#allocation3 + $0x2e4] sm:$0xf] %v3091_v4  ;;  %v10926_v47 = vld [vmem:[#allocation33_spill] sm:$0xff]  ;;  %v9845_v16 = vpop.f32.mrf.mxu0 }
 0x294   : > { %v10925_v15 = vshll.u32 %v10922_v10, 16  ;;  %v2461_v22 = vld [vmem:[#allocation2 + $0x98] sm:$0x1]  ;;  %v3570_v57 = vsel %vm8695_vm1, %v3565_v34, %v3569_v43  ;;  %v8105_v26 = vld [vmem:[#allocation2 + $0xa0] sm:$0xf]  ;;  %v3591_v38 = vshll.u32 %v3294_v41, 16  ;;  %v9891_v33 = vadd.f32 %v9836_v30, %v9755_v42 }
 0x295   : > { %v3581_v19 = vshll.u32 %v8105_v26, 16  ;;  %v10927_v9 = vshrl.u32 %v10926_v47, 16  ;;  %v2955_v12 = vld [vmem:[#allocation2 + $0x90] sm:$0xe]  ;;  %v3219_v44 = vld [vmem:[#allocation2 + $0xa8] sm:$0xf]  ;;  %v2727_v14 = vsel %vm8695_vm1, %v2722_v59, %v2726_v61  ;;  %v3094_v49 = vsel %vm8447_vm14, %v3092_v1, %v3093_v58  ;;  %v7232_v61 = vpop.f32.mrf.mxu1 }
 0x296   : > { %v3577_v23 = vrot.slane %v10925_v15, 5  ;;  %3744 = vst [vmem:[#allocation3 + $0x310] sm:$0xf] %v3570_v57  ;;  %v2732_v10 = vrot.slane %v2731_v40, 4  ;;  %v2956_v43 = vld [vmem:[#allocation2 + $0x94] sm:$0xf]  ;;  %v9853_v57 = vadd.f32 %v9820_v46, %v9755_v42  ;;  %v9857_v59 = vadd.f32 %v9798_v25, %v9784_v55 }
 0x297   : > { %v2741_v60 = vrot.slane %v10927_v9, 4  ;;  %v3220_v34 = vld [vmem:[#allocation2 + $0xac] sm:$0xf]  ;;  %3251 = vst [vmem:[#allocation3 + $0x378] sm:$0xf] %v3219_v44  ;;  %v3583_v15 = vrot.slane %v3581_v19, 5  ;;  %v9860_v58 = vadd.f32 %v7348_v52, %v9814_v0  ;;  %v7233_v52 = vpop.f32.mrf.mxu1 }
 0x298   : > { %v3578_v4 = vor.u32 %v3577_v23, %v3574_v56  ;;  %v8023_v41 = vld [vmem:[#allocation3 + $0x2a0] ss:$36 sps:$4 sm:$0xff]   ;;  %2910 = vst [vmem:[#allocation3 + $0x2e0] sm:$0xf] %v2727_v14  ;;  %3183 = vst [vmem:[#allocation3 + $0x308] sm:$0xf] %v3094_v49  ;;  %v9862_v56 = vpop.f32.mrf.mxu0  ;;  %v2737_v45 = vsel %vm8695_vm1, %v2732_v10, %v2736_v11 }
 0x299   : > { %v8027_v50 = vld [vmem:[#allocation3 + $0x29c] ss:$36 sps:$4 sm:$0xff]   ;;  %3252 = vst [vmem:[#allocation3 + $0x39c] sm:$0xf] %v3220_v34  ;;  %v3593_v1 = vrot.slane %v3591_v38, 5  ;;  %v10928_v23 = vshll.u32 %v10926_v47, 16  ;;  %6094 = vmatmul.mubr.bf16.gmra.mxu0 %v8023_v41 }
 0x29a   : > { %v3579_v40 = vrot.slane %v3578_v4, 4  ;;  %5932 = vmatprep.mubr.bf16.mxu1 %v8027_v50  ;;  %2911 = vst [vmem:[#allocation3 + $0x304] sm:$0xf] %v2737_v45  ;;  %v10929_v26 = vld [vmem:[#allocation34_spill] sm:$0xff]  ;;  %v2748_v55 = vshll.u32 %v2460_v2, 16  ;;  %v2752_v25 = vshrl.u32 %v2460_v2, 16  ;;  %v7235_v50 = vpop.f32.mrf.mxu1  ;;  %v9871_v45 = vpop.f32.mrf.mxu0 }
 0x29b   : > { %v2744_v46 = vrot.slane %v10928_v23, 5  ;;  %v3588_v19 = vor.u32 %v10929_v26, %v3583_v15  ;;  %v2758_v9 = vshll.u32 %v2461_v22, 16  ;;  %v2957_v0 = vld [vmem:[#allocation2 + $0x98] sm:$0x1]  ;;  %v6898_v11 = vrot.slane %v2955_v12, 9 }
 0x29c   : > { %v3584_v44 = vsel %vm8695_vm1, %v3579_v40, %v3583_v15  ;;  %v3097_v10 = vrot.slane %v2956_v43, 5  ;;  %v3296_v38 = vld [vmem:[#allocation2 + $0xac] sm:$0xf]  ;;  %v8032_v49 = vld [vmem:[#allocation3 + $0x298] ss:$36 sps:$4 sm:$0xff]   ;;  %v2750_v4 = vrot.slane %v2748_v55, 5 }
 0x29d   : > { %v2745_v14 = vor.u32 %v2744_v46, %v2741_v60  ;;  %v3589_v47 = vrot.slane %v3588_v19, 4  ;;  %3745 = vst [vmem:[#allocation3 + $0x334] sm:$0xf] %v3584_v44  ;;  %v2754_v34 = vrot.slane %v2752_v25, 4  ;;  %v2760_v41 = vrot.slane %v2758_v9, 5  ;;  %v7236_v9 = vpop.f32.mrf.mxu1  ;;  %5933 = vmatmul.mubr.bf16.gmra.mxu1 %v8032_v49 }
 0x29e   : > { %v3098_v22 = vsel %vm8447_vm14, %v6898_v11, %v3097_v10  ;;  %v3099_v23 = vrot.slane %v3097_v10, 4  ;;  %v3100_v26 = vrot.slane %v2957_v0, 5  ;;  %v3297_v15 = vld [vmem:[#allocation2 + $0xb0] sm:$0x1]  ;;  %v8029_v60 = vld [vmem:[#allocation3 + $0x2e8] ss:$36 sps:$4 sm:$0xff]   ;;  %v7234_v25 = vadd.f32 %v7233_v52, %v7232_v61 }
 0x29f   : > { %v2746_v2 = vrot.slane %v2745_v14, 4  ;;  %v8031_v12 = vld [vmem:[#allocation3 + $0x2ec] ss:$36 sps:$4 sm:$0xff]   ;;  %v3594_v43 = vsel %vm8695_vm1, %v3589_v47, %v3593_v1  ;;  %v2755_v40 = vor.u32 %v2754_v34, %v2750_v4  ;;  %3184 = vst [vmem:[#allocation3 + $0x32c] sm:$0xf] %v3098_v22  ;;  %v3598_v46 = vrot.slane %v3596_v28, 4 }
 0x2a0   : > { %v2464_v19 = vld [vmem:[#allocation2 + $0xa4] sm:$0x1]  ;;  %v2958_v55 = vld [vmem:[#allocation2 + $0x9c] sm:$0xe]  ;;  %3746 = vst [vmem:[#allocation3 + $0x358] sm:$0xf] %v3594_v43  ;;  %v3101_v0 = vsel %vm8447_vm14, %v3099_v23, %v3100_v26  ;;  %6101 = vmatprep.mubr.bf16.mxu0 %v8031_v12  ;;  %v9893_v26 = vadd.f32 %v7236_v9, %v7235_v50 }
 0x2a1   : > { %v2751_v44 = vsel %vm8695_vm1, %v2746_v2, %v2750_v4  ;;  %v3601_v14 = vrot.slane %v3599_v20, 5  ;;  %v3605_v1 = vshll.u32 %v3296_v38, 16  ;;  %v3221_v11 = vld [vmem:[#allocation2 + $0xb4] sm:$0xf]  ;;  %v2756_v10 = vrot.slane %v2755_v40, 4  ;;  %v10930_v52 = vld [vmem:[#allocation30_spill] sm:$0xff]  ;;  %v9887_v4 = vpop.f32.mrf.mxu0  ;;  %6102 = vmatmul.mubr.bf16.gmra.mxu0 %v8029_v60 }
 0x2a2   : > { %2912 = vst [vmem:[#allocation3 + $0x328] sm:$0xf] %v2751_v44  ;;  %3185 = vst [vmem:[#allocation3 + $0x350] sm:$0xf] %v3101_v0  ;;  %v3609_v28 = vshrl.u32 %v3296_v38, 16  ;;  %v3615_v61 = vshll.u32 %v3297_v15, 16  ;;  %v7238_v38 = vpop.f32.mrf.mxu1  ;;  %v9900_v0 = vadd.f32 %v7234_v25, %v9755_v42 }
 0x2a3   : > { %v10931_v47 = vshrl.u32 %v10930_v52, 16  ;;  %v3222_v22 = vld [vmem:[#allocation2 + $0xb8] sm:$0xf]  ;;  %3253 = vst [vmem:[#allocation3 + $0x3c0] sm:$0xf] %v3221_v11  ;;  %v3602_v20 = vor.u32 %v3601_v14, %v3598_v46  ;;  %v3607_v23 = vrot.slane %v3605_v1, 5  ;;  %v2761_v15 = vsel %vm8695_vm1, %v2756_v10, %v2760_v41 }
 0x2a4   : > { %v8033_v2 = vld [vmem:[#allocation3 + $0x2e4] ss:$36 sps:$4 sm:$0xff]   ;;  %3254 = vst [vmem:[#allocation3 + $0x3e4] sm:$0xf] %v3222_v22  ;;  %v3611_v12 = vrot.slane %v3609_v28, 4  ;;  %v10932_v43 = vshll.u32 %v10930_v52, 16  ;;  %v7239_v1 = vpop.f32.mrf.mxu1  ;;  %v9902_v28 = vpop.f32.mrf.mxu0 }
 0x2a5   : > { %v2765_v34 = vrot.slane %v10931_v47, 4  ;;  %v2959_v49 = vld [vmem:[#allocation2 + $0xa0] sm:$0xf]  ;;  %v2960_v44 = vld [vmem:[#allocation2 + $0xa4] sm:$0x1]  ;;  %5940 = vmatprep.mubr.bf16.mxu1 %v8033_v2  ;;  %v3603_v30 = vrot.slane %v3602_v20, 4 }
 0x2a6   : > { %v2768_v40 = vrot.slane %v10932_v43, 5  ;;  %2913 = vst [vmem:[#allocation3 + $0x34c] sm:$0xf] %v2761_v15  ;;  %v8106_v46 = vld [vmem:[#allocation2 + $0xa0] sm:$0xf]  ;;  %v2782_v9 = vshll.u32 %v2464_v19, 16  ;;  %v3612_v11 = vor.u32 %v3611_v12, %v3607_v23 }
 0x2a7   : > { %v2772_v50 = vshll.u32 %v8106_v46, 16  ;;  %v6899_v14 = vrot.slane %v2958_v55, 9  ;;  %v8039_v60 = vld [vmem:[#allocation3 + $0x2e0] ss:$36 sps:$4 sm:$0xff]   ;;  %v3617_v47 = vrot.slane %v3615_v61, 5  ;;  %v3104_v10 = vrot.slane %v2959_v49, 5 }
 0x2a8   : > { %v2769_v41 = vor.u32 %v2768_v40, %v2765_v34  ;;  %v3608_v52 = vsel %vm8695_vm1, %v3603_v30, %v3607_v23  ;;  %v2784_v22 = vrot.slane %v2782_v9, 5  ;;  %v3107_v2 = vrot.slane %v2960_v44, 5  ;;  %v3300_v15 = vld [vmem:[#allocation2 + $0xbc] sm:$0x1]  ;;  %v8038_v20 = vld [vmem:[#allocation3 + $0x334] ss:$36 sps:$4 sm:$0xff]   ;;  %5941 = vmatmul.mubr.bf16.gmra.mxu1 %v8039_v60 }
 0x2a9   : > { %v2774_v25 = vrot.slane %v2772_v50, 5  ;;  %v3613_v43 = vrot.slane %v3612_v11, 4  ;;  %3747 = vst [vmem:[#allocation3 + $0x37c] sm:$0xf] %v3608_v52  ;;  %v3105_v19 = vsel %vm8447_vm14, %v6899_v14, %v3104_v10  ;;  %v9910_v55 = vadd.f32 %v9862_v56, %v9845_v16  ;;  %v2466_v61 = vld [vmem:[#allocation2 + $0xac] sm:$0xf]  ;;  %6109 = vmatprep.mubr.bf16.mxu0 %v8038_v20  ;;  %v9921_v52 = vpop.f32.mrf.mxu0 }
 0x2aa   : > { %v9912_v34 = vadd.f32 %v7239_v1, %v7238_v38  ;;  %v8036_v49 = vld [vmem:[#allocation3 + $0x330] ss:$36 sps:$4 sm:$0xff]   ;;  %v2770_v12 = vrot.slane %v2769_v41, 4  ;;  %v10933_v23 = vld [vmem:[#allocation32_spill] sm:$0xff]  ;;  %v3106_v30 = vrot.slane %v3104_v10, 4  ;;  %v3639_v11 = vshll.u32 %v3300_v15, 16 }
 0x2ab   : > { %v2779_v40 = vor.u32 %v10933_v23, %v2774_v25  ;;  %3186 = vst [vmem:[#allocation3 + $0x374] sm:$0xf] %v3105_v19  ;;  %v10934_v44 = vld [vmem:[#allocation38_spill] sm:$0xff]  ;;  %v2467_v9 = vld [vmem:[#allocation2 + $0xb0] sm:$0x1]  ;;  %v3618_v14 = vsel %vm8695_vm1, %v3613_v43, %v3617_v47  ;;  %v2789_v47 = vrot.slane %v2787_v6, 4  ;;  %v7241_v43 = vpop.f32.mrf.mxu1  ;;  %6110 = vmatmul.mubr.bf16.gmra.mxu0 %v8036_v49  ;;  %v9931_v15 = vadd.f32 %v9893_v26, %v9755_v42 }
 0x2ac   : > { %v10935_v46 = vshrl.u32 %v10934_v44, 16  ;;  %v10936_v16 = vshll.u32 %v10934_v44, 16  ;;  %v8107_v38 = vld [vmem:[#allocation2 + $0xb8] sm:$0xf]  ;;  %v3223_v41 = vld [vmem:[#allocation2 + $0xc0] sm:$0xf]  ;;  %v2775_v10 = vsel %vm8695_vm1, %v2770_v12, %v2774_v25  ;;  %v3108_v60 = vsel %vm8447_vm14, %v3106_v30, %v3107_v2 }
 0x2ad   : > { %v3629_v1 = vshll.u32 %v8107_v38, 16  ;;  %3748 = vst [vmem:[#allocation3 + $0x3a0] sm:$0xf] %v3618_v14  ;;  %v2780_v19 = vrot.slane %v2779_v40, 4  ;;  %v2961_v20 = vld [vmem:[#allocation2 + $0xa8] sm:$0xe]  ;;  %v9935_v2 = vadd.f32 %v9887_v4, %v9871_v45  ;;  %v7359_v38 = vpop.f32.mrf.mxu0  ;;  %v9964_v51 = vadd.f32 %v9921_v52, %v9902_v28 }
 0x2ae   : > { %v3622_v50 = vrot.slane %v10935_v46, 4  ;;  %v3625_v56 = vrot.slane %v10936_v16, 5  ;;  %v3224_v23 = vld [vmem:[#allocation2 + $0xc4] sm:$0xf]  ;;  %3255 = vst [vmem:[#allocation3 + $0x408] sm:$0xf] %v3223_v41 }
 0x2af   : > { %v8040_v44 = vld [vmem:[#allocation3 + $0x32c] ss:$36 sps:$4 sm:$0xff]   ;;  %2914 = vst [vmem:[#allocation3 + $0x370] sm:$0xf] %v2775_v10  ;;  %3187 = vst [vmem:[#allocation3 + $0x398] sm:$0xf] %v3108_v60  ;;  %v2785_v6 = vsel %vm8695_vm1, %v2780_v19, %v2784_v22  ;;  %v7242_v10 = vpop.f32.mrf.mxu1 }
 0x2b0   : > { %v3626_v25 = vor.u32 %v3625_v56, %v3622_v50  ;;  %v3631_v12 = vrot.slane %v3629_v1, 5  ;;  %v2962_v40 = vld [vmem:[#allocation2 + $0xac] sm:$0xf]  ;;  %3256 = vst [vmem:[#allocation3 + $0x42c] sm:$0xf] %v3224_v23  ;;  %v3641_v30 = vrot.slane %v3639_v11, 5  ;;  %5948 = vmatprep.mubr.bf16.mxu1 %v8040_v44 }
 0x2b1   : > { %v2792_v49 = vrot.slane %v2790_v21, 5  ;;  %v2796_v46 = vshll.u32 %v2466_v61, 16  ;;  %2915 = vst [vmem:[#allocation3 + $0x394] sm:$0xf] %v2785_v6  ;;  %v2800_v14 = vshrl.u32 %v2466_v61, 16  ;;  %v2806_v16 = vshll.u32 %v2467_v9, 16 }
 0x2b2   : > { %v3627_v26 = vrot.slane %v3626_v25, 4  ;;  %v3636_v50 = vor.u32 %v9394_v7, %v3631_v12  ;;  %v2963_v56 = vld [vmem:[#allocation2 + $0xb0] sm:$0x1]  ;;  %v6900_v1 = vrot.slane %v2961_v20, 9  ;;  %v3111_v41 = vrot.slane %v2962_v40, 5 }
 0x2b3   : > { %v2793_v45 = vor.u32 %v2792_v49, %v2789_v47  ;;  %v2798_v4 = vrot.slane %v2796_v46, 5  ;;  %v3302_v22 = vld [vmem:[#allocation2 + $0xc4] sm:$0xf]  ;;  %v2802_v19 = vrot.slane %v2800_v14, 4  ;;  %v2808_v60 = vrot.slane %v2806_v16, 5  ;;  %v7360_v49 = vpop.f32.mrf.mxu0  ;;  %v7244_v16 = vpop.f32.mrf.mxu1 }
 0x2b4   : > { %v8045_v11 = vld [vmem:[#allocation3 + $0x328] ss:$36 sps:$4 sm:$0xff]   ;;  %v3632_v18 = vsel %vm8695_vm1, %v3627_v26, %v3631_v12  ;;  %v3637_v21 = vrot.slane %v3636_v50, 4  ;;  %v3112_v7 = vsel %vm8447_vm14, %v6900_v1, %v3111_v41  ;;  %v3113_v61 = vrot.slane %v3111_v41, 4  ;;  %v3303_v47 = vld [vmem:[#allocation2 + $0xc8] sm:$0x1] }
 0x2b5   : > { %3749 = vst [vmem:[#allocation3 + $0x3c4] sm:$0xf] %v3632_v18  ;;  %v2794_v23 = vrot.slane %v2793_v45, 4  ;;  %v3114_v9 = vrot.slane %v2963_v56, 5  ;;  %v8044_v44 = vld [vmem:[#allocation3 + $0x37c] ss:$36 sps:$4 sm:$0xff]   ;;  %5949 = vmatmul.mubr.bf16.gmra.mxu1 %v8045_v11  ;;  %v2803_v25 = vor.u32 %v2802_v19, %v2798_v4  ;;  %v9948_v40 = vadd.f32 %v7242_v10, %v7241_v43  ;;  %v7245_v18 = vpop.f32.mrf.mxu1 }
 0x2b6   : > { %v3642_v20 = vsel %vm8695_vm1, %v3637_v21, %v3641_v30  ;;  %3188 = vst [vmem:[#allocation3 + $0x3bc] sm:$0xf] %v3112_v7  ;;  %v3646_v12 = vrot.slane %v3644_v54, 4  ;;  %v2470_v6 = vld [vmem:[#allocation2 + $0xbc] sm:$0x1]  ;;  %v3649_v30 = vrot.slane %v3647_v53, 5  ;;  %6117 = vmatprep.mubr.bf16.mxu0 %v8044_v44  ;;  %v9960_v54 = vadd.f32 %v9912_v34, %v9755_v42 }
 0x2b7   : > { %v8042_v46 = vld [vmem:[#allocation3 + $0x378] ss:$36 sps:$4 sm:$0xff]   ;;  %3750 = vst [vmem:[#allocation3 + $0x3e8] sm:$0xf] %v3642_v20  ;;  %v2799_v26 = vsel %vm8695_vm1, %v2794_v23, %v2798_v4  ;;  %v3115_v50 = vsel %vm8447_vm14, %v3113_v61, %v3114_v9  ;;  %v3653_v14 = vshll.u32 %v3302_v22, 16  ;;  %v2804_v56 = vrot.slane %v2803_v25, 4  ;;  %v7362_v9 = vpop.f32.mrf.mxu0 }
 0x2b8   : > { %v2964_v43 = vld [vmem:[#allocation2 + $0xb4] sm:$0xe]  ;;  %2916 = vst [vmem:[#allocation3 + $0x3b8] sm:$0xf] %v2799_v26  ;;  %3189 = vst [vmem:[#allocation3 + $0x3e0] sm:$0xf] %v3115_v50  ;;  %6118 = vmatmul.mubr.bf16.gmra.mxu0 %v8042_v46  ;;  %v3650_v10 = vor.u32 %v3649_v30, %v3646_v12  ;;  %v9966_v21 = vadd.f32 %v7360_v49, %v7359_v38  ;;  %v7247_v38 = vpop.f32.mrf.mxu1 }
 0x2b9   : > { %v3657_v45 = vshrl.u32 %v3302_v22, 16  ;;  %v3663_v1 = vshll.u32 %v3303_v47, 16  ;;  %v2965_v4 = vld [vmem:[#allocation2 + $0xb8] sm:$0xf]  ;;  %v8048_v41 = vld [vmem:[#allocation3 + $0x374] ss:$36 sps:$4 sm:$0xff]   ;;  %v2809_v19 = vsel %vm8695_vm1, %v2804_v56, %v2808_v60  ;;  %v7363_v50 = vpop.f32.mrf.mxu0 }
 0x2ba   : > { %v3655_v11 = vrot.slane %v3653_v14, 5  ;;  %v2966_v53 = vld [vmem:[#allocation2 + $0xbc] sm:$0x1]  ;;  %v10937_v22 = vld [vmem:[#allocation37_spill] sm:$0xff]  ;;  %5956 = vmatprep.mubr.bf16.mxu1 %v8048_v41  ;;  %2917 = vst [vmem:[#allocation3 + $0x3dc] sm:$0xf] %v2809_v19 }
 0x2bb   : > { %v3659_v34 = vrot.slane %v3657_v45, 4  ;;  %v3665_v23 = vrot.slane %v3663_v1, 5  ;;  %v10938_v7 = vshrl.u32 %v10937_v22, 16  ;;  %v3651_v47 = vrot.slane %v3650_v10, 4  ;;  %v8108_v52 = vld [vmem:[#allocation2 + $0xb8] sm:$0xf]  ;;  %v7248_v1 = vpop.f32.mrf.mxu1 }
 0x2bc   : > { %v10939_v44 = vshll.u32 %v10937_v22, 16  ;;  %v2820_v20 = vshll.u32 %v8108_v52, 16  ;;  %v2830_v25 = vshll.u32 %v2470_v6, 16  ;;  %v8046_v12 = vld [vmem:[#allocation3 + $0x370] ss:$36 sps:$4 sm:$0xff]   ;;  %v6901_v46 = vrot.slane %v2964_v43, 9 }
 0x2bd   : > { %v2813_v61 = vrot.slane %v10938_v7, 4  ;;  %v3660_v49 = vor.u32 %v3659_v34, %v3655_v11  ;;  %v3118_v60 = vrot.slane %v2965_v4, 5  ;;  %v3121_v26 = vrot.slane %v2966_v53, 5  ;;  %v3225_v41 = vld [vmem:[#allocation2 + $0xcc] sm:$0xf]  ;;  %5957 = vmatmul.mubr.bf16.gmra.mxu1 %v8046_v12  ;;  %v7365_v34 = vpop.f32.mrf.mxu0 }
 0x2be   : > { %v2816_v28 = vrot.slane %v10939_v44, 5  ;;  %v3656_v30 = vsel %vm8695_vm1, %v3651_v47, %v3655_v11  ;;  %v2822_v56 = vrot.slane %v2820_v20, 5  ;;  %v2832_v45 = vrot.slane %v2830_v25, 5  ;;  %v3226_v10 = vld [vmem:[#allocation2 + $0xd0] sm:$0xf] }
 0x2bf   : > { %v8052_v19 = vld [vmem:[#allocation3 + $0x3c4] ss:$36 sps:$4 sm:$0xff]   ;;  %v3661_v22 = vrot.slane %v3660_v49, 4  ;;  %3751 = vst [vmem:[#allocation3 + $0x40c] sm:$0xf] %v3656_v30  ;;  %v3119_v6 = vsel %vm8447_vm14, %v6901_v46, %v3118_v60  ;;  %v7246_v43 = vadd.f32 %v7245_v18, %v7244_v16  ;;  %v9978_v4 = vadd.f32 %v7248_v1, %v7247_v38  ;;  %v7366_v25 = vpop.f32.mrf.mxu0 }
 0x2c0   : > { %v2817_v14 = vor.u32 %v2816_v28, %v2813_v61  ;;  %v2472_v53 = vld [vmem:[#allocation2 + $0xc4] sm:$0xf]  ;;  %3257 = vst [vmem:[#allocation3 + $0x450] sm:$0xf] %v3225_v41  ;;  %3258 = vst [vmem:[#allocation3 + $0x474] sm:$0xf] %v3226_v10  ;;  %v2827_v61 = vor.u32 %v9384_v48, %v2822_v56  ;;  %v9981_v44 = vadd.f32 %v7363_v50, %v7362_v9  ;;  %6125 = vmatprep.mubr.bf16.mxu0 %v8052_v19 }
 0x2c1   : > { %v8050_v11 = vld [vmem:[#allocation3 + $0x3c0] ss:$36 sps:$4 sm:$0xff]   ;;  %v3120_v47 = vrot.slane %v3118_v60, 4  ;;  %3190 = vst [vmem:[#allocation3 + $0x404] sm:$0xf] %v3119_v6  ;;  %v9985_v28 = vadd.f32 %v9948_v40, %v9755_v42  ;;  %v3666_v16 = vsel %vm8695_vm1, %v3661_v22, %v3665_v23  ;;  %v9990_v18 = vadd.f32 %v7246_v43, %v9755_v42  ;;  %v7250_v6 = vpop.f32.mrf.mxu1 }
 0x2c2   : > { %v2818_v7 = vrot.slane %v2817_v14, 4  ;;  %v2473_v52 = vld [vmem:[#allocation2 + $0xc8] sm:$0x1]  ;;  %v2837_v20 = vrot.slane %v2835_v29, 4  ;;  %v2967_v48 = vld [vmem:[#allocation2 + $0xc0] sm:$0xe]  ;;  %6126 = vmatmul.mubr.bf16.gmra.mxu0 %v8050_v11  ;;  %v10000_v60 = vadd.f32 %v7366_v25, %v7365_v34  ;;  %v7368_v25 = vpop.f32.mrf.mxu0 }
 0x2c3   : > { %3752 = vst [vmem:[#allocation3 + $0x430] sm:$0xf] %v3666_v16  ;;  %v2828_v38 = vrot.slane %v2827_v61, 4  ;;  %v3122_v40 = vsel %vm8447_vm14, %v3120_v47, %v3121_v26  ;;  %v2840_v23 = vrot.slane %v2838_v32, 5  ;;  %v2968_v12 = vld [vmem:[#allocation2 + $0xc4] sm:$0xf] }
 0x2c4   : > { %v2823_v9 = vsel %vm8695_vm1, %v2818_v7, %v2822_v56  ;;  %v2969_v49 = vld [vmem:[#allocation2 + $0xc8] sm:$0x1]  ;;  %v8055_v46 = vld [vmem:[#allocation3 + $0x3bc] ss:$36 sps:$4 sm:$0xff]   ;;  %3191 = vst [vmem:[#allocation3 + $0x428] sm:$0xf] %v3122_v40 }
 0x2c5   : > { %2918 = vst [vmem:[#allocation3 + $0x400] sm:$0xf] %v2823_v9  ;;  %v2844_v29 = vshll.u32 %v2472_v53, 16  ;;  %v3304_v50 = vld [vmem:[#allocation2 + $0xcc] sm:$0xf]  ;;  %v10940_v30 = vrot.slane %v9326_v31, 5  ;;  %v2833_v32 = vsel %vm8695_vm1, %v2828_v38, %v2832_v45  ;;  %v2841_v26 = vor.u32 %v2840_v23, %v2837_v20  ;;  %5964 = vmatprep.mubr.bf16.mxu1 %v8055_v46  ;;  %v7251_v20 = vpop.f32.mrf.mxu1  ;;  %v7369_v46 = vpop.f32.mrf.mxu0 }
 0x2c6   : > { %v10941_v14 = vld [vmem:[#allocation36_spill] sm:$0xff]  ;;  %v2848_v41 = vshrl.u32 %v2472_v53, 16  ;;  %v2854_v10 = vshll.u32 %v2473_v52, 16  ;;  %v3305_v19 = vld [vmem:[#allocation2 + $0xd0] sm:$0xf]  ;;  %v6902_v34 = vrot.slane %v2967_v48, 9 }
 0x2c7   : > { %v10942_v56 = vrot.slane %v10941_v14, 9  ;;  %v8053_v22 = vld [vmem:[#allocation3 + $0x3b8] ss:$36 sps:$4 sm:$0xff]   ;;  %2919 = vst [vmem:[#allocation3 + $0x424] sm:$0xf] %v2833_v32  ;;  %v2846_v43 = vrot.slane %v2844_v29, 5  ;;  %v7253_v14 = vpop.f32.mrf.mxu1  ;;  %v10020_v32 = vadd.f32 %v7369_v46, %v7368_v25 }
 0x2c8   : > { %v3125_v11 = vrot.slane %v2968_v12, 5  ;;  %v3128_v7 = vrot.slane %v2969_v49, 5  ;;  %v2842_v61 = vrot.slane %v2841_v26, 4  ;;  %v2850_v47 = vrot.slane %v2848_v41, 4  ;;  %v3306_v37 = vld [vmem:[#allocation2 + $0xd4] sm:$0x1]  ;;  %5965 = vmatmul.mubr.bf16.gmra.mxu1 %v8053_v22 }
 0x2c9   : > { %v3945_v1 = vsel %vm8447_vm14, %v10942_v56, %v10940_v30  ;;  %v2856_v17 = vrot.slane %v2854_v10, 5  ;;  %v3668_v16 = vshrl.u32 %v3304_v50, 16  ;;  %v3755_v45 = vld [vmem:[#allocation2 + $0x18] sm:$0xe]  ;;  %v3671_v9 = vshll.u32 %v3304_v50, 16 }
 0x2ca   : > { %4021 = vst [vmem:[#allocation3 + $0x3c8] sm:$0xf] %v3945_v1  ;;  %v3126_v53 = vsel %vm8447_vm14, %v6902_v34, %v3125_v11  ;;  %v3127_v52 = vrot.slane %v3125_v11, 4  ;;  %v3677_v38 = vshll.u32 %v3305_v19, 16  ;;  %v3756_v40 = vld [vmem:[#allocation2 + $0x1c] sm:$0xf]  ;;  %v2847_v48 = vsel %vm8695_vm1, %v2842_v61, %v2846_v43  ;;  %v7371_v11 = vpop.f32.mrf.mxu0 }
 0x2cb   : > { %v2851_v23 = vor.u32 %v2850_v47, %v2846_v43  ;;  %3192 = vst [vmem:[#allocation3 + $0x44c] sm:$0xf] %v3126_v53  ;;  %v7252_v12 = vadd.f32 %v7251_v20, %v7250_v6  ;;  %v3670_v49 = vrot.slane %v3668_v16, 4  ;;  %v8058_v29 = vld [vmem:[#allocation3 + $0x40c] ss:$36 sps:$4 sm:$0xff]   ;;  %v3673_v56 = vrot.slane %v3671_v9, 5  ;;  %v7254_v47 = vpop.f32.mrf.mxu1 }
 0x2cc   : > { %2920 = vst [vmem:[#allocation3 + $0x448] sm:$0xf] %v2847_v48  ;;  %v3129_v30 = vsel %vm8447_vm14, %v3127_v52, %v3128_v7  ;;  %v3757_v1 = vld [vmem:[#allocation2 + $0x20] sm:$0x1]  ;;  %v3761_v50 = vld [vmem:[#allocation2 + $0x30] sm:$0xe]  ;;  %v10024_v26 = vadd.f32 %v9697_v13, %v9796_v62  ;;  %v10028_v10 = vadd.f32 %v9978_v4, %v9755_v42  ;;  %6133 = vmatprep.mubr.bf16.mxu0 %v8058_v29  ;;  %v7372_v52 = vpop.f32.mrf.mxu0 }
 0x2cd   : > { %v8056_v41 = vld [vmem:[#allocation3 + $0x408] ss:$36 sps:$4 sm:$0xff]   ;;  %v2852_v22 = vrot.slane %v2851_v23, 4  ;;  %3193 = vst [vmem:[#allocation3 + $0x470] sm:$0xf] %v3129_v30  ;;  %v3679_v6 = vrot.slane %v3677_v38, 5  ;;  %v3674_v7 = vor.u32 %v3673_v56, %v3670_v49  ;;  %v7255_v42 = vadd.f32 %v7254_v47, %v7253_v14  ;;  %v7256_v47 = vpop.f32.mrf.mxu1 }
 0x2ce   : > { %v3681_v43 = vshrl.u32 %v3305_v19, 16  ;;  %v3762_v34 = vld [vmem:[#allocation2 + $0x34] sm:$0xf]  ;;  %v3687_v61 = vshll.u32 %v3306_v37, 16  ;;  %v6903_v16 = vrot.slane %v3755_v45, 9  ;;  %v3853_v25 = vrot.slane %v3756_v40, 5  ;;  %6134 = vmatmul.mubr.bf16.gmra.mxu0 %v8056_v41 }
 0x2cf   : > { %v8061_v53 = vld [vmem:[#allocation3 + $0x404] ss:$36 sps:$4 sm:$0xff]   ;;  %v2857_v13 = vsel %vm8695_vm1, %v2852_v22, %v2856_v17  ;;  %v3763_v4 = vld [vmem:[#allocation2 + $0x38] sm:$0x1]  ;;  %v10034_v19 = vadd.f32 %v9676_v39, %v9818_v5  ;;  %v3675_v9 = vrot.slane %v3674_v7, 4  ;;  %v3856_v39 = vrot.slane %v3757_v1, 5 }
 0x2d0   : > { %v3683_v62 = vrot.slane %v3681_v43, 4  ;;  %v8059_v20 = vld [vmem:[#allocation3 + $0x400] ss:$36 sps:$4 sm:$0xff]   ;;  %2921 = vst [vmem:[#allocation3 + $0x46c] sm:$0xf] %v2857_v13  ;;  %v3689_v17 = vrot.slane %v3687_v61, 5  ;;  %v3854_v38 = vsel %vm8447_vm14, %v6903_v16, %v3853_v25  ;;  %5972 = vmatprep.mubr.bf16.mxu1 %v8061_v53 }
 0x2d1   : > { %v10039_v37 = vld [vmem:[%s10715_s7] ss:$0 sm:$0xff]  ;;  %v3855_v48 = vrot.slane %v3853_v25, 4  ;;  %3995 = vst [vmem:[#allocation3 + $0x20] sm:$0xf] %v3854_v38  ;;  %v6905_v5 = vrot.slane %v3761_v50, 9  ;;  %5973 = vmatmul.mubr.bf16.gmra.mxu1 %v8059_v20  ;;  %v3680_v49 = vsel %vm8695_vm1, %v3675_v9, %v3679_v6 }
 0x2d2   : > { %v10042_v45 = vadd.f32 %v10039_v37, %v7252_v12  ;;  %v3684_v40 = vor.u32 %v3683_v62, %v3679_v6  ;;  %v3767_v23 = vld [vmem:[#allocation2 + $0x48] sm:$0xe]  ;;  %v3867_v46 = vrot.slane %v3762_v34, 5  ;;  %v3870_v29 = vrot.slane %v3763_v4, 5  ;;  %v3768_v30 = vld [vmem:[#allocation2 + $0x4c] sm:$0xf] }
 0x2d3   : > { %v10048_v12 = vadd.f32 %v7372_v52, %v7371_v11  ;;  %v3769_v14 = vld [vmem:[#allocation2 + $0x50] sm:$0x1]  ;;  %3753 = vst [vmem:[#allocation3 + $0x454] sm:$0xf] %v3680_v49  ;;  %v3857_v41 = vsel %vm8447_vm14, %v3855_v48, %v3856_v39  ;;  %v6907_v22 = vrot.slane %v3767_v23, 9  ;;  %v3881_v1 = vrot.slane %v3768_v30, 5 }
 0x2d4   : > { %v3685_v56 = vrot.slane %v3684_v40, 4  ;;  %v3772_v43 = vld [vmem:[#allocation2 + $0x5c] sm:$0x1]  ;;  %3996 = vst [vmem:[#allocation3 + $0x44] sm:$0xf] %v3857_v41  ;;  %v3868_v50 = vsel %vm8447_vm14, %v6905_v5, %v3867_v46  ;;  %v3869_v7 = vrot.slane %v3867_v46, 4  ;;  %v10057_v61 = vadd.f32 %v10039_v37, %v7255_v42  ;;  %v7257_v40 = vpop.f32.mrf.mxu1 }
 0x2d5   : > { %v3884_v6 = vrot.slane %v3769_v14, 5  ;;  %v3891_v34 = vrot.slane %v3772_v43, 5  ;;  %3999 = vst [vmem:[#allocation3 + $0xb0] sm:$0xf] %v3868_v50  ;;  %v3882_v16 = vsel %vm8447_vm14, %v6907_v22, %v3881_v1  ;;  %v3883_v25 = vrot.slane %v3881_v1, 4  ;;  %v10943_v4 = vld [vmem:[#allocation15_spill] sm:$0xff]  ;;  %v7374_v43 = vpop.f32.mrf.mxu0 }
 0x2d6   : > { %v3690_v11 = vsel %vm8695_vm1, %v3685_v56, %v3689_v17  ;;  %v3773_v53 = vld [vmem:[#allocation2 + $0x60] sm:$0xe]  ;;  %v3774_v13 = vld [vmem:[#allocation2 + $0x64] sm:$0xf]  ;;  %v3871_v62 = vsel %vm8447_vm14, %v3869_v7, %v3870_v29  ;;  %4003 = vst [vmem:[#allocation3 + $0x140] sm:$0xf] %v3882_v16  ;;  %v10070_v5 = vadd.f32 %v9746_v36, %v9828_v3  ;;  %v10074_v23 = vadd.f32 %v9733_v35, %v9853_v57  ;;  %v7259_v14 = vpop.f32.mrf.mxu1 }
 0x2d7   : > { %3754 = vst [vmem:[#allocation3 + $0x478] sm:$0xf] %v3690_v11  ;;  %v3892_v24 = vsel %vm8447_vm14, %v10943_v4, %v3891_v34  ;;  %v3775_v52 = vld [vmem:[#allocation2 + $0x68] sm:$0x1]  ;;  %v6909_v42 = vrot.slane %v3773_v53, 9  ;;  %v3895_v20 = vrot.slane %v3774_v13, 5  ;;  %v3885_v48 = vsel %vm8447_vm14, %v3883_v25, %v3884_v6  ;;  %v7375_v34 = vpop.f32.mrf.mxu0 }
 0x2d8   : > { %v3778_v9 = vld [vmem:[#allocation2 + $0x74] sm:$0x1]  ;;  %v8063_v17 = vld [vmem:[#allocation3 + $0x448] ss:$36 sps:$4 sm:$0xff]   ;;  %4000 = vst [vmem:[#allocation3 + $0xd4] sm:$0xf] %v3871_v62  ;;  %v7258_v49 = vadd.f32 %v7257_v40, %v7256_v47  ;;  %v10080_v36 = vadd.f32 %v9782_v63, %v9891_v33  ;;  %v10084_v35 = vadd.f32 %v9857_v59, %v9900_v0  ;;  %v10088_v3 = vadd.f32 %v9860_v58, %v9931_v15  ;;  %v7260_v7 = vpop.f32.mrf.mxu1 }
 0x2d9   : > { %v8065_v38 = vld [vmem:[#allocation3 + $0x44c] ss:$36 sps:$4 sm:$0xff]   ;;  %4006 = vst [vmem:[#allocation3 + $0x1ac] sm:$0xf] %v3892_v24  ;;  %v3898_v39 = vrot.slane %v3775_v52, 5  ;;  %v3896_v46 = vsel %vm8447_vm14, %v6909_v42, %v3895_v20  ;;  %v3897_v29 = vrot.slane %v3895_v20, 4  ;;  %v10092_v57 = vadd.f32 %v9910_v55, %v9960_v54 }
 0x2da   : > { %4004 = vst [vmem:[#allocation3 + $0x164] sm:$0xf] %v3885_v48  ;;  %v3905_v30 = vrot.slane %v3778_v9, 5  ;;  %5980 = vmatprep.mubr.bf16.mxu1 %v8065_v38  ;;  %4007 = vst [vmem:[#allocation3 + $0x1d0] sm:$0xf] %v3896_v46  ;;  %v5597_v1 = vadd.f32 %v10039_v37, %v7258_v49  ;;  %v10944_v33 = vld [vmem:[#allocation22_spill] sm:$0xff]  ;;  %v10102_v55 = vadd.f32 %v9935_v2, %v9985_v28  ;;  %v7262_v38 = vpop.f32.mrf.mxu1 }
 0x2db   : > { %v3779_v56 = vld [vmem:[#allocation2 + $0x78] sm:$0xe]  ;;  %v3780_v41 = vld [vmem:[#allocation2 + $0x7c] sm:$0xf]  ;;  %v3781_v22 = vld [vmem:[#allocation2 + $0x80] sm:$0x1]  ;;  %5981 = vmatmul.mubr.bf16.gmra.mxu1 %v8063_v17  ;;  %v3899_v63 = vsel %vm8447_vm14, %v3897_v29, %v3898_v39  ;;  %v10106_v54 = vadd.f32 %v9964_v51, %v9990_v18  ;;  %v7261_v6 = vadd.f32 %v7260_v7, %v7259_v14  ;;  %v10110_v16 = vadd.f32 %v9966_v21, %v10028_v10 }
 0x2dc   : > { %v3906_v59 = vsel %vm8447_vm14, %v10944_v33, %v3905_v30  ;;  %v6911_v0 = vrot.slane %v3779_v56, 9  ;;  %v3784_v50 = vld [vmem:[#allocation2 + $0x8c] sm:$0x1]  ;;  %4008 = vst [vmem:[#allocation3 + $0x1f4] sm:$0xf] %v3899_v63  ;;  %v3909_v58 = vrot.slane %v3780_v41, 5  ;;  %v10114_v25 = vadd.f32 %v9981_v44, %v10042_v45  ;;  %v7377_v44 = vpop.f32.mrf.mxu0  ;;  %v7263_v56 = vpop.f32.mrf.mxu1 }
 0x2dd   : > { %4010 = vst [vmem:[#allocation3 + $0x23c] sm:$0xf] %v3906_v59  ;;  %v3912_v15 = vrot.slane %v3781_v22, 5  ;;  %v3919_v11 = vrot.slane %v3784_v50, 5  ;;  %v3785_v47 = vld [vmem:[#allocation2 + $0x90] sm:$0xe]  ;;  %v10118_v13 = vadd.f32 %v7375_v34, %v7374_v43  ;;  %v10124_v62 = vadd.f32 %v10000_v60, %v10057_v61 }
 0x2de   : > { %v10116_v53 = vld [vmem:[#allocation2 + $0xd0] sm:$0xf]  ;;  %v8066_v2 = vld [vmem:[#allocation3 + $0x450] ss:$36 sps:$4 sm:$0xff]   ;;  %v3910_v51 = vsel %vm8447_vm14, %v6911_v0, %v3909_v58  ;;  %v3911_v18 = vrot.slane %v3909_v58, 4  ;;  %v5600_v10 = vadd.f32 %v10039_v37, %v7261_v6  ;;  %v10945_v45 = vld [vmem:[#allocation29_spill] sm:$0xff]  ;;  %v10131_v52 = vadd.f32 %v10020_v32, %v5597_v1  ;;  %v7378_v61 = vpop.f32.mrf.mxu0 }
 0x2df   : > { %v8068_v28 = vld [vmem:[#allocation3 + $0x454] ss:$36 sps:$4 sm:$0xff]   ;;  %4011 = vst [vmem:[#allocation3 + $0x260] sm:$0xf] %v3910_v51  ;;  %v3920_v24 = vsel %vm8447_vm14, %v10945_v45, %v3919_v11  ;;  %v8069_v42 = vld [vmem:[#allocation3 + $0x20] ss:$36 sps:$4 sm:$0xff]   ;;  %v10138_v40 = vadd.f32 %v7378_v61, %v7377_v44  ;;  %v7264_v63 = vadd.f32 %v7263_v56, %v7262_v38 }
 0x2e0   : > { %v8070_v21 = vld [vmem:[#allocation3 + $0xb0] ss:$36 sps:$4 sm:$0xff]   ;;  %v8072_v4 = vld [vmem:[#allocation3 + $0xf8] ss:$36 sps:$4 sm:$0xff]   ;;  %6141 = vmatprep.mubr.bf16.mxu0 %v8068_v28  ;;  %v3913_v20 = vsel %vm8447_vm14, %v3911_v18, %v3912_v15  ;;  %4014 = vst [vmem:[#allocation3 + $0x2cc] sm:$0xf] %v3920_v24  ;;  %v10136_v17 = vadd.f32 %v10048_v12, %v5600_v10  ;;  %v7380_v14 = vpop.f32.mrf.mxu0 }
 0x2e1   : > { %6142 = vmatmul.mubr.bf16.gmra.mxu0 %v8066_v2  ;;  %7730 = vmatprep.mubr.bf16.mxu1 %v8070_v21  ;;  %v8073_v60 = vld [vmem:[#allocation3 + $0x140] ss:$36 sps:$4 sm:$0xff]   ;;  %4012 = vst [vmem:[#allocation3 + $0x284] sm:$0xf] %v3913_v20  ;;  %v3786_v9 = vld [vmem:[#allocation2 + $0x94] sm:$0xf]  ;;  %v5605_v11 = vadd.f32 %v10039_v37, %v7264_v63 }
 0x2e2   : > { %7726 = vmatprep.mubr.bf16.mxu0 %v8069_v42  ;;  %v3787_v32 = vld [vmem:[#allocation2 + $0x98] sm:$0x1]  ;;  %v6913_v48 = vrot.slane %v3785_v47, 9  ;;  %v3923_v39 = vrot.slane %v3786_v9, 5  ;;  %v3790_v49 = vld [vmem:[#allocation2 + $0xa4] sm:$0x1]  ;;  %v7381_v33 = vpop.f32.mrf.mxu0 }
 0x2e3   : > { %v10946_v46 = vrot.slane %v9326_v31, 5  ;;  %v3958_v30 = vrot.slane %v10116_v53, 5  ;;  %7731 = vmatmul.mubr.bf16.vlgmr.msra.gmra.mxu1 %v8072_v4  ;;  %v3926_v22 = vrot.slane %v3787_v32, 5  ;;  %v3933_v1 = vrot.slane %v3790_v49, 5  ;;  %v8071_v43 = vld [vmem:[#allocation3 + $0x68] ss:$36 sps:$4 sm:$0xff]   ;;  %v7265_v31 = vpop.f32.mrf.mxu1 }
 0x2e4   : > { %7734 = vmatprep.mubr.bf16.mxu1 %v8073_v60  ;;  %v3924_v12 = vsel %vm8447_vm14, %v6913_v48, %v3923_v39  ;;  %v3925_v41 = vrot.slane %v3923_v39, 4  ;;  %v3791_v59 = vld [vmem:[#allocation2 + $0xa8] sm:$0xe]  ;;  %v3792_v0 = vld [vmem:[#allocation2 + $0xac] sm:$0xf]  ;;  %v10145_v50 = vadd.f32 %v7381_v33, %v7380_v14  ;;  %v10947_v58 = vld [vmem:[#allocation35_spill] sm:$0xff]  ;;  %v7383_v2 = vpop.f32.mrf.mxu0  ;;  %v10158_v48 = vadd.f32 %v10118_v13, %v5605_v11 }
 0x2e5   : > { %v3946_v29 = vrot.slane %v10946_v46, 4  ;;  %4015 = vst [vmem:[#allocation3 + $0x2f0] sm:$0xf] %v3924_v12  ;;  %v3934_v15 = vsel %vm8447_vm14, %v10947_v58, %v3933_v1  ;;  %v3793_v6 = vld [vmem:[#allocation2 + $0xb0] sm:$0x1]  ;;  %v6915_v34 = vrot.slane %v3791_v59, 9  ;;  %v7266_v18 = vpop.f32.mrf.mxu1 }
 0x2e6   : > { %v3927_v7 = vsel %vm8447_vm14, %v3925_v41, %v3926_v22  ;;  %v8074_v47 = vld [vmem:[#allocation3 + $0x188] ss:$36 sps:$4 sm:$0xff]   ;;  %4018 = vst [vmem:[#allocation3 + $0x35c] sm:$0xf] %v3934_v15  ;;  %v3937_v28 = vrot.slane %v3792_v0, 5  ;;  %v3940_v51 = vrot.slane %v3793_v6, 5  ;;  %v7267_v4 = vadd.f32 %v7266_v18, %v7265_v31  ;;  %v7384_v44 = vpop.f32.mrf.mxu0 }
 0x2e7   : > { %4016 = vst [vmem:[#allocation3 + $0x314] sm:$0xf] %v3927_v7  ;;  %v8075_v21 = vld [vmem:[#allocation3 + $0x1d0] ss:$36 sps:$4 sm:$0xff]   ;;  %v3796_v10 = vld [vmem:[#allocation2 + $0xbc] sm:$0x1]  ;;  %v7385_v60 = vadd.f32 %v7384_v44, %v7383_v2  ;;  %v7268_v49 = vpop.f32.mrf.mxu1 }
 0x2e8   : > { %v3938_v45 = vsel %vm8447_vm14, %v6915_v34, %v3937_v28  ;;  %v3939_v24 = vrot.slane %v3937_v28, 4  ;;  %v3947_v42 = vrot.slane %v3796_v10, 5  ;;  %v3797_v20 = vld [vmem:[#allocation2 + $0xc0] sm:$0xe]  ;;  %v3798_v61 = vld [vmem:[#allocation2 + $0xc4] sm:$0xf]  ;;  %v5608_v39 = vadd.f32 %v10039_v37, %v7267_v4  ;;  %v7386_v46 = vpop.f32.mrf.mxu0 }
 0x2e9   : > { %7727 = vmatmul.mubr.bf16.vlgmr.msra.gmra.mxu0 %v8071_v43  ;;  %4019 = vst [vmem:[#allocation3 + $0x380] sm:$0xf] %v3938_v45  ;;  %v3799_v9 = vld [vmem:[#allocation2 + $0xc8] sm:$0x1]  ;;  %v6917_v38 = vrot.slane %v3797_v20, 9  ;;  %v3960_v32 = vrot.slane %v3958_v30, 4  ;;  %v7269_v63 = vpop.f32.mrf.mxu1 }
 0x2ea   : > { %v3941_v14 = vsel %vm8447_vm14, %v3939_v24, %v3940_v51  ;;  %v3948_v56 = vsel %vm8447_vm14, %v3946_v29, %v3947_v42  ;;  %v3951_v12 = vrot.slane %v3798_v61, 5  ;;  %v3800_v41 = vld [vmem:[#allocation2 + $0xcc] sm:$0xe]  ;;  %v3802_v22 = vld [vmem:[#allocation2 + $0xd4] sm:$0x1]  ;;  %v3954_v1 = vrot.slane %v3799_v9, 5  ;;  %v7387_v33 = vpop.f32.mrf.mxu0 }
 0x2eb   : > { %7735 = vmatmul.mubr.bf16.gmra.mxu1 %v8074_v47  ;;  %4020 = vst [vmem:[#allocation3 + $0x3a4] sm:$0xf] %v3941_v14  ;;  %4022 = vst [vmem:[#allocation3 + $0x3ec] sm:$0xf] %v3948_v56  ;;  %v6918_v13 = vrot.slane %v3800_v41, 9  ;;  %v3961_v43 = vrot.slane %v3802_v22, 5  ;;  %v10168_v31 = vadd.f32 %v10138_v40, %v5608_v39  ;;  %v7270_v7 = vadd.f32 %v7269_v63, %v7268_v49  ;;  %v7271_v6 = vpop.f32.mrf.mxu1 }
 0x2ec   : > { %7738 = vmatprep.mubr.bf16.mxu1 %v8075_v21  ;;  %v3952_v59 = vsel %vm8447_vm14, %v6917_v38, %v3951_v12  ;;  %v3953_v0 = vrot.slane %v3951_v12, 4  ;;  %v7388_v29 = vadd.f32 %v7387_v33, %v7386_v46  ;;  %v7389_v34 = vpop.f32.mrf.mxu0  ;;  %v8076_v2 = vld [vmem:[#allocation3 + $0x218] ss:$36 sps:$4 sm:$0xff]   ;;  %v8077_v51 = vld [vmem:[#allocation3 + $0x260] ss:$36 sps:$4 sm:$0xff]  }
 0x2ed   : > { %4023 = vst [vmem:[#allocation3 + $0x410] sm:$0xf] %v3952_v59  ;;  %v3959_v58 = vsel %vm8447_vm14, %v6918_v13, %v3958_v30  ;;  %v3962_v15 = vsel %vm8447_vm14, %v3960_v32, %v3961_v43  ;;  %v5613_v40 = vadd.f32 %v10039_v37, %v7270_v7  ;;  %v7272_v47 = vpop.f32.mrf.mxu1  ;;  %v8078_v32 = vld [vmem:[#allocation3 + $0x2a8] ss:$36 sps:$4 sm:$0xff]   ;;  %v8080_v7 = vld [vmem:[#allocation3 + $0x338] ss:$36 sps:$4 sm:$0xff]  }
 0x2ee   : > { %v3955_v11 = vsel %vm8447_vm14, %v3953_v0, %v3954_v1  ;;  %4025 = vst [vmem:[#allocation3 + $0x458] sm:$0xf] %v3959_v58  ;;  %4026 = vst [vmem:[#allocation3 + $0x47c] sm:$0xf] %v3962_v15  ;;  %v7390_v28 = vpop.f32.mrf.mxu0  ;;  %v7273_v53 = vadd.f32 %v7272_v47, %v7271_v6  ;;  %v8079_v39 = vld [vmem:[#allocation3 + $0x2f0] ss:$36 sps:$4 sm:$0xff]  }
 0x2ef   : > { %4024 = vst [vmem:[#allocation3 + $0x434] sm:$0xf] %v3955_v11  ;;  %v7391_v18 = vadd.f32 %v7390_v28, %v7389_v34  ;;  %v10180_v30 = vadd.f32 %v10145_v50, %v5613_v40  ;;  %v7274_v21 = vpop.f32.mrf.mxu1 }
 0x2f0   : > { %v5616_v10 = vadd.f32 %v10039_v37, %v7273_v53  ;;  %v7392_v27 = vpop.f32.mrf.mxu0 }
 0x2f1   : > { %v7275_v4 = vpop.f32.mrf.mxu1 }
 0x2f2   : > { %v7276_v44 = vadd.f32 %v7275_v4, %v7274_v21  ;;  %v7393_v45 = vpop.f32.mrf.mxu0  ;;  %v10183_v24 = vadd.f32 %v7385_v60, %v5616_v10  ;;  %v8081_v58 = vld [vmem:[#allocation3 + $0x380] ss:$36 sps:$4 sm:$0xff]  }
 0x2f3   : > { %7739 = vmatmul.mubr.bf16.gmra.mxu1 %v8076_v2  ;;  %v7277_v42 = vpop.f32.mrf.mxu1  ;;  %v7394_v20 = vadd.f32 %v7393_v45, %v7392_v27 }
 0x2f4   : > { %7742 = vmatprep.mubr.bf16.mxu1 %v8077_v51  ;;  %v5621_v61 = vadd.f32 %v10039_v37, %v7276_v44  ;;  %v7395_v9 = vpop.f32.mrf.mxu0  ;;  %v8082_v44 = vld [vmem:[#allocation3 + $0x3c8] ss:$36 sps:$4 sm:$0xff]  }
 0x2f5   : > { %v7278_v38 = vpop.f32.mrf.mxu1 }
 0x2f6   : > { %v7279_v50 = vadd.f32 %v7278_v38, %v7277_v42  ;;  %v7396_v49 = vpop.f32.mrf.mxu0  ;;  %v10186_v46 = vadd.f32 %v7388_v29, %v5621_v61  ;;  %v8083_v42 = vld [vmem:[#allocation3 + $0x410] ss:$36 sps:$4 sm:$0xff]  }
 0x2f7   : > { %v7280_v14 = vpop.f32.mrf.mxu1  ;;  %v7397_v56 = vadd.f32 %v7396_v49, %v7395_v9 }
 0x2f8   : > { %v5624_v12 = vadd.f32 %v10039_v37, %v7279_v50  ;;  %v7398_v60 = vpop.f32.mrf.mxu0 }
 0x2f9   : > { %v7281_v41 = vpop.f32.mrf.mxu1 }
 0x2fa   : > { %v7282_v22 = vadd.f32 %v7281_v41, %v7280_v14  ;;  %v7399_v1 = vpop.f32.mrf.mxu0  ;;  %v10189_v13 = vadd.f32 %v7391_v18, %v5624_v12  ;;  %v8084_v41 = vld [vmem:[#allocation3 + $0x458] ss:$36 sps:$4 sm:$0xff]  }
 0x2fb   : > { %7743 = vmatmul.mubr.bf16.gmra.mxu1 %v8078_v32  ;;  %v7283_v43 = vpop.f32.mrf.mxu1  ;;  %v7400_v63 = vadd.f32 %v7399_v1, %v7398_v60 }
 0x2fc   : > { %7746 = vmatprep.mubr.bf16.mxu1 %v8079_v39  ;;  %v5629_v33 = vadd.f32 %v10039_v37, %v7282_v22  ;;  %v7401_v59 = vpop.f32.mrf.mxu0 }
 0x2fd   : > { %v7284_v0 = vpop.f32.mrf.mxu1 }
 0x2fe   : > { %v7285_v29 = vadd.f32 %v7284_v0, %v7283_v43  ;;  %v7402_v15 = vpop.f32.mrf.mxu0  ;;  %v10192_v6 = vadd.f32 %v7394_v20, %v5629_v33 }
 0x2ff   : > { %v7286_v34 = vpop.f32.mrf.mxu1  ;;  %v7403_v11 = vadd.f32 %v7402_v15, %v7401_v59 }
 0x300   : > { %v5632_v40 = vadd.f32 %v10039_v37, %v7285_v29  ;;  %v7404_v47 = vpop.f32.mrf.mxu0 }
 0x301   : > { %v7287_v2 = vpop.f32.mrf.mxu1 }
 0x302   : > { %v7288_v28 = vadd.f32 %v7287_v2, %v7286_v34  ;;  %v7405_v53 = vpop.f32.mrf.mxu0  ;;  %v10195_v51 = vadd.f32 %v7397_v56, %v5632_v40 }
 0x303   : > { %7747 = vmatmul.mubr.bf16.gmra.mxu1 %v8080_v7  ;;  %v7289_v18 = vpop.f32.mrf.mxu1  ;;  %v7406_v21 = vadd.f32 %v7405_v53, %v7404_v47 }
 0x304   : > { %7750 = vmatprep.mubr.bf16.mxu1 %v8081_v58  ;;  %v5637_v10 = vadd.f32 %v10039_v37, %v7288_v28  ;;  %v7407_v27 = vpop.f32.mrf.mxu0 }
 0x305   : > { %v7290_v4 = vpop.f32.mrf.mxu1 }
 0x306   : > { %v7291_v45 = vadd.f32 %v7290_v4, %v7289_v18  ;;  %v7408_v20 = vpop.f32.mrf.mxu0  ;;  %v10198_v61 = vadd.f32 %v7400_v63, %v5637_v10 }
 0x307   : > { %v7292_v9 = vpop.f32.mrf.mxu1  ;;  %v7409_v38 = vadd.f32 %v7408_v20, %v7407_v27 }
 0x308   : > { %v5640_v32 = vadd.f32 %v10039_v37, %v7291_v45  ;;  %v7410_v50 = vpop.f32.mrf.mxu0 }
 0x309   : > { %v7293_v39 = vpop.f32.mrf.mxu1 }
 0x30a   : > { %v7294_v49 = vadd.f32 %v7293_v39, %v7292_v9  ;;  %v7411_v14 = vpop.f32.mrf.mxu0  ;;  %v10201_v56 = vadd.f32 %v7403_v11, %v5640_v32 }
 0x30b   : > { %7751 = vmatmul.mubr.bf16.gmra.mxu1 %v8082_v44  ;;  %v7295_v12 = vpop.f32.mrf.mxu1  ;;  %v7412_v60 = vadd.f32 %v7411_v14, %v7410_v50 }
 0x30c   : > { %7754 = vmatprep.mubr.bf16.mxu1 %v8083_v42  ;;  %v5645_v22 = vadd.f32 %v10039_v37, %v7294_v49  ;;  %v7413_v1 = vpop.f32.mrf.mxu0 }
 0x30d   : > { %v7296_v43 = vpop.f32.mrf.mxu1 }
 0x30e   : > { %v7297_v63 = vadd.f32 %v7296_v43, %v7295_v12  ;;  %v7414_v33 = vpop.f32.mrf.mxu0  ;;  %v10204_v59 = vadd.f32 %v7406_v21, %v5645_v22 }
 0x30f   : > { %v7298_v0 = vpop.f32.mrf.mxu1  ;;  %v7415_v7 = vadd.f32 %v7414_v33, %v7413_v1 }
 0x310   : > { %v5648_v29 = vadd.f32 %v10039_v37, %v7297_v63  ;;  %v7416_v58 = vpop.f32.mrf.mxu0 }
 0x311   : > { %v7299_v15 = vpop.f32.mrf.mxu1 }
 0x312   : > { %v7300_v34 = vadd.f32 %v7299_v15, %v7298_v0  ;;  %v7417_v11 = vpop.f32.mrf.mxu0  ;;  %v10207_v40 = vadd.f32 %v7409_v38, %v5648_v29 }
 0x313   : > { %7755 = vmatmul.mubr.bf16.gmra.mxu1 %v8084_v41  ;;  %v7301_v47 = vpop.f32.mrf.mxu1  ;;  %v7418_v2 = vadd.f32 %v7417_v11, %v7416_v58 }
 0x314   : > { %v5653_v28 = vadd.f32 %v10039_v37, %v7300_v34  ;;  %v7419_v53 = vpop.f32.mrf.mxu0 }
 0x315   : > { %v7302_v18 = vpop.f32.mrf.mxu1 }
 0x316   : > { %v7303_v10 = vadd.f32 %v7302_v18, %v7301_v47  ;;  %v7420_v21 = vpop.f32.mrf.mxu0  ;;  %v10210_v27 = vadd.f32 %v7412_v60, %v5653_v28 }
 0x317   : > { %v7304_v4 = vpop.f32.mrf.mxu1  ;;  %v7421_v44 = vadd.f32 %v7420_v21, %v7419_v53 }
 0x318   : > { %v5656_v45 = vadd.f32 %v10039_v37, %v7303_v10  ;;  %v7550_v42 = vpop.f32.mrf.mxu0 }
 0x319   : > { %v7305_v20 = vpop.f32.mrf.mxu1 }
 0x31a   : > { %v7306_v9 = vadd.f32 %v7305_v20, %v7304_v4  ;;  %v7551_v32 = vpop.f32.mrf.mxu0  ;;  %v10213_v38 = vadd.f32 %v7415_v7, %v5656_v45 }
 0x31b   : > { %v7307_v50 = vpop.f32.mrf.mxu1  ;;  %v7552_v39 = vadd.f32 %v7551_v32, %v7550_v42 }
 0x31c   : > { %v5661_v49 = vadd.f32 %v10039_v37, %v7306_v9  ;;  %v7553_v14 = vpop.f32.mrf.mxu0 }
 0x31d   : > { %v7308_v12 = vpop.f32.mrf.mxu1 }
 0x31e   : > { %v7309_v41 = vadd.f32 %v7308_v12, %v7307_v50  ;;  %v7554_v22 = vpop.f32.mrf.mxu0  ;;  %v10217_v63 = vadd.f32 %v7418_v2, %v5661_v49 }
 0x31f   : > { %v7438_v60 = vpop.f32.mrf.mxu1  ;;  %v7555_v1 = vadd.f32 %v7554_v22, %v7553_v14 }
 0x320   : > { %v5664_v43 = vadd.f32 %v10039_v37, %v7309_v41  ;;  %v7556_v0 = vpop.f32.mrf.mxu0 }
 0x321   : > { %v7439_v33 = vpop.f32.mrf.mxu1 }
 0x322   : > { %v7440_v29 = vadd.f32 %v7439_v33, %v7438_v60  ;;  %v7557_v7 = vpop.f32.mrf.mxu0  ;;  %v10220_v11 = vadd.f32 %v7421_v44, %v5664_v43 }
 0x323   : > { %v7441_v58 = vpop.f32.mrf.mxu1  ;;  %v7558_v34 = vadd.f32 %v7557_v7, %v7556_v0 }
 0x324   : > { %v5863_v15 = vadd.f32 %v7440_v29, %v10010_v8  ;;  %v7559_v28 = vpop.f32.mrf.mxu0 }
 0x325   : > { %v7442_v47 = vpop.f32.mrf.mxu1 }
 0x326   : > { %v7443_v53 = vadd.f32 %v7442_v47, %v7441_v58  ;;  %v7560_v10 = vpop.f32.mrf.mxu0  ;;  %v10223_v2 = vadd.f32 %v7552_v39, %v5863_v15 }
 0x327   : > { %v7444_v18 = vpop.f32.mrf.mxu1  ;;  %v7561_v37 = vadd.f32 %v7560_v10, %v7559_v28 }
 0x328   : > { %v5866_v21 = vadd.f32 %v7443_v53, %v10024_v26  ;;  %v7562_v45 = vpop.f32.mrf.mxu0 }
 0x329   : > { %v7445_v4 = vpop.f32.mrf.mxu1 }
 0x32a   : > { %v7446_v42 = vadd.f32 %v7445_v4, %v7444_v18  ;;  %v7563_v9 = vpop.f32.mrf.mxu0  ;;  %v10226_v44 = vadd.f32 %v7555_v1, %v5866_v21 }
 0x32b   : > { %v7447_v20 = vpop.f32.mrf.mxu1  ;;  %v7564_v32 = vadd.f32 %v7563_v9, %v7562_v45 }
 0x32c   : > { %v5871_v8 = vadd.f32 %v7446_v42, %v10034_v19  ;;  %v7565_v49 = vpop.f32.mrf.mxu0 }
 0x32d   : > { %v7448_v50 = vpop.f32.mrf.mxu1 }
 0x32e   : > { %v7449_v14 = vadd.f32 %v7448_v50, %v7447_v20  ;;  %v10228_v12 = vadd.f32 %v7558_v34, %v5871_v8  ;;  %v7566_v26 = vpop.f32.mrf.mxu0 }
 0x32f   : > { %v7450_v41 = vpop.f32.mrf.mxu1  ;;  %v7567_v22 = vadd.f32 %v7566_v26, %v7565_v49 }
 0x330   : > { %v5874_v39 = vadd.f32 %v7449_v14, %v10070_v5  ;;  %v7568_v43 = vpop.f32.mrf.mxu0 }
 0x331   : > { %v7451_v60 = vpop.f32.mrf.mxu1 }
 0x332   : > { %v7452_v33 = vadd.f32 %v7451_v60, %v7450_v41  ;;  %v10231_v0 = vadd.f32 %v7561_v37, %v5874_v39  ;;  %v7569_v19 = vpop.f32.mrf.mxu0 }
 0x333   : > { %v7453_v29 = vpop.f32.mrf.mxu1  ;;  %v7570_v58 = vadd.f32 %v7569_v19, %v7568_v43 }
 0x334   : > { %v5879_v1 = vadd.f32 %v7452_v33, %v10074_v23  ;;  %v7571_v15 = vpop.f32.mrf.mxu0 }
 0x335   : > { %v7454_v7 = vpop.f32.mrf.mxu1 }
 0x336   : > { %v7455_v47 = vadd.f32 %v7454_v7, %v7453_v29  ;;  %v10234_v34 = vadd.f32 %v7564_v32, %v5879_v1  ;;  %v7572_v53 = vpop.f32.mrf.mxu0 }
 0x337   : > { %v7456_v28 = vpop.f32.mrf.mxu1  ;;  %v7573_v18 = vadd.f32 %v7572_v53, %v7571_v15 }
 0x338   : > { %v5882_v5 = vadd.f32 %v7455_v47, %v10080_v36  ;;  %v7574_v21 = vpop.f32.mrf.mxu0 }
 0x339   : > { %v7457_v10 = vpop.f32.mrf.mxu1 }
 0x33a   : > { %v7458_v4 = vadd.f32 %v7457_v10, %v7456_v28  ;;  %v10237_v37 = vadd.f32 %v7567_v22, %v5882_v5  ;;  %v7575_v42 = vpop.f32.mrf.mxu0 }
 0x33b   : > { %v7459_v45 = vpop.f32.mrf.mxu1  ;;  %v7576_v20 = vadd.f32 %v7575_v42, %v7574_v21 }
 0x33c   : > { %v5887_v23 = vadd.f32 %v7458_v4, %v10084_v35  ;;  %v7577_v8 = vpop.f32.mrf.mxu0 }
 0x33d   : > { %v7460_v9 = vpop.f32.mrf.mxu1 }
 0x33e   : > { %v7461_v50 = vadd.f32 %v7460_v9, %v7459_v45  ;;  %v10240_v32 = vadd.f32 %v7570_v58, %v5887_v23  ;;  %v7578_v14 = vpop.f32.mrf.mxu0 }
 0x33f   : > { %v7462_v49 = vpop.f32.mrf.mxu1  ;;  %v7579_v41 = vadd.f32 %v7578_v14, %v7577_v8 }
 0x340   : > { %v5890_v36 = vadd.f32 %v7461_v50, %v10088_v3  ;;  %v7580_v39 = vpop.f32.mrf.mxu0 }
 0x341   : > { %v7463_v26 = vpop.f32.mrf.mxu1 }
 0x342   : > { %v7464_v60 = vadd.f32 %v7463_v26, %v7462_v49  ;;  %v10243_v22 = vadd.f32 %v7573_v18, %v5890_v36  ;;  %v7581_v33 = vpop.f32.mrf.mxu0 }
 0x343   : > { %v7465_v43 = vpop.f32.mrf.mxu1  ;;  %v7582_v29 = vadd.f32 %v7581_v33, %v7580_v39 }
 0x344   : > { %v5895_v35 = vadd.f32 %v7464_v60, %v10092_v57  ;;  %v7583_v1 = vpop.f32.mrf.mxu0 }
 0x345   : > { %v7466_v19 = vpop.f32.mrf.mxu1 }
 0x346   : > { %v7467_v7 = vadd.f32 %v7466_v19, %v7465_v43  ;;  %v10246_v58 = vadd.f32 %v7576_v20, %v5895_v35  ;;  %v7584_v47 = vpop.f32.mrf.mxu0 }
 0x347   : > { %v7468_v15 = vpop.f32.mrf.mxu1  ;;  %v7585_v28 = vadd.f32 %v7584_v47, %v7583_v1 }
 0x348   : > { %v5898_v3 = vadd.f32 %v7467_v7, %v10102_v55  ;;  %v7586_v5 = vpop.f32.mrf.mxu0 }
 0x349   : > { %v7469_v53 = vpop.f32.mrf.mxu1 }
 0x34a   : > { %v7470_v10 = vadd.f32 %v7469_v53, %v7468_v15  ;;  %v10249_v18 = vadd.f32 %v7579_v41, %v5898_v3  ;;  %v7587_v4 = vpop.f32.mrf.mxu0 }
 0x34b   : > { %v7471_v21 = vpop.f32.mrf.mxu1  ;;  %v7588_v45 = vadd.f32 %v7587_v4, %v7586_v5 }
 0x34c   : > { %v5903_v57 = vadd.f32 %v7470_v10, %v10106_v54  ;;  %v7589_v23 = vpop.f32.mrf.mxu0 }
 0x34d   : > { %v7472_v42 = vpop.f32.mrf.mxu1 }
 0x34e   : > { %v7473_v9 = vadd.f32 %v7472_v42, %v7471_v21  ;;  %v10252_v20 = vadd.f32 %v7582_v29, %v5903_v57  ;;  %v7590_v50 = vpop.f32.mrf.mxu0 }
 0x34f   : > { %v7474_v8 = vpop.f32.mrf.mxu1  ;;  %v7591_v49 = vadd.f32 %v7590_v50, %v7589_v23 }
 0x350   : > { %v5906_v55 = vadd.f32 %v7473_v9, %v10110_v16  ;;  %v7592_v36 = vpop.f32.mrf.mxu0 }
 0x351   : > { %v7475_v14 = vpop.f32.mrf.mxu1 }
 0x352   : > { %v7476_v26 = vadd.f32 %v7475_v14, %v7474_v8  ;;  %v10255_v41 = vadd.f32 %v7585_v28, %v5906_v55  ;;  %v7593_v60 = vpop.f32.mrf.mxu0 }
 0x353   : > { %v7477_v39 = vpop.f32.mrf.mxu1  ;;  %v7594_v43 = vadd.f32 %v7593_v60, %v7592_v36 }
 0x354   : > { %v5911_v54 = vadd.f32 %v7476_v26, %v10114_v25  ;;  %v7595_v35 = vpop.f32.mrf.mxu0 }
 0x355   : > { %v7478_v33 = vpop.f32.mrf.mxu1 }
 0x356   : > { %v7479_v19 = vadd.f32 %v7478_v33, %v7477_v39  ;;  %v10258_v29 = vadd.f32 %v7588_v45, %v5911_v54  ;;  %v7596_v7 = vpop.f32.mrf.mxu0 }
 0x357   : > { %v7480_v1 = vpop.f32.mrf.mxu1  ;;  %v7597_v15 = vadd.f32 %v7596_v7, %v7595_v35 }
 0x358   : > { %v5914_v16 = vadd.f32 %v7479_v19, %v10124_v62  ;;  %v7598_v3 = vpop.f32.mrf.mxu0 }
 0x359   : > { %v7481_v47 = vpop.f32.mrf.mxu1 }
 0x35a   : > { %v7482_v53 = vadd.f32 %v7481_v47, %v7480_v1  ;;  %v10261_v28 = vadd.f32 %v7591_v49, %v5914_v16  ;;  %v7599_v10 = vpop.f32.mrf.mxu0 }
 0x35b   : > { %v7483_v5 = vpop.f32.mrf.mxu1  ;;  %v7600_v21 = vadd.f32 %v7599_v10, %v7598_v3 }
 0x35c   : > { %v5919_v25 = vadd.f32 %v7482_v53, %v10131_v52  ;;  %v7601_v57 = vpop.f32.mrf.mxu0 }
 0x35d   : > { %v7484_v4 = vpop.f32.mrf.mxu1 }
 0x35e   : > { %v7485_v42 = vadd.f32 %v7484_v4, %v7483_v5  ;;  %v10264_v45 = vadd.f32 %v7594_v43, %v5919_v25  ;;  %v7602_v9 = vpop.f32.mrf.mxu0 }
 0x35f   : > { %v7486_v23 = vpop.f32.mrf.mxu1  ;;  %v7603_v8 = vadd.f32 %v7602_v9, %v7601_v57 }
 0x360   : > { %v5922_v62 = vadd.f32 %v7485_v42, %v10136_v17  ;;  %v7604_v55 = vpop.f32.mrf.mxu0 }
 0x361   : > { %v7487_v50 = vpop.f32.mrf.mxu1 }
 0x362   : > { %v7488_v14 = vadd.f32 %v7487_v50, %v7486_v23  ;;  %v10267_v49 = vadd.f32 %v7597_v15, %v5922_v62  ;;  %v7605_v26 = vpop.f32.mrf.mxu0 }
 0x363   : > { %v7489_v36 = vpop.f32.mrf.mxu1  ;;  %v7606_v39 = vadd.f32 %v7605_v26, %v7604_v55 }
 0x364   : > { %v5927_v52 = vadd.f32 %v7488_v14, %v10158_v48  ;;  %v7607_v54 = vpop.f32.mrf.mxu0 }
 0x365   : > { %v7490_v60 = vpop.f32.mrf.mxu1 }
 0x366   : > { %v7491_v33 = vadd.f32 %v7490_v60, %v7489_v36  ;;  %v10270_v43 = vadd.f32 %v7600_v21, %v5927_v52  ;;  %v7608_v19 = vpop.f32.mrf.mxu0 }
 0x367   : > { %v7492_v35 = vpop.f32.mrf.mxu1  ;;  %v7609_v1 = vadd.f32 %v7608_v19, %v7607_v54 }
 0x368   : > { %v5930_v17 = vadd.f32 %v7491_v33, %v10168_v31  ;;  %v7610_v16 = vpop.f32.mrf.mxu0 }
 0x369   : > { %v7493_v7 = vpop.f32.mrf.mxu1 }
 0x36a   : > { %v7494_v47 = vadd.f32 %v7493_v7, %v7492_v35  ;;  %v10273_v15 = vadd.f32 %v7603_v8, %v5930_v17  ;;  %v7611_v53 = vpop.f32.mrf.mxu0 }
 0x36b   : > { %v7495_v3 = vpop.f32.mrf.mxu1  ;;  %v7612_v5 = vadd.f32 %v7611_v53, %v7610_v16 }
 0x36c   : > { %v5935_v48 = vadd.f32 %v7494_v47, %v10180_v30  ;;  %v7613_v25 = vpop.f32.mrf.mxu0 }
 0x36d   : > { %v7496_v10 = vpop.f32.mrf.mxu1 }
 0x36e   : > { %v7497_v4 = vadd.f32 %v7496_v10, %v7495_v3  ;;  %v10276_v21 = vadd.f32 %v7606_v39, %v5935_v48  ;;  %v7614_v42 = vpop.f32.mrf.mxu0 }
 0x36f   : > { %v7498_v57 = vpop.f32.mrf.mxu1  ;;  %v7615_v23 = vadd.f32 %v7614_v42, %v7613_v25 }
 0x370   : > { %v5938_v31 = vadd.f32 %v7497_v4, %v10183_v24  ;;  %v7616_v62 = vpop.f32.mrf.mxu0 }
 0x371   : > { %v7499_v9 = vpop.f32.mrf.mxu1 }
 0x372   : > { %v7500_v50 = vadd.f32 %v7499_v9, %v7498_v57  ;;  %v10279_v8 = vadd.f32 %v7609_v1, %v5938_v31  ;;  %v7617_v14 = vpop.f32.mrf.mxu0 }
 0x373   : > { %v7501_v55 = vpop.f32.mrf.mxu1  ;;  %v7618_v36 = vadd.f32 %v7617_v14, %v7616_v62 }
 0x374   : > { %v5943_v30 = vadd.f32 %v7500_v50, %v10186_v46  ;;  %v7619_v52 = vpop.f32.mrf.mxu0 }
 0x375   : > { %v7502_v26 = vpop.f32.mrf.mxu1 }
 0x376   : > { %v7503_v60 = vadd.f32 %v7502_v26, %v7501_v55  ;;  %v10282_v39 = vadd.f32 %v7612_v5, %v5943_v30  ;;  %v7620_v33 = vpop.f32.mrf.mxu0 }
 0x377   : > { %v7504_v54 = vpop.f32.mrf.mxu1  ;;  %v7621_v35 = vadd.f32 %v7620_v33, %v7619_v52 }
 0x378   : > { %v5946_v24 = vadd.f32 %v7503_v60, %v10189_v13  ;;  %v7622_v7 = vpop.f32.mrf.mxu0 }
 0x379   : > { %v7505_v19 = vpop.f32.mrf.mxu1 }
 0x37a   : > { %v7506_v17 = vadd.f32 %v7505_v19, %v7504_v54  ;;  %v10285_v1 = vadd.f32 %v7615_v23, %v5946_v24  ;;  %v7623_v46 = vpop.f32.mrf.mxu0 }
 0x37b   : > { %v7507_v16 = vpop.f32.mrf.mxu1  ;;  %v7624_v53 = vadd.f32 %v7623_v46, %v7622_v7 }
 0x37c   : > { %v5951_v47 = vadd.f32 %v7506_v17, %v10192_v6  ;;  %v7625_v10 = vpop.f32.mrf.mxu0 }
 0x37d   : > { %v7508_v3 = vpop.f32.mrf.mxu1 }
 0x37e   : > { %v7509_v48 = vadd.f32 %v7508_v3, %v7507_v16  ;;  %v10288_v5 = vadd.f32 %v7618_v36, %v5951_v47  ;;  %v7626_v13 = vpop.f32.mrf.mxu0 }
 0x37f   : > { %v7510_v25 = vpop.f32.mrf.mxu1  ;;  %v7627_v42 = vadd.f32 %v7626_v13, %v7625_v10 }
 0x380   : > { %v5954_v4 = vadd.f32 %v7509_v48, %v10195_v51 }
 0x381   : > { %v7511_v57 = vpop.f32.mrf.mxu1 }
 0x382   : > { %v7512_v31 = vadd.f32 %v7511_v57, %v7510_v25  ;;  %v7628_v9 = vpop.f32.mrf.mxu0  ;;  %v10291_v23 = vadd.f32 %v7621_v35, %v5954_v4 }
 0x383   : > { %v7513_v62 = vpop.f32.mrf.mxu1 }
 0x384   : > { %v5959_v6 = vadd.f32 %v7512_v31, %v10198_v61  ;;  %v7629_v50 = vpop.f32.mrf.mxu0 }
 0x385   : > { %v7514_v55 = vpop.f32.mrf.mxu1  ;;  %v7630_v14 = vadd.f32 %v7629_v50, %v7628_v9 }
 0x386   : > { %v7515_v30 = vadd.f32 %v7514_v55, %v7513_v62  ;;  %v7631_v26 = vpop.f32.mrf.mxu0  ;;  %v10294_v36 = vadd.f32 %v7624_v53, %v5959_v6 }
 0x388   : > { %v7516_v52 = vpop.f32.mrf.mxu1  ;;  %v5962_v51 = vadd.f32 %v7515_v30, %v10201_v56  ;;  %v7632_v60 = vpop.f32.mrf.mxu0 }
 0x389   : > { %v7633_v53 = vadd.f32 %v7632_v60, %v7631_v26 }
 0x38a   : > { %v7517_v54 = vpop.f32.mrf.mxu1  ;;  %v10297_v24 = vadd.f32 %v7627_v42, %v5962_v51 }
 0x38b   : > { %v7518_v33 = vadd.f32 %v7517_v54, %v7516_v52 }
 0x38c   : > { %v7519_v35 = vpop.f32.mrf.mxu1 }
 0x38d   : > { %v5967_v19 = vadd.f32 %v7518_v33, %v10204_v59 }
 0x38e   : > { %v7634_v17 = vpop.f32.mrf.mxu0  ;;  %v7520_v61 = vpop.f32.mrf.mxu1 }
 0x38f   : > { %v7521_v7 = vadd.f32 %v7520_v61, %v7519_v35  ;;  %v10300_v47 = vadd.f32 %v7630_v14, %v5967_v19 }
 0x390   : > { %v7635_v16 = vpop.f32.mrf.mxu0 }
 0x391   : > { %v7522_v46 = vpop.f32.mrf.mxu1  ;;  %v7636_v3 = vadd.f32 %v7635_v16, %v7634_v17  ;;  %v5970_v48 = vadd.f32 %v7521_v7, %v10207_v40 }
 0x392   : > { %v7637_v10 = vpop.f32.mrf.mxu0 }
 0x393   : > { %v7523_v56 = vpop.f32.mrf.mxu1  ;;  %v10303_v4 = vadd.f32 %v7633_v53, %v5970_v48 }
 0x394   : > { %v7524_v25 = vadd.f32 %v7523_v56, %v7522_v46  ;;  %v7638_v59 = vpop.f32.mrf.mxu0 }
 0x395   : > { %v7525_v13 = vpop.f32.mrf.mxu1  ;;  %v7639_v6 = vadd.f32 %v7638_v59, %v7637_v10 }
 0x396   : > { %v5975_v57 = vadd.f32 %v7524_v25, %v10210_v27 }
 0x397   : > { %v7526_v42 = vpop.f32.mrf.mxu1 }
 0x398   : > { %v7527_v31 = vadd.f32 %v7526_v42, %v7525_v13  ;;  %v10306_v9 = vadd.f32 %v7636_v3, %v5975_v57 }
 0x39a   : > { %v5978_v50 = vadd.f32 %v7527_v31, %v10213_v38 }
 0x39b   : > { %v7528_v62 = vpop.f32.mrf.mxu1 }
 0x39c   : > { %v10309_v40 = vadd.f32 %v7639_v6, %v5978_v50 }
 0x39d   : > { %v7529_v55 = vpop.f32.mrf.mxu1 }
 0x39e   : > { %v7530_v14 = vadd.f32 %v7529_v55, %v7528_v62 }
 0x39f   : > { %v10311_v30 = vpop.f32.mrf.mxu1 }
 0x3a0   : > { %v5983_v27 = vadd.f32 %v7530_v14, %v10217_v63 }
 0x3a1   : > { %v7640_v26 = vpop.f32.mrf.mxu0  ;;  %v10313_v52 = vpop.f32.mrf.mxu1 }
 0x3a3   : > { %v7641_v51 = vpop.f32.mrf.mxu0  ;;  %v7732_v60 = vpop.f32.mrf.mxu1 }
 0x3a4   : > { %v7642_v54 = vadd.f32 %v7641_v51, %v7640_v26 }
 0x3a5   : > { %v10316_v33 = vpop.f32.mrf.mxu0  ;;  %v6200_v35 = vpop.f32.mrf.mxu1 }
 0x3a6   : > { %v10318_v19 = vadd.f32 %v7642_v54, %v5983_v27 }
 0x3a7   : > { %v10320_v38 = vpop.f32.mrf.mxu0  ;;  %v7733_v17 = vpop.f32.mrf.mxu1 }
 0x3a8   : > { %v10341_v25 = vadd.f32 %v7733_v17, %v10243_v22 }
 0x3a9   : > { %v7728_v61 = vpop.f32.mrf.mxu0  ;;  %v6203_v7 = vpop.f32.mrf.mxu1 }
 0x3aa   : > { %v10323_v16 = vadd.f32 %v7728_v61, %v10228_v12  ;;  %v10336_v12 = vadd.f32 %v7732_v60, %v10240_v32  ;;  %v10351_v59 = vadd.f32 %v6203_v7, %v10237_v37 }
 0x3ab   : > { %v6184_v46 = vpop.f32.mrf.mxu0  ;;  %v7736_v3 = vpop.f32.mrf.mxu1 }
 0x3ac   : > { %v10326_v63 = vadd.f32 %v6184_v46, %v10223_v2  ;;  %6521 = vrot.lane.b32.xlu1 %v10323_v16, %s8136_s11  ;;  %v10366_v37 = vadd.f32 %v7736_v3, %v10252_v20 }
 0x3ad   : > { %v7729_v53 = vpop.f32.mrf.mxu0  ;;  %v6216_v48 = vpop.f32.mrf.mxu1 }
 0x3ae   : > { %v10331_v56 = vadd.f32 %v7729_v53, %v10231_v0  ;;  %6517 = vrot.lane.b32.xlu0 %v10326_v63, %s8136_s11  ;;  %v10346_v0 = vadd.f32 %v6200_v35, %v10234_v34 }
 0x3af   : > { %v7737_v10 = vpop.f32.mrf.mxu1  ;;  %v6187_v57 = vpop.f32.mrf.mxu0 }
 0x3b0   : > { %6523 = vrot.lane.b32.xlu1 %v10331_v56, %s8136_s11  ;;  %v10356_v42 = vadd.f32 %v6187_v57, %v10226_v44  ;;  %v10361_v31 = vadd.f32 %v7737_v10, %v10255_v41  ;;  %v10376_v41 = vadd.f32 %v6216_v48, %v10246_v58  ;;  %v6314_v10 = vld [vmem:[%s10490_s15 + $0x18] sm:$0xff]  ;;  %v6423_v57 = vadd.f32 1.0, %v10323_v16 }
 0x3b1   : > { %v6219_v2 = vpop.f32.mrf.mxu1 }
 0x3b2   : > { %6529 = vrot.lane.b32.xlu0 %v10336_v12, %s8136_s11  ;;  %v10371_v44 = vadd.f32 %v6219_v2, %v10249_v18 }
 0x3b3   : > { %v7740_v13 = vpop.f32.mrf.mxu1 }
 0x3b4   : > { %6531 = vrot.lane.b32.xlu1 %v10341_v25, %s8136_s11  ;;  %v10386_v18 = vadd.f32 %v7740_v13, %v10264_v45  ;;  %v6317_v13 = vld [vmem:[%s10490_s15 + $0x30] sm:$0xff] }
 0x3b5   : > { %v6232_v32 = vpop.f32.mrf.mxu1 }
 0x3b6   : > { %6525 = vrot.lane.b32.xlu0 %v10346_v0, %s8136_s11 }
 0x3b7   : > { %v7741_v22 = vpop.f32.mrf.mxu1 }
 0x3b8   : > { %6527 = vrot.lane.b32.xlu1 %v10351_v59, %s8136_s11  ;;  %v10381_v20 = vadd.f32 %v7741_v22, %v10267_v49  ;;  %v10396_v49 = vadd.f32 %v6232_v32, %v10258_v29 }
 0x3b9   : > { %v6235_v34 = vpop.f32.mrf.mxu1 }
 0x3ba   : > { %6519 = vrot.lane.b32.xlu0 %v10356_v42, %s8136_s11  ;;  %v10391_v58 = vadd.f32 %v6235_v34, %v10261_v28  ;;  %v6318_v34 = vld [vmem:[%s10490_s15 + $0x38] sm:$0xff] }
 0x3bb   : > { %v7744_v62 = vpop.f32.mrf.mxu1 }
 0x3bc   : > { %6539 = vrot.lane.b32.xlu1 %v10361_v31, %s8136_s11  ;;  %v10406_v28 = vadd.f32 %v7744_v62, %v10276_v21  ;;  %v6421_v62 = vadd.f32 1.0, %v10326_v63 }
 0x3bd   : > { %v6248_v6 = vpop.f32.mrf.mxu1 }
 0x3be   : > { %6537 = vrot.lane.b32.xlu0 %v10366_v37, %s8136_s11 }
 0x3bf   : > { %v7745_v50 = vpop.f32.mrf.mxu1 }
 0x3c0   : > { %6535 = vrot.lane.b32.xlu1 %v10371_v44, %s8136_s11  ;;  %v10401_v45 = vadd.f32 %v7745_v50, %v10279_v8  ;;  %v10416_v8 = vadd.f32 %v6248_v6, %v10270_v43 }
 0x3c1   : > { %v6251_v55 = vpop.f32.mrf.mxu1 }
 0x3c2   : > { %6533 = vrot.lane.b32.xlu0 %v10376_v41, %s8136_s11  ;;  %v10411_v29 = vadd.f32 %v6251_v55, %v10273_v15  ;;  %v6315_v55 = vld [vmem:[%s10490_s15 + $0x20] sm:$0xff] }
 0x3c3   : > { %v7748_v14 = vpop.f32.mrf.mxu1 }
 0x3c4   : > { %6547 = vrot.lane.b32.xlu1 %v10381_v20, %s8136_s11  ;;  %v10426_v15 = vadd.f32 %v7748_v14, %v10288_v5  ;;  %v6424_v14 = vadd.f32 1.0, %v10331_v56 }
 0x3c5   : > { %v6264_v26 = vpop.f32.mrf.mxu1 }
 0x3c6   : > { %6545 = vrot.lane.b32.xlu0 %v10386_v18, %s8136_s11 }
 0x3c7   : > { %v7749_v27 = vpop.f32.mrf.mxu1 }
 0x3c8   : > { %6543 = vrot.lane.b32.xlu1 %v10391_v58, %s8136_s11  ;;  %v10421_v21 = vadd.f32 %v7749_v27, %v10291_v23  ;;  %v10436_v23 = vadd.f32 %v6264_v26, %v10282_v39 }
 0x3c9   : > { %v6267_v51 = vpop.f32.mrf.mxu1 }
 0x3ca   : > { %6541 = vrot.lane.b32.xlu0 %v10396_v49, %s8136_s11  ;;  %v10431_v43 = vadd.f32 %v6267_v51, %v10285_v1  ;;  %v7533_v1 = vadd.f32 %v10313_v52, %v10311_v30  ;;  %v7645_v30 = vadd.f32 %v10320_v38, %v10316_v33  ;;  %v6311_v33 = vld [vmem:[%s10490_s15] sm:$0xff] }
 0x3cb   : > { %v7752_v60 = vpop.f32.mrf.mxu1  ;;  %v10503_v38 = vld [vmem:[%s10711_s3] ss:$0 sm:$0xff] }
 0x3cc   : > { %6555 = vrot.lane.b32.xlu1 %v10401_v45, %s8136_s11  ;;  %v10448_v3 = vadd.f32 %v7752_v60, %v10300_v47  ;;  %v6316_v60 = vld [vmem:[%s10490_s15 + $0x28] sm:$0xff] }
 0x3cd   : > { %v6280_v54 = vpop.f32.mrf.mxu1 }
 0x3ce   : > { %6553 = vrot.lane.b32.xlu0 %v10406_v28, %s8136_s11  ;;  %v10459_v48 = vadd.f32 %v6280_v54, %v10294_v36  ;;  %v6427_v54 = vadd.f32 1.0, %v10336_v12  ;;  %v6425_v12 = vadd.f32 1.0, %v10346_v0 }
 0x3cf   : > { %v7753_v35 = vpop.f32.mrf.mxu1 }
 0x3d0   : > { %6551 = vrot.lane.b32.xlu1 %v10411_v29, %s8136_s11  ;;  %v10441_v5 = vadd.f32 %v7753_v35, %v10303_v4  ;;  %v5986_v4 = vadd.f32 %v7533_v1, %v10220_v11 }
 0x3d1   : > { %v6283_v17 = vpop.f32.mrf.mxu1 }
 0x3d2   : > { %6549 = vrot.lane.b32.xlu0 %v10416_v8, %s8136_s11  ;;  %v10453_v53 = vadd.f32 %v6283_v17, %v10297_v24  ;;  %v6147_v52 = vadd.f32 %v7645_v30, %v5986_v4 }
 0x3d3   : > { %v7756_v61 = vpop.f32.mrf.mxu1 }
 0x3d4   : > { %6563 = vrot.lane.b32.xlu1 %v10421_v21, %s8136_s11  ;;  %v10480_v36 = vadd.f32 %v7756_v61, %v10318_v19  ;;  %v6428_v61 = vadd.f32 1.0, %v10341_v25 }
 0x3d5   : > { %v6296_v7 = vpop.f32.mrf.mxu1 }
 0x3d6   : > { %6561 = vrot.lane.b32.xlu0 %v10426_v15, %s8136_s11  ;;  %v10471_v24 = vadd.f32 %v6296_v7, %v10306_v9  ;;  %v10495_v9 = vld [vmem:[%s10710_s2] ss:$0 sm:$0xff] }
 0x3d7   : > { %v7757_v46 = vpop.f32.mrf.mxu1  ;;  %v6350_v2 = vmul.f32 %v10495_v9, %v6311_v33  ;;  %v6353_v22 = vmul.f32 %v10495_v9, %v6314_v10  ;;  %v6356_v50 = vmul.f32 %v10495_v9, %v6317_v13  ;;  %v6357_v16 = vmul.f32 %v10495_v9, %v6318_v34  ;;  %v6322_v33 = vld [vmem:[%s10490_s15 + $0x58] sm:$0xff] }
 0x3d8   : > { %6559 = vrot.lane.b32.xlu1 %v10431_v43, %s8136_s11  ;;  %v10475_v11 = vadd.f32 %v7757_v46, %v6147_v52  ;;  %v6354_v63 = vmul.f32 %v10495_v9, %v6315_v55  ;;  %v6312_v46 = vld [vmem:[%s10490_s15 + $0x8] sm:$0xff]  ;;  %v6355_v30 = vmul.f32 %v10495_v9, %v6316_v60  ;;  %v6361_v34 = vmul.f32 %v10495_v9, %v6322_v33 }
 0x3d9   : > { %v6299_v39 = vpop.f32.mrf.mxu1  ;;  %v6389_v6 = vadd.f32 %v10503_v38, %v6350_v2  ;;  %v6392_v27 = vadd.f32 %v10503_v38, %v6353_v22  ;;  %v6395_v17 = vadd.f32 %v10503_v38, %v6356_v50  ;;  %v6396_v4 = vadd.f32 %v10503_v38, %v6357_v16 }
 0x3da   : > { %6557 = vrot.lane.b32.xlu0 %v10436_v23, %s8136_s11  ;;  %v10464_v47 = vadd.f32 %v6299_v39, %v10309_v40  ;;  %v6313_v40 = vld [vmem:[%s10490_s15 + $0x10] sm:$0xff]  ;;  %v6351_v10 = vmul.f32 %v10495_v9, %v6312_v46  ;;  %v6426_v2 = vadd.f32 1.0, %v10351_v59  ;;  %v6394_v22 = vadd.f32 %v10503_v38, %v6355_v30 }
 0x3db   : > { %v6352_v19 = vmul.f32 %v10495_v9, %v6313_v40  ;;  %v6453_v35 = vmul.f32 %v6421_v62, %v6389_v6  ;;  %v6456_v39 = vmul.f32 %v6424_v14, %v6392_v27  ;;  %v6393_v40 = vadd.f32 %v10503_v38, %v6354_v63  ;;  %v6320_v62 = vld [vmem:[%s10490_s15 + $0x48] sm:$0xff]  ;;  %v6325_v30 = vld [vmem:[%s10490_s15 + $0x70] sm:$0xff] }
 0x3dc   : > { %6571 = vrot.lane.b32.xlu1 %v10441_v5, %s8136_s11  ;;  %v6422_v55 = vadd.f32 1.0, %v10356_v42  ;;  %v6390_v14 = vadd.f32 %v10503_v38, %v6351_v10  ;;  %v6359_v16 = vmul.f32 %v10495_v9, %v6320_v62  ;;  %v6432_v63 = vadd.f32 1.0, %v10361_v31 }
 0x3dd   : > { %v6391_v32 = vadd.f32 %v10503_v38, %v6352_v19  ;;  %v6459_v19 = vmul.f32 %v6427_v54, %v6395_v17  ;;  %v6457_v50 = vmul.f32 %v6425_v12, %v6393_v40  ;;  %v6458_v42 = vmul.f32 %v6426_v2, %v6394_v22  ;;  %v6326_v17 = vld [vmem:[%s10490_s15 + $0x78] sm:$0xff] }
 0x3de   : > { %6569 = vrot.lane.b32.xlu0 %v10448_v3, %s8136_s11  ;;  %v6400_v54 = vadd.f32 %v10503_v38, %v6361_v34  ;;  %v6429_v40 = vadd.f32 1.0, %v10376_v41  ;;  %v6364_v2 = vmul.f32 %v10495_v9, %v6325_v30  ;;  %v6435_v62 = vadd.f32 1.0, %v10386_v18 }
 0x3df   : > { %v6455_v26 = vmul.f32 %v6423_v57, %v6391_v32  ;;  %v6321_v57 = vld [vmem:[%s10490_s15 + $0x50] sm:$0xff]  ;;  %v6460_v32 = vmul.f32 %v6428_v61, %v6396_v4  ;;  %v6398_v4 = vadd.f32 %v10503_v38, %v6359_v16  ;;  %v6439_v30 = vadd.f32 1.0, %v10406_v28 }
 0x3e0   : > { %6567 = vrot.lane.b32.xlu1 %v10453_v53, %s8136_s11  ;;  %v6464_v12 = vmul.f32 %v6432_v63, %v6400_v54  ;;  %v6329_v16 = vld [vmem:[%s10490_s15 + $0x90] sm:$0xff]  ;;  %v6433_v54 = vadd.f32 1.0, %v10396_v49 }
 0x3e2   : > { %6565 = vrot.lane.b32.xlu0 %v10459_v48, %s8136_s11 }
 0x3e4   : > { %6575 = vrot.lane.b32.xlu1 %v10464_v47, %s8136_s11 }
 0x3e6   : > { %6573 = vrot.lane.b32.xlu0 %v10471_v24, %s8136_s11 }
 0x3e8   : > { %6579 = vrot.lane.b32.xlu1 %v10475_v11, %s8136_s11 }
 0x3ea   : > { %6577 = vrot.lane.b32.xlu0 %v10480_v36, %s8136_s11 }
 0x41e   : > { %v6522_v51 = vpop.permute.xlu1 %6521 }
 0x41f   : > { %v6615_v56 = vadd.f32 %v6522_v51, %v6455_v26  ;;  %v6360_v26 = vmul.f32 %v10495_v9, %v6321_v57  ;;  %v6319_v51 = vld [vmem:[%s10490_s15 + $0x40] sm:$0xff] }
 0x420   : > { %v6518_v7 = vpop.permute.xlu0 %6517  ;;  %v6358_v46 = vmul.f32 %v10495_v9, %v6319_v51 }
 0x421   : > { %6648 = vst.msk [vmem:[%s10522_s21 + $0x10] sm:$0xff] %vm6645_vm2, %v6615_v56  ;;  %v6613_v1 = vadd.f32 %v6518_v7, %v6453_v35  ;;  %v6431_v56 = vadd.f32 1.0, %v10366_v37  ;;  %v6454_v7 = vmul.f32 %v6422_v55, %v6390_v14  ;;  %v6399_v31 = vadd.f32 %v10503_v38, %v6360_v26 }
 0x422   : > { %v6524_v52 = vpop.permute.xlu1 %6523  ;;  %v6397_v10 = vadd.f32 %v10503_v38, %v6358_v46  ;;  %v6434_v26 = vadd.f32 1.0, %v10391_v58  ;;  %v6327_v46 = vld [vmem:[%s10490_s15 + $0x80] sm:$0xff] }
 0x423   : > { %6646 = vst.msk [vmem:[%s10522_s21] sm:$0xff] %vm6645_vm2, %v6613_v1  ;;  %v6616_v25 = vadd.f32 %v6524_v52, %v6456_v39  ;;  %v6430_v1 = vadd.f32 1.0, %v10371_v44  ;;  %v6365_v52 = vmul.f32 %v10495_v9, %v6326_v17 }
 0x424   : > { %v6530_v13 = vpop.permute.xlu0 %6529 }
 0x425   : > { %6649 = vst.msk [vmem:[%s10522_s21 + $0x18] sm:$0xff] %vm6645_vm2, %v6616_v25  ;;  %v6619_v0 = vadd.f32 %v6530_v13, %v6459_v19  ;;  %v6324_v25 = vld [vmem:[%s10490_s15 + $0x68] sm:$0xff]  ;;  %v6463_v19 = vmul.f32 %v6431_v56, %v6399_v31  ;;  %v6462_v57 = vmul.f32 %v6430_v1, %v6398_v4  ;;  %v6404_v22 = vadd.f32 %v10503_v38, %v6365_v52 }
 0x426   : > { %v6532_v6 = vpop.permute.xlu1 %6531  ;;  %v6363_v34 = vmul.f32 %v10495_v9, %v6324_v25  ;;  %v6440_v1 = vadd.f32 1.0, %v10401_v45  ;;  %v6438_v25 = vadd.f32 1.0, %v10411_v29 }
 0x427   : > { %6652 = vst.msk [vmem:[%s10522_s21 + $0x30] sm:$0xff] %vm6645_vm2, %v6619_v0  ;;  %v6620_v59 = vadd.f32 %v6532_v6, %v6460_v32  ;;  %v6323_v0 = vld [vmem:[%s10490_s15 + $0x60] sm:$0xff]  ;;  %v6436_v32 = vadd.f32 1.0, %v10381_v20  ;;  %v6403_v20 = vadd.f32 %v10503_v38, %v6364_v2 }
 0x428   : > { %v6526_v27 = vpop.permute.xlu0 %6525  ;;  %v6362_v14 = vmul.f32 %v10495_v9, %v6323_v0  ;;  %v6402_v63 = vadd.f32 %v10503_v38, %v6363_v34 }
 0x429   : > { %6653 = vst.msk [vmem:[%s10522_s21 + $0x38] sm:$0xff] %vm6645_vm2, %v6620_v59  ;;  %v6617_v60 = vadd.f32 %v6526_v27, %v6457_v50  ;;  %v6330_v50 = vld [vmem:[%s10490_s15 + $0x98] sm:$0xff]  ;;  %v6461_v59 = vmul.f32 %v6429_v40, %v6397_v10  ;;  %v6468_v51 = vmul.f32 %v6436_v32, %v6404_v22  ;;  %v6333_v10 = vld [vmem:[%s10490_s15 + $0xb0] sm:$0xff]  ;;  %v6332_v32 = vld [vmem:[%s10490_s15 + $0xa8] sm:$0xff] }
 0x42a   : > { %v6528_v35 = vpop.permute.xlu1 %6527  ;;  %v6401_v17 = vadd.f32 %v10503_v38, %v6362_v14  ;;  %v6372_v34 = vmul.f32 %v10495_v9, %v6333_v10  ;;  %v6443_v14 = vadd.f32 1.0, %v10426_v15 }
 0x42b   : > { %6650 = vst.msk [vmem:[%s10522_s21 + $0x20] sm:$0xff] %vm6645_vm2, %v6617_v60  ;;  %v6618_v61 = vadd.f32 %v6528_v35, %v6458_v42  ;;  %v6369_v60 = vmul.f32 %v10495_v9, %v6330_v50  ;;  %v6328_v42 = vld [vmem:[%s10490_s15 + $0x88] sm:$0xff]  ;;  %v6467_v35 = vmul.f32 %v6435_v62, %v6403_v20  ;;  %v6331_v50 = vld [vmem:[%s10490_s15 + $0xa0] sm:$0xff]  ;;  %v6371_v20 = vmul.f32 %v10495_v9, %v6332_v32  ;;  %v6342_v32 = vld [vmem:[%s10490_s15 + $0xf8] sm:$0xff] }
 0x42c   : > { %v6520_v39 = vpop.permute.xlu0 %6519  ;;  %v6367_v31 = vmul.f32 %v10495_v9, %v6328_v42  ;;  %v6465_v40 = vmul.f32 %v6433_v54, %v6401_v17  ;;  %v6337_v42 = vld [vmem:[%s10490_s15 + $0xd0] sm:$0xff]  ;;  %v6441_v17 = vadd.f32 1.0, %v10436_v23 }
 0x42d   : > { %6651 = vst.msk [vmem:[%s10522_s21 + $0x28] sm:$0xff] %vm6645_vm2, %v6618_v61  ;;  %v6614_v37 = vadd.f32 %v6520_v39, %v6454_v7  ;;  %v6368_v61 = vmul.f32 %v10495_v9, %v6329_v16  ;;  %v6466_v39 = vmul.f32 %v6434_v26, %v6402_v63  ;;  %v6408_v4 = vadd.f32 %v10503_v38, %v6369_v60 }
 0x42e   : > { %v6540_v33 = vpop.permute.xlu1 %6539  ;;  %v6442_v63 = vadd.f32 1.0, %v10431_v43 }
 0x42f   : > { %6647 = vst.msk [vmem:[%s10522_s21 + $0x8] sm:$0xff] %vm6645_vm2, %v6614_v37  ;;  %v6624_v44 = vadd.f32 %v6540_v33, %v6464_v12  ;;  %v6334_v12 = vld [vmem:[%s10490_s15 + $0xb8] sm:$0xff]  ;;  %v6407_v45 = vadd.f32 %v10503_v38, %v6368_v61  ;;  %v6366_v33 = vmul.f32 %v10495_v9, %v6327_v46  ;;  %v6472_v2 = vmul.f32 %v6440_v1, %v6408_v4 }
 0x430   : > { %v6538_v13 = vpop.permute.xlu0 %6537  ;;  %v6376_v46 = vmul.f32 %v10495_v9, %v6337_v42  ;;  %v6448_v4 = vadd.f32 1.0, %v10441_v5 }
 0x431   : > { %6657 = vst.msk [vmem:[%s10522_s21 + $0x58] sm:$0xff] %vm6645_vm2, %v6624_v44  ;;  %v6623_v41 = vadd.f32 %v6538_v13, %v6463_v19  ;;  %v6406_v19 = vadd.f32 %v10503_v38, %v6367_v31  ;;  %v6373_v13 = vmul.f32 %v10495_v9, %v6334_v12  ;;  %v6405_v22 = vadd.f32 %v10503_v38, %v6366_v33 }
 0x432   : > { %v6536_v6 = vpop.permute.xlu1 %6535  ;;  %v6447_v12 = vadd.f32 1.0, %v10448_v3  ;;  %v6415_v5 = vadd.f32 %v10503_v38, %v6376_v46 }
 0x433   : > { %6656 = vst.msk [vmem:[%s10522_s21 + $0x50] sm:$0xff] %vm6645_vm2, %v6623_v41  ;;  %v6622_v55 = vadd.f32 %v6536_v6, %v6462_v57  ;;  %v6437_v57 = vadd.f32 1.0, %v10416_v8  ;;  %v6471_v41 = vmul.f32 %v6439_v30, %v6407_v45  ;;  %v6470_v6 = vmul.f32 %v6438_v25, %v6406_v19 }
 0x434   : > { %v6534_v27 = vpop.permute.xlu0 %6533 }
 0x435   : > { %6655 = vst.msk [vmem:[%s10522_s21 + $0x48] sm:$0xff] %vm6645_vm2, %v6622_v55  ;;  %v6621_v18 = vadd.f32 %v6534_v27, %v6461_v59  ;;  %v6444_v55 = vadd.f32 1.0, %v10421_v21  ;;  %v6412_v59 = vadd.f32 %v10503_v38, %v6373_v13  ;;  %v6338_v27 = vld [vmem:[%s10490_s15 + $0xd8] sm:$0xff]  ;;  %v6411_v21 = vadd.f32 %v10503_v38, %v6372_v34 }
 0x436   : > { %v6548_v56 = vpop.permute.xlu1 %6547 }
 0x437   : > { %6654 = vst.msk [vmem:[%s10522_s21 + $0x40] sm:$0xff] %vm6645_vm2, %v6621_v18  ;;  %v6628_v58 = vadd.f32 %v6548_v56, %v6468_v51  ;;  %v6469_v18 = vmul.f32 %v6437_v57, %v6405_v22  ;;  %v6370_v51 = vmul.f32 %v10495_v9, %v6331_v50  ;;  %v6476_v54 = vmul.f32 %v6444_v55, %v6412_v59 }
 0x438   : > { %v6546_v7 = vpop.permute.xlu0 %6545  ;;  %v6410_v56 = vadd.f32 %v10503_v38, %v6371_v20  ;;  %v6445_v57 = vadd.f32 1.0, %v10459_v48  ;;  %v6450_v50 = vadd.f32 1.0, %v10464_v47  ;;  %v6449_v59 = vadd.f32 1.0, %v10471_v24 }
 0x439   : > { %6661 = vst.msk [vmem:[%s10522_s21 + $0x78] sm:$0xff] %vm6645_vm2, %v6628_v58  ;;  %v6627_v49 = vadd.f32 %v6546_v7, %v6467_v35  ;;  %v6377_v58 = vmul.f32 %v10495_v9, %v6338_v27  ;;  %v6336_v35 = vld [vmem:[%s10490_s15 + $0xc8] sm:$0xff]  ;;  %v6475_v7 = vmul.f32 %v6443_v14, %v6411_v21  ;;  %v6409_v31 = vadd.f32 %v10503_v38, %v6370_v51 }
 0x43a   : > { %v6544_v37 = vpop.permute.xlu1 %6543  ;;  %v6474_v30 = vmul.f32 %v6442_v63, %v6410_v56 }
 0x43b   : > { %6660 = vst.msk [vmem:[%s10522_s21 + $0x70] sm:$0xff] %vm6645_vm2, %v6627_v49  ;;  %v6626_v52 = vadd.f32 %v6544_v37, %v6466_v39  ;;  %v6375_v49 = vmul.f32 %v10495_v9, %v6336_v35  ;;  %v6335_v39 = vld [vmem:[%s10490_s15 + $0xc0] sm:$0xff]  ;;  %v6416_v37 = vadd.f32 %v10503_v38, %v6377_v58  ;;  %v6473_v33 = vmul.f32 %v6441_v17, %v6409_v31 }
 0x43c   : > { %v6542_v44 = vpop.permute.xlu0 %6541  ;;  %v6374_v25 = vmul.f32 %v10495_v9, %v6335_v39 }
 0x43d   : > { %6659 = vst.msk [vmem:[%s10522_s21 + $0x68] sm:$0xff] %vm6645_vm2, %v6626_v52  ;;  %v6625_v28 = vadd.f32 %v6542_v44, %v6465_v40  ;;  %v6340_v40 = vld [vmem:[%s10490_s15 + $0xe8] sm:$0xff]  ;;  %v6446_v44 = vadd.f32 1.0, %v10453_v53  ;;  %v6414_v10 = vadd.f32 %v10503_v38, %v6375_v49 }
 0x43e   : > { %v6556_v0 = vpop.permute.xlu1 %6555  ;;  %v6379_v13 = vmul.f32 %v10495_v9, %v6340_v40 }
 0x43f   : > { %6658 = vst.msk [vmem:[%s10522_s21 + $0x60] sm:$0xff] %vm6645_vm2, %v6625_v28  ;;  %v6632_v29 = vadd.f32 %v6556_v0, %v6472_v2  ;;  %v6339_v28 = vld [vmem:[%s10490_s15 + $0xe0] sm:$0xff]  ;;  %v6480_v2 = vmul.f32 %v6448_v4, %v6416_v37 }
 0x440   : > { %v6554_v62 = vpop.permute.xlu0 %6553  ;;  %v6378_v22 = vmul.f32 %v10495_v9, %v6339_v28  ;;  %v6418_v55 = vadd.f32 %v10503_v38, %v6379_v13 }
 0x441   : > { %6665 = vst.msk [vmem:[%s10522_s21 + $0x98] sm:$0xff] %vm6645_vm2, %v6632_v29  ;;  %v6631_v8 = vadd.f32 %v6554_v62, %v6471_v41  ;;  %v6479_v29 = vmul.f32 %v6447_v12, %v6415_v5  ;;  %v6413_v41 = vadd.f32 %v10503_v38, %v6374_v25  ;;  %v6478_v62 = vmul.f32 %v6446_v44, %v6414_v10 }
 0x442   : > { %v6552_v26 = vpop.permute.xlu1 %6551  ;;  %v6417_v27 = vadd.f32 %v10503_v38, %v6378_v22  ;;  %v6482_v51 = vmul.f32 %v6450_v50, %v6418_v55 }
 0x443   : > { %6664 = vst.msk [vmem:[%s10522_s21 + $0x90] sm:$0xff] %vm6645_vm2, %v6631_v8  ;;  %v6630_v16 = vadd.f32 %v6552_v26, %v6470_v6  ;;  %v6341_v6 = vld [vmem:[%s10490_s15 + $0xf0] sm:$0xff]  ;;  %v6381_v8 = vmul.f32 %v10495_v9, %v6342_v32  ;;  %v6477_v26 = vmul.f32 %v6445_v57, %v6413_v41 }
 0x444   : > { %v6550_v60 = vpop.permute.xlu0 %6549  ;;  %v6380_v47 = vmul.f32 %v10495_v9, %v6341_v6 }
 0x445   : > { %6663 = vst.msk [vmem:[%s10522_s21 + $0x88] sm:$0xff] %vm6645_vm2, %v6630_v16  ;;  %v6629_v15 = vadd.f32 %v6550_v60, %v6469_v18  ;;  %v6452_v18 = vadd.f32 1.0, %v10475_v11  ;;  %v6420_v24 = vadd.f32 %v10503_v38, %v6381_v8  ;;  %v6451_v60 = vadd.f32 1.0, %v10480_v36 }
 0x446   : > { %v6564_v61 = vpop.permute.xlu1 %6563  ;;  %v6419_v9 = vadd.f32 %v10503_v38, %v6380_v47 }
 0x447   : > { %6662 = vst.msk [vmem:[%s10522_s21 + $0x80] sm:$0xff] %vm6645_vm2, %v6629_v15  ;;  %v6636_v43 = vadd.f32 %v6564_v61, %v6476_v54  ;;  %v6481_v15 = vmul.f32 %v6449_v59, %v6417_v27  ;;  %v6484_v56 = vmul.f32 %v6452_v18, %v6420_v24 }
 0x448   : > { %v6562_v1 = vpop.permute.xlu0 %6561  ;;  %v6483_v17 = vmul.f32 %v6451_v60, %v6419_v9 }
 0x449   : > { %6669 = vst.msk [vmem:[%s10522_s21 + $0xb8] sm:$0xff] %vm6645_vm2, %v6636_v43  ;;  %v6635_v23 = vadd.f32 %v6562_v1, %v6475_v7 }
 0x44a   : > { %v6560_v52 = vpop.permute.xlu1 %6559 }
 0x44b   : > { %6668 = vst.msk [vmem:[%s10522_s21 + $0xb0] sm:$0xff] %vm6645_vm2, %v6635_v23  ;;  %v6634_v45 = vadd.f32 %v6560_v52, %v6474_v30 }
 0x44c   : > { %v6558_v19 = vpop.permute.xlu0 %6557 }
 0x44d   : > { %6667 = vst.msk [vmem:[%s10522_s21 + $0xa8] sm:$0xff] %vm6645_vm2, %v6634_v45  ;;  %v6633_v3 = vadd.f32 %v6558_v19, %v6473_v33 }
 0x44e   : > { %v6572_v0 = vpop.permute.xlu1 %6571 }
 0x44f   : > { %6666 = vst.msk [vmem:[%s10522_s21 + $0xa0] sm:$0xff] %vm6645_vm2, %v6633_v3  ;;  %v6640_v53 = vadd.f32 %v6572_v0, %v6480_v2 }
 0x450   : > { %v6570_v34 = vpop.permute.xlu0 %6569 }
 0x451   : > { %6673 = vst.msk [vmem:[%s10522_s21 + $0xd8] sm:$0xff] %vm6645_vm2, %v6640_v53  ;;  %v6639_v48 = vadd.f32 %v6570_v34, %v6479_v29 }
 0x452   : > { %v6568_v20 = vpop.permute.xlu1 %6567 }
 0x453   : > { %6672 = vst.msk [vmem:[%s10522_s21 + $0xd0] sm:$0xff] %vm6645_vm2, %v6639_v48  ;;  %v6638_v14 = vadd.f32 %v6568_v20, %v6478_v62 }
 0x454   : > { %v6566_v16 = vpop.permute.xlu0 %6565 }
 0x455   : > { %6671 = vst.msk [vmem:[%s10522_s21 + $0xc8] sm:$0xff] %vm6645_vm2, %v6638_v14  ;;  %v6637_v21 = vadd.f32 %v6566_v16, %v6477_v26 }
 0x456   : > { %v6576_v63 = vpop.permute.xlu1 %6575 }
 0x457   : > { %6670 = vst.msk [vmem:[%s10522_s21 + $0xc0] sm:$0xff] %vm6645_vm2, %v6637_v21  ;;  %v6642_v42 = vadd.f32 %v6576_v63, %v6482_v51 }
 0x458   : > { %v6574_v54 = vpop.permute.xlu0 %6573 }
 0x459   : > { %6675 = vst.msk [vmem:[%s10522_s21 + $0xe8] sm:$0xff] %vm6645_vm2, %v6642_v42  ;;  %v6641_v11 = vadd.f32 %v6574_v54, %v6481_v15 }
 0x45a   : > { %v6580_v58 = vpop.permute.xlu1 %6579 }
 0x45b   : > { %6674 = vst.msk [vmem:[%s10522_s21 + $0xe0] sm:$0xff] %vm6645_vm2, %v6641_v11  ;;  %v6644_v35 = vadd.f32 %v6580_v58, %v6484_v56 }
 0x45c   : > { %v6578_v61 = vpop.permute.xlu0 %6577 }
 0x45d   : > { %6677 = vst.msk [vmem:[%s10522_s21 + $0xf8] sm:$0xff] %vm6645_vm2, %v6644_v35  ;;  %v6643_v36 = vadd.f32 %v6578_v61, %v6483_v17 }
 0x45f   : > { %6676 = vst.msk [vmem:[%s10522_s21 + $0xf0] sm:$0xff] %vm6645_vm2, %v6643_v36 }
 0x460 PF: > { %s18_s29 = sadd.s32 1, %s8132_s29   ;;  %s10948_s27 = smov %s8128_s28 }
 0x461   : > { %p15_p5 = scmp.ge.s32.totalorder %s18_s29, 4   ;;  %s10949_s28 = smov %s10951_s30 }
 0x463   :  { %17 = sbr.rel (!%p15_p5) target bundleno = 2 (0x2), region = 92 }

</bundles_post_ra>
